<compile_context>
chip_gen: v7x
topology: tpu7x:2x2x1
jax: 0.10.0
libtpu: 0.0.40
codegen_flags: <defaults>
</compile_context>

<pallas_src>
import jax
import jax.numpy as jnp
from jax.experimental import pallas as pl
from jax.experimental.pallas import tpu as pltpu

jax.config.update("jax_default_matmul_precision", "highest")

OUT_DIM = 42     # fixed by the Seq2Seq module (42 output classes / one-hot input)


def _round_up(x, m):
    return ((x + m - 1) // m) * m


def _make_seq2seq_kernel(L, B, S, H, Hp, I, Ip):
    """B here is the sublane-padded batch. Hp = lane-padded hidden (gate width)."""
    twoH = 2 * H

    def kernel(enc_ref, h0_ref, gru_ref, misc_ref, out_ref, h_scr, x_scr):
        t = pl.program_id(0)

        @pl.when(t == 0)
        def _init():
            h_scr[...] = h0_ref[...]
            lane0 = jax.lax.broadcasted_iota(jnp.int32, (B, Ip), 1)
            x_scr[...] = (lane0 == (I - 1)).astype(jnp.float32)   # start token one-hot

        # ---------------- attention over encoder states -------------------
        hid0 = h_scr[0]                               # (B, Hp)   (pad lanes are 0)
        enc = enc_ref[...]                            # (B, S, 2H)
        weh = misc_ref[Hp + 1:Hp + 2, :]              # (1, Hp)   hidden part of energy_w
        wee = misc_ref[Hp + 2:Hp + 3, 0:twoH]         # (1, 2H)   encoder part of energy_w
        eb = misc_ref[Hp + 3:Hp + 4, 0:1]             # (1, 1)    energy bias

        score_h = jnp.sum(hid0 * weh, axis=-1, keepdims=True)      # (B, 1)
        score_e = jnp.sum(enc * wee[None, :, :], axis=-1)          # (B, S)
        energy = jnp.tanh(score_h + score_e + eb)                  # (B, S)

        m = jnp.max(energy, axis=1, keepdims=True)                 # softmax over seq
        p = jnp.exp(energy - m)
        attn = p / jnp.sum(p, axis=1, keepdims=True)               # (B, S)
        context = jnp.sum(attn[:, :, None] * enc, axis=1)          # (B, 2H)

        # ---------------- stacked GRU, single timestep ---------------------
        x_prev = None
        for l in range(L):
            h = h_scr[l]                                           # (B, Hp)
            if l == 0:
                # concat([context, x]) replaced by two dots (review item)
                gi = (jnp.dot(context, gru_ref[l, 0:twoH, :],
                              preferred_element_type=jnp.float32)
                      + jnp.dot(x_scr[...], gru_ref[l, twoH:twoH + Ip, :],
                                preferred_element_type=jnp.float32))
            else:
                gi = jnp.dot(x_prev, gru_ref[l, 0:Hp, :],
                             preferred_element_type=jnp.float32)
            gi = gi + gru_ref[l, 2 * Hp:2 * Hp + 1, :]             # + b_ih
            gh = (jnp.dot(h, gru_ref[l, Hp:2 * Hp, :],
                          preferred_element_type=jnp.float32)
                  + gru_ref[l, 2 * Hp + 1:2 * Hp + 2, :])          # + b_hh

            # gate slices are 128-lane aligned (Hp = 128)
            r = jax.nn.sigmoid(gi[:, 0:Hp] + gh[:, 0:Hp])
            z = jax.nn.sigmoid(gi[:, Hp:2 * Hp] + gh[:, Hp:2 * Hp])
            n = jnp.tanh(gi[:, 2 * Hp:3 * Hp] + r * gh[:, 2 * Hp:3 * Hp])
            h_new = (1.0 - z) * n + z * h
            h_scr[l] = h_new
            x_prev = h_new
            # TODO(synk): inter-layer dropout is train-only; eval semantics used here.

        # ---------------- output projection (lane-dense 128-wide store) ----
        logits = (jnp.dot(x_prev, misc_ref[0:Hp, :],
                          preferred_element_type=jnp.float32)
                  + misc_ref[Hp:Hp + 1, :])                        # (B, 128), pads=-1e30
        out_ref[0] = logits

        # ---------------- greedy feedback: one_hot(argmax(preds)) ----------
        mmax = jnp.max(logits, axis=-1, keepdims=True)
        lane = jax.lax.broadcasted_iota(jnp.int32, logits.shape, 1)
        big = jnp.int32(2 ** 30)
        idx = jnp.min(jnp.where(logits == mmax, lane, big),
                      axis=-1, keepdims=True)                      # first-max index
        lane_x = jax.lax.broadcasted_iota(jnp.int32, (B, Ip), 1)
        x_scr[...] = (lane_x == idx).astype(jnp.float32)
        # TODO(synk): stochastic teacher forcing (random.uniform < ratio) with a given
        # trgt is not implemented; this is the trgt=None / teacher_force_ratio==0 path.

    return kernel


def seq2seq_forward(enc_states, enc_hidden, params, n_dec_layers, trgt_len):
    """Greedy Seq2Seq decode. enc_states: (B,S,2H), enc_hidden: (1,B,H).
    Returns outputs (B, trgt_len, 42)."""
    B, S, twoH = enc_states.shape
    H = twoH // 2
    L = n_dec_layers
    I = O = OUT_DIM
    assert H % 8 == 0 and 2 * H <= 128, "packing below assumes H<=64, H%8==0"

    Hp = 128                        # lane-padded hidden / per-gate width
    Ip = _round_up(I, 8)            # 48
    Op = 128                        # lane-dense output width
    Bp = max(8, _round_up(B, 8))    # fill f32 sublanes
    TH = 3 * Hp
    f32 = jnp.float32

    # ---- batch / hidden padding (zeros stay zero through the GRU) ---------
    encp = jnp.zeros((Bp, S, twoH), f32).at[:B].set(enc_states.astype(f32))
    h0 = jnp.zeros((L, Bp, Hp), f32)
    h0 = h0.at[0, :B, :H].set(enc_hidden[0].astype(f32))   # layers>0 zero (Seq2Seq pad)

    # ---- pack GRU weights into ONE slab, gate blocks lane-aligned ---------
    def gate_pad(wT):               # (rows, 3H) -> (rows, 3Hp)
        rows = wT.shape[0]
        out = jnp.zeros((rows, TH), f32)
        for g in range(3):
            out = out.at[:, g * Hp:g * Hp + H].set(wT[:, g * H:(g + 1) * H])
        return out

    gru_rows = 2 * Hp + 8
    gru_slab = jnp.zeros((L, gru_rows, TH), f32)
    for l in range(L):
        g = params["gru"][l]
        wihT = gate_pad(g["w_ih"].T.astype(f32))
        whhT = gate_pad(g["w_hh"].T.astype(f32))
        if l == 0:
            gru_slab = gru_slab.at[l, 0:2 * H, :].set(wihT[0:2 * H])          # context part
            gru_slab = gru_slab.at[l, 2 * H:2 * H + I, :].set(wihT[2 * H:])   # input part
        else:
            gru_slab = gru_slab.at[l, 0:H, :].set(wihT)
        gru_slab = gru_slab.at[l, Hp:Hp + H, :].set(whhT)
        gru_slab = gru_slab.at[l, 2 * Hp, :].set(gate_pad(g["b_ih"].reshape(1, -1))[0])
        gru_slab = gru_slab.at[l, 2 * Hp + 1, :].set(gate_pad(g["b_hh"].reshape(1, -1))[0])

    # ---- misc slab: fc_out + attention params ------------------------------
    misc = jnp.zeros((Hp + 8, Op), f32)
    misc = misc.at[0:H, 0:O].set(params["fc_w"].T.astype(f32))      # (H, O) fc weight
    misc = misc.at[Hp, :].set(jnp.full((Op,), -1e30, f32))          # pad logits -> -inf-ish
    misc = misc.at[Hp, 0:O].set(params["fc_b"].astype(f32))
    misc = misc.at[Hp + 1, 0:H].set(params["energy_w"][0, 0:H].astype(f32))
    misc = misc.at[Hp + 2, 0:2 * H].set(params["energy_w"][0, H:3 * H].astype(f32))
    misc = misc.at[Hp + 3, 0].set(params["energy_b"].reshape(())[()].astype(f32))

    T = trgt_len
    kernel = _make_seq2seq_kernel(L, Bp, S, H, Hp, I, Ip)

    out = pl.pallas_call(
        kernel,
        out_shape=jax.ShapeDtypeStruct((T - 1, Bp, Op), f32),
        grid=(T - 1,),
        in_specs=[
            pl.BlockSpec((Bp, S, twoH), lambda t: (0, 0, 0)),        # enc (resident)
            pl.BlockSpec((L, Bp, Hp), lambda t: (0, 0, 0)),          # initial hidden
            pl.BlockSpec((L, gru_rows, TH), lambda t: (0, 0, 0)),    # GRU slab (resident)
            pl.BlockSpec((Hp + 8, Op), lambda t: (0, 0)),            # fc/attn slab
        ],
        out_specs=pl.BlockSpec((1, Bp, Op), lambda t: (t, 0, 0)),
        scratch_shapes=[
            pltpu.VMEM((L, Bp, Hp), f32),   # hidden state, persists across timesteps
            pltpu.VMEM((Bp, Ip), f32),      # fed-back one-hot token, persists
        ],
        compiler_params=pltpu.CompilerParams(
            dimension_semantics=("arbitrary",)),   # sequential recurrence over timesteps
    )(encp, h0, gru_slab, misc)

    preds = jnp.transpose(out[:, :B, :O], (1, 0, 2))                 # (B, T-1, 42)
    start = jnp.zeros((B, 1, O), f32).at[:, :, O - 1].set(1.0)       # outputs[:, 0]
    return jnp.concatenate([start, preds], axis=1)                   # (B, T, 42)


# ----------------------------- pure-JAX reference ---------------------------
def _decoder_step_ref(x, enc_states, hidden, params):
    B, S, twoH = enc_states.shape
    H = twoH // 2
    hidden0 = hidden[0]
    hid_rep = jnp.broadcast_to(hidden0[None], (S, B, H))
    enc_t = jnp.transpose(enc_states, (1, 0, 2))
    e_inp = jnp.concatenate([hid_rep, enc_t], axis=2)                  # (S,B,3H)
    energy = jnp.tanh(e_inp @ params["energy_w"].T + params["energy_b"])
    attention = jax.nn.softmax(energy, axis=0)
    attention = jnp.transpose(attention, (1, 2, 0))                    # (B,1,S)
    context = jnp.einsum("bos,bsh->boh", attention, enc_states)[:, 0]  # (B,2H)
    h_in = jnp.concatenate([context, x], axis=1)
    nh = []
    for l in range(hidden.shape[0]):
        g = params["gru"][l]
        h = hidden[l]
        gi = h_in @ g["w_ih"].T + g["b_ih"]
        gh = h @ g["w_hh"].T + g["b_hh"]
        r = jax.nn.sigmoid(gi[:, :H] + gh[:, :H])
        z = jax.nn.sigmoid(gi[:, H:2 * H] + gh[:, H:2 * H])
        n = jnp.tanh(gi[:, 2 * H:] + r * gh[:, 2 * H:])
        h_new = (1.0 - z) * n + z * h
        nh.append(h_new)
        h_in = h_new
    preds = h_in @ params["fc_w"].T + params["fc_b"]
    return preds, jnp.stack(nh, axis=0)


def seq2seq_reference(enc_states, enc_hidden, params, n_dec_layers, trgt_len):
    B = enc_states.shape[0]
    H = enc_states.shape[2] // 2
    hidden = jnp.zeros((n_dec_layers, B, H), jnp.float32).at[0].set(
        enc_hidden[0].astype(jnp.float32))
    x = jnp.zeros((B, OUT_DIM), jnp.float32).at[:, OUT_DIM - 1].set(1.0)
    outs = [x]
    enc_f32 = enc_states.astype(jnp.float32)
    for _ in range(1, trgt_len):
        preds, hidden = _decoder_step_ref(x, enc_f32, hidden, params)
        outs.append(preds)
        idx = jnp.argmax(preds, axis=1)
        x = jax.nn.one_hot(idx, OUT_DIM, dtype=jnp.float32)
    return jnp.stack(outs, axis=1)                                     # (B,T,42)


def init_params(key, input_dim, output_dim, hid_dim, n_layers):
    H = hid_dim
    k = float(1.0 / (H ** 0.5))
    keys = jax.random.split(key, 4 + 4 * n_layers)

    def u(kk, shape):
        return jax.random.uniform(kk, shape, jnp.float32, minval=-k, maxval=k)

    params = {
        "energy_w": u(keys[0], (1, 3 * H)),
        "energy_b": u(keys[1], (1,)),
        "fc_w": u(keys[2], (output_dim, H)),
        "fc_b": u(keys[3], (output_dim,)),
        "gru": [],
    }
    for l in range(n_layers):
        in_l = 2 * H + input_dim if l == 0 else H
        kk = keys[4 + 4 * l: 8 + 4 * l]
        params["gru"].append({
            "w_ih": u(kk[0], (3 * H, in_l)),
            "w_hh": u(kk[1], (3 * H, H)),
            "b_ih": u(kk[2], (3 * H,)),
            "b_hh": u(kk[3], (3 * H,)),
        })
    return params


if __name__ == "__main__":
    # TODO(synk): the encoder is a separate external module; we feed its outputs
    # (enc_states, hidden) directly, exactly what Seq2Seq.forward consumes.
    B, S, H, L = 2, 8, 32, 2      # batch, vid_seq_len, hid_dim, num_dec_layers
    T = 16                        # trgt_len (spec default is 100; small for the test)

    key = jax.random.PRNGKey(0)
    k_enc, k_hid, k_par = jax.random.split(key, 3)
    enc_states = jax.random.normal(k_enc, (B, S, 2 * H), jnp.float32)
    enc_hidden = jax.random.normal(k_hid, (1, B, H), jnp.float32)
    params = init_params(k_par, OUT_DIM, OUT_DIM, H, L)

    outputs = seq2seq_forward(enc_states, enc_hidden, params, L, T)
    jax.block_until_ready(outputs)

    outputs_ref = seq2seq_reference(enc_states, enc_hidden, params, L, T)
    assert outputs.shape == (B, T, OUT_DIM)
    assert jnp.allclose(outputs, outputs_ref, atol=5e-3, rtol=5e-3), \
        float(jnp.max(jnp.abs(outputs - outputs_ref)))
    print("KERNEL_OK")
</pallas_src>

<mosaic_0001>
module attributes {stable_mosaic.version = 11 : i64} {
  func.func @kernel(%arg0: i32, %arg1: memref<8x8x64xf32, #tpu.memory_space<vmem>>, %arg2: memref<2x8x128xf32, #tpu.memory_space<vmem>>, %arg3: memref<2x264x384xf32, #tpu.memory_space<vmem>>, %arg4: memref<136x128xf32, #tpu.memory_space<vmem>>, %arg5: memref<1x8x128xf32, #tpu.memory_space<vmem>>, %arg6: memref<2x8x128xf32, #tpu.memory_space<vmem>>, %arg7: memref<8x48xf32, #tpu.memory_space<vmem>>) attributes {dimension_semantics = [#tpu.dimension_semantics<arbitrary>], iteration_bounds = array<i64: 15>, scalar_prefetch = 0 : i64, scratch_operands = 2 : i64, tpu.core_type = #tpu.core_type<tc>, window_params = [{pipeline_mode = #tpu.pipeline_mode<synchronous>, transform_indices = @transform_0, window_bounds = array<i64: 8, 8, 64>}, {pipeline_mode = #tpu.pipeline_mode<synchronous>, transform_indices = @transform_1, window_bounds = array<i64: 2, 8, 128>}, {pipeline_mode = #tpu.pipeline_mode<synchronous>, transform_indices = @transform_2, window_bounds = array<i64: 2, 264, 384>}, {pipeline_mode = #tpu.pipeline_mode<synchronous>, transform_indices = @transform_3, window_bounds = array<i64: 136, 128>}, {transform_indices = @transform_4, window_bounds = array<i64: 1, 8, 128>}]} {
    %c0_i32 = arith.constant 0 : i32
    %0 = arith.cmpi eq, %arg0, %c0_i32 : i32
    %1 = arith.extui %0 : i1 to i32
    %c0_i32_0 = arith.constant 0 : i32
    %2 = arith.cmpi ne, %1, %c0_i32_0 : i32
    scf.if %2 {
      %c0_72 = arith.constant 0 : index
      %c0_73 = arith.constant 0 : index
      %c0_74 = arith.constant 0 : index
      %153 = vector.load %arg2[%c0_72, %c0_73, %c0_74] : memref<2x8x128xf32, #tpu.memory_space<vmem>>, vector<2x8x128xf32>
      %c0_75 = arith.constant 0 : index
      %c0_76 = arith.constant 0 : index
      %c0_77 = arith.constant 0 : index
      %154 = vector.load %arg6[%c0_75, %c0_76, %c0_77] : memref<2x8x128xf32, #tpu.memory_space<vmem>>, vector<2x8x128xf32>
      tpu.vector_store %arg6[%c0_75, %c0_76, %c0_77], %153 {strides = array<i32>} : memref<2x8x128xf32, #tpu.memory_space<vmem>>, vector<2x8x128xf32>,
      %155 = tpu.iota {dimensions = array<i32: 1>} : vector<8x48xi32>
      %c41_i32 = arith.constant 41 : i32
      %156 = vector.broadcast %c41_i32 : i32 to vector<8x48xi32>
      %157 = arith.cmpi eq, %155, %156 : vector<8x48xi32>
      %158 = arith.extui %157 : vector<8x48xi1> to vector<8x48xi32>
      %159 = arith.sitofp %158 : vector<8x48xi32> to vector<8x48xf32>
      %c0_78 = arith.constant 0 : index
      %c0_79 = arith.constant 0 : index
      %160 = vector.load %arg7[%c0_78, %c0_79] : memref<8x48xf32, #tpu.memory_space<vmem>>, vector<8x48xf32>
      tpu.vector_store %arg7[%c0_78, %c0_79], %159 {strides = array<i32>} : memref<8x48xf32, #tpu.memory_space<vmem>>, vector<8x48xf32>,
    } else {
    }
    %c0 = arith.constant 0 : index
    %c0_1 = arith.constant 0 : index
    %c0_2 = arith.constant 0 : index
    %3 = vector.load %arg6[%c0, %c0_1, %c0_2] : memref<2x8x128xf32, #tpu.memory_space<vmem>>, vector<1x8x128xf32>
    %4 = vector.shape_cast %3 : vector<1x8x128xf32> to vector<8x128xf32>
    %c0_3 = arith.constant 0 : index
    %c0_4 = arith.constant 0 : index
    %c0_5 = arith.constant 0 : index
    %5 = vector.load %arg1[%c0_3, %c0_4, %c0_5] : memref<8x8x64xf32, #tpu.memory_space<vmem>>, vector<8x8x64xf32>
    %c129 = arith.constant 129 : index
    %c0_6 = arith.constant 0 : index
    %6 = vector.load %arg4[%c129, %c0_6] : memref<136x128xf32, #tpu.memory_space<vmem>>, vector<1x128xf32>
    %c130 = arith.constant 130 : index
    %c0_7 = arith.constant 0 : index
    %7 = vector.load %arg4[%c130, %c0_7] : memref<136x128xf32, #tpu.memory_space<vmem>>, vector<1x64xf32>
    %c131 = arith.constant 131 : index
    %c0_8 = arith.constant 0 : index
    %8 = vector.load %arg4[%c131, %c0_8] : memref<136x128xf32, #tpu.memory_space<vmem>>, vector<1x1xf32>
    %9 = vector.broadcast %6 : vector<1x128xf32> to vector<8x128xf32>
    %10 = arith.mulf %4, %9 : vector<8x128xf32>
    %cst = arith.constant dense<0.000000e+00> : vector<8xf32>
    %11 = vector.multi_reduction <add>, %10, %cst [1] : vector<8x128xf32> to vector<8xf32>
    %12 = vector.shape_cast %11 : vector<8xf32> to vector<8x1xf32>
    %13 = vector.shape_cast %7 : vector<1x64xf32> to vector<1x1x64xf32>
    %14 = vector.broadcast %13 : vector<1x1x64xf32> to vector<8x8x64xf32>
    %15 = arith.mulf %5, %14 : vector<8x8x64xf32>
    %cst_9 = arith.constant dense<0.000000e+00> : vector<8x8xf32>
    %16 = vector.multi_reduction <add>, %15, %cst_9 [2] : vector<8x8x64xf32> to vector<8x8xf32>
    %17 = vector.broadcast %12 : vector<8x1xf32> to vector<8x8xf32>
    %18 = arith.addf %17, %16 : vector<8x8xf32>
    %19 = vector.broadcast %8 : vector<1x1xf32> to vector<8x8xf32>
    %20 = arith.addf %18, %19 : vector<8x8xf32>
    %21 = math.tanh %20 : vector<8x8xf32>
    %cst_10 = arith.constant dense<0xFF800000> : vector<8xf32>
    %22 = vector.multi_reduction <maximumf>, %21, %cst_10 [1] : vector<8x8xf32> to vector<8xf32>
    %23 = vector.shape_cast %22 : vector<8xf32> to vector<8x1xf32>
    %24 = vector.broadcast %23 : vector<8x1xf32> to vector<8x8xf32>
    %25 = arith.subf %21, %24 : vector<8x8xf32>
    %26 = math.exp %25 : vector<8x8xf32>
    %cst_11 = arith.constant dense<0.000000e+00> : vector<8xf32>
    %27 = vector.multi_reduction <add>, %26, %cst_11 [1] : vector<8x8xf32> to vector<8xf32>
    %28 = vector.shape_cast %27 : vector<8xf32> to vector<8x1xf32>
    %29 = vector.broadcast %28 : vector<8x1xf32> to vector<8x8xf32>
    %30 = arith.divf %26, %29 : vector<8x8xf32>
    %31 = vector.shape_cast %30 : vector<8x8xf32> to vector<8x8x1xf32>
    %32 = vector.broadcast %31 : vector<8x8x1xf32> to vector<8x8x64xf32>
    %33 = arith.mulf %32, %5 : vector<8x8x64xf32>
    %cst_12 = arith.constant dense<0.000000e+00> : vector<8x64xf32>
    %34 = vector.multi_reduction <add>, %33, %cst_12 [1] : vector<8x8x64xf32> to vector<8x64xf32>
    %c0_13 = arith.constant 0 : index
    %c0_14 = arith.constant 0 : index
    %c0_15 = arith.constant 0 : index
    %35 = vector.load %arg6[%c0_13, %c0_14, %c0_15] : memref<2x8x128xf32, #tpu.memory_space<vmem>>, vector<1x8x128xf32>
    %36 = vector.shape_cast %35 : vector<1x8x128xf32> to vector<8x128xf32>
    %c0_16 = arith.constant 0 : index
    %c0_17 = arith.constant 0 : index
    %c0_18 = arith.constant 0 : index
    %37 = vector.load %arg3[%c0_16, %c0_17, %c0_18] : memref<2x264x384xf32, #tpu.memory_space<vmem>>, vector<1x64x384xf32>
    %38 = vector.shape_cast %37 : vector<1x64x384xf32> to vector<64x384xf32>
    %cst_19 = arith.constant dense<0.000000e+00> : vector<8x384xf32>
    %39 = tpu.matmul %34, %38, %cst_19 {dimension_numbers = #tpu.dot_dimension_numbers<[1], [0], [0], [1], [0, 0, 1, 1], [], []>, precision = #tpu.contract_precision<fp32>} : vector<8x64xf32>, vector<64x384xf32>, vector<8x384xf32> -> vector<8x384xf32>
    %c0_20 = arith.constant 0 : index
    %c0_21 = arith.constant 0 : index
    %40 = vector.load %arg7[%c0_20, %c0_21] : memref<8x48xf32, #tpu.memory_space<vmem>>, vector<8x48xf32>
    %c0_22 = arith.constant 0 : index
    %c64 = arith.constant 64 : index
    %c0_23 = arith.constant 0 : index
    %41 = vector.load %arg3[%c0_22, %c64, %c0_23] : memref<2x264x384xf32, #tpu.memory_space<vmem>>, vector<1x48x384xf32>
    %42 = vector.shape_cast %41 : vector<1x48x384xf32> to vector<48x384xf32>
    %cst_24 = arith.constant dense<0.000000e+00> : vector<8x384xf32>
    %43 = tpu.matmul %40, %42, %cst_24 {dimension_numbers = #tpu.dot_dimension_numbers<[1], [0], [0], [1], [0, 0, 1, 1], [], []>, precision = #tpu.contract_precision<fp32>} : vector<8x48xf32>, vector<48x384xf32>, vector<8x384xf32> -> vector<8x384xf32>
    %44 = arith.addf %39, %43 : vector<8x384xf32>
    %c0_25 = arith.constant 0 : index
    %c256 = arith.constant 256 : index
    %c0_26 = arith.constant 0 : index
    %45 = vector.load %arg3[%c0_25, %c256, %c0_26] : memref<2x264x384xf32, #tpu.memory_space<vmem>>, vector<1x1x384xf32>
    %46 = vector.shape_cast %45 : vector<1x1x384xf32> to vector<1x384xf32>
    %47 = vector.broadcast %46 : vector<1x384xf32> to vector<8x384xf32>
    %48 = arith.addf %44, %47 : vector<8x384xf32>
    %c0_27 = arith.constant 0 : index
    %c128 = arith.constant 128 : index
    %c0_28 = arith.constant 0 : index
    %49 = vector.load %arg3[%c0_27, %c128, %c0_28] : memref<2x264x384xf32, #tpu.memory_space<vmem>>, vector<1x128x384xf32>
    %50 = vector.shape_cast %49 : vector<1x128x384xf32> to vector<128x384xf32>
    %cst_29 = arith.constant dense<0.000000e+00> : vector<8x384xf32>
    %51 = tpu.matmul %36, %50, %cst_29 {dimension_numbers = #tpu.dot_dimension_numbers<[1], [0], [0], [1], [0, 0, 1, 1], [], []>, precision = #tpu.contract_precision<fp32>} : vector<8x128xf32>, vector<128x384xf32>, vector<8x384xf32> -> vector<8x384xf32>
    %c0_30 = arith.constant 0 : index
    %c257 = arith.constant 257 : index
    %c0_31 = arith.constant 0 : index
    %52 = vector.load %arg3[%c0_30, %c257, %c0_31] : memref<2x264x384xf32, #tpu.memory_space<vmem>>, vector<1x1x384xf32>
    %53 = vector.shape_cast %52 : vector<1x1x384xf32> to vector<1x384xf32>
    %54 = vector.broadcast %53 : vector<1x384xf32> to vector<8x384xf32>
    %55 = arith.addf %51, %54 : vector<8x384xf32>
    %56 = vector.extract_strided_slice %48 {offsets = [0, 0], sizes = [8, 128], strides = [1, 1]} : vector<8x384xf32> to vector<8x128xf32>
    %57 = vector.extract_strided_slice %55 {offsets = [0, 0], sizes = [8, 128], strides = [1, 1]} : vector<8x384xf32> to vector<8x128xf32>
    %58 = arith.addf %56, %57 : vector<8x128xf32>
    %59 = arith.negf %58 : vector<8x128xf32>
    %60 = math.exp %59 : vector<8x128xf32>
    %cst_32 = arith.constant 1.000000e+00 : f32
    %61 = vector.broadcast %cst_32 : f32 to vector<8x128xf32>
    %62 = arith.addf %61, %60 : vector<8x128xf32>
    %63 = arith.divf %61, %62 : vector<8x128xf32>
    %64 = vector.extract_strided_slice %48 {offsets = [0, 128], sizes = [8, 128], strides = [1, 1]} : vector<8x384xf32> to vector<8x128xf32>
    %65 = vector.extract_strided_slice %55 {offsets = [0, 128], sizes = [8, 128], strides = [1, 1]} : vector<8x384xf32> to vector<8x128xf32>
    %66 = arith.addf %64, %65 : vector<8x128xf32>
    %67 = arith.negf %66 : vector<8x128xf32>
    %68 = math.exp %67 : vector<8x128xf32>
    %cst_33 = arith.constant 1.000000e+00 : f32
    %69 = vector.broadcast %cst_33 : f32 to vector<8x128xf32>
    %70 = arith.addf %69, %68 : vector<8x128xf32>
    %71 = arith.divf %69, %70 : vector<8x128xf32>
    %72 = vector.extract_strided_slice %48 {offsets = [0, 256], sizes = [8, 128], strides = [1, 1]} : vector<8x384xf32> to vector<8x128xf32>
    %73 = vector.extract_strided_slice %55 {offsets = [0, 256], sizes = [8, 128], strides = [1, 1]} : vector<8x384xf32> to vector<8x128xf32>
    %74 = arith.mulf %63, %73 : vector<8x128xf32>
    %75 = arith.addf %72, %74 : vector<8x128xf32>
    %76 = math.tanh %75 : vector<8x128xf32>
    %cst_34 = arith.constant 1.000000e+00 : f32
    %77 = vector.broadcast %cst_34 : f32 to vector<8x128xf32>
    %78 = arith.subf %77, %71 : vector<8x128xf32>
    %79 = arith.mulf %78, %76 : vector<8x128xf32>
    %80 = arith.mulf %71, %36 : vector<8x128xf32>
    %81 = arith.addf %79, %80 : vector<8x128xf32>
    %c0_35 = arith.constant 0 : index
    %c0_36 = arith.constant 0 : index
    %c0_37 = arith.constant 0 : index
    %82 = vector.load %arg6[%c0_35, %c0_36, %c0_37] : memref<2x8x128xf32, #tpu.memory_space<vmem>>, vector<1x8x128xf32>
    %83 = vector.shape_cast %82 : vector<1x8x128xf32> to vector<8x128xf32>
    %84 = vector.shape_cast %81 : vector<8x128xf32> to vector<1x8x128xf32>
    tpu.vector_store %arg6[%c0_35, %c0_36, %c0_37], %84 {strides = array<i32>} : memref<2x8x128xf32, #tpu.memory_space<vmem>>, vector<1x8x128xf32>,
    %c1 = arith.constant 1 : index
    %c0_38 = arith.constant 0 : index
    %c0_39 = arith.constant 0 : index
    %85 = vector.load %arg6[%c1, %c0_38, %c0_39] : memref<2x8x128xf32, #tpu.memory_space<vmem>>, vector<1x8x128xf32>
    %86 = vector.shape_cast %85 : vector<1x8x128xf32> to vector<8x128xf32>
    %c1_40 = arith.constant 1 : index
    %c0_41 = arith.constant 0 : index
    %c0_42 = arith.constant 0 : index
    %87 = vector.load %arg3[%c1_40, %c0_41, %c0_42] : memref<2x264x384xf32, #tpu.memory_space<vmem>>, vector<1x128x384xf32>
    %88 = vector.shape_cast %87 : vector<1x128x384xf32> to vector<128x384xf32>
    %cst_43 = arith.constant dense<0.000000e+00> : vector<8x384xf32>
    %89 = tpu.matmul %81, %88, %cst_43 {dimension_numbers = #tpu.dot_dimension_numbers<[1], [0], [0], [1], [0, 0, 1, 1], [], []>, precision = #tpu.contract_precision<fp32>} : vector<8x128xf32>, vector<128x384xf32>, vector<8x384xf32> -> vector<8x384xf32>
    %c1_44 = arith.constant 1 : index
    %c256_45 = arith.constant 256 : index
    %c0_46 = arith.constant 0 : index
    %90 = vector.load %arg3[%c1_44, %c256_45, %c0_46] : memref<2x264x384xf32, #tpu.memory_space<vmem>>, vector<1x1x384xf32>
    %91 = vector.shape_cast %90 : vector<1x1x384xf32> to vector<1x384xf32>
    %92 = vector.broadcast %91 : vector<1x384xf32> to vector<8x384xf32>
    %93 = arith.addf %89, %92 : vector<8x384xf32>
    %c1_47 = arith.constant 1 : index
    %c128_48 = arith.constant 128 : index
    %c0_49 = arith.constant 0 : index
    %94 = vector.load %arg3[%c1_47, %c128_48, %c0_49] : memref<2x264x384xf32, #tpu.memory_space<vmem>>, vector<1x128x384xf32>
    %95 = vector.shape_cast %94 : vector<1x128x384xf32> to vector<128x384xf32>
    %cst_50 = arith.constant dense<0.000000e+00> : vector<8x384xf32>
    %96 = tpu.matmul %86, %95, %cst_50 {dimension_numbers = #tpu.dot_dimension_numbers<[1], [0], [0], [1], [0, 0, 1, 1], [], []>, precision = #tpu.contract_precision<fp32>} : vector<8x128xf32>, vector<128x384xf32>, vector<8x384xf32> -> vector<8x384xf32>
    %c1_51 = arith.constant 1 : index
    %c257_52 = arith.constant 257 : index
    %c0_53 = arith.constant 0 : index
    %97 = vector.load %arg3[%c1_51, %c257_52, %c0_53] : memref<2x264x384xf32, #tpu.memory_space<vmem>>, vector<1x1x384xf32>
    %98 = vector.shape_cast %97 : vector<1x1x384xf32> to vector<1x384xf32>
    %99 = vector.broadcast %98 : vector<1x384xf32> to vector<8x384xf32>
    %100 = arith.addf %96, %99 : vector<8x384xf32>
    %101 = vector.extract_strided_slice %93 {offsets = [0, 0], sizes = [8, 128], strides = [1, 1]} : vector<8x384xf32> to vector<8x128xf32>
    %102 = vector.extract_strided_slice %100 {offsets = [0, 0], sizes = [8, 128], strides = [1, 1]} : vector<8x384xf32> to vector<8x128xf32>
    %103 = arith.addf %101, %102 : vector<8x128xf32>
    %104 = arith.negf %103 : vector<8x128xf32>
    %105 = math.exp %104 : vector<8x128xf32>
    %cst_54 = arith.constant 1.000000e+00 : f32
    %106 = vector.broadcast %cst_54 : f32 to vector<8x128xf32>
    %107 = arith.addf %106, %105 : vector<8x128xf32>
    %108 = arith.divf %106, %107 : vector<8x128xf32>
    %109 = vector.extract_strided_slice %93 {offsets = [0, 128], sizes = [8, 128], strides = [1, 1]} : vector<8x384xf32> to vector<8x128xf32>
    %110 = vector.extract_strided_slice %100 {offsets = [0, 128], sizes = [8, 128], strides = [1, 1]} : vector<8x384xf32> to vector<8x128xf32>
    %111 = arith.addf %109, %110 : vector<8x128xf32>
    %112 = arith.negf %111 : vector<8x128xf32>
    %113 = math.exp %112 : vector<8x128xf32>
    %cst_55 = arith.constant 1.000000e+00 : f32
    %114 = vector.broadcast %cst_55 : f32 to vector<8x128xf32>
    %115 = arith.addf %114, %113 : vector<8x128xf32>
    %116 = arith.divf %114, %115 : vector<8x128xf32>
    %117 = vector.extract_strided_slice %93 {offsets = [0, 256], sizes = [8, 128], strides = [1, 1]} : vector<8x384xf32> to vector<8x128xf32>
    %118 = vector.extract_strided_slice %100 {offsets = [0, 256], sizes = [8, 128], strides = [1, 1]} : vector<8x384xf32> to vector<8x128xf32>
    %119 = arith.mulf %108, %118 : vector<8x128xf32>
    %120 = arith.addf %117, %119 : vector<8x128xf32>
    %121 = math.tanh %120 : vector<8x128xf32>
    %cst_56 = arith.constant 1.000000e+00 : f32
    %122 = vector.broadcast %cst_56 : f32 to vector<8x128xf32>
    %123 = arith.subf %122, %116 : vector<8x128xf32>
    %124 = arith.mulf %123, %121 : vector<8x128xf32>
    %125 = arith.mulf %116, %86 : vector<8x128xf32>
    %126 = arith.addf %124, %125 : vector<8x128xf32>
    %c1_57 = arith.constant 1 : index
    %c0_58 = arith.constant 0 : index
    %c0_59 = arith.constant 0 : index
    %127 = vector.load %arg6[%c1_57, %c0_58, %c0_59] : memref<2x8x128xf32, #tpu.memory_space<vmem>>, vector<1x8x128xf32>
    %128 = vector.shape_cast %127 : vector<1x8x128xf32> to vector<8x128xf32>
    %129 = vector.shape_cast %126 : vector<8x128xf32> to vector<1x8x128xf32>
    tpu.vector_store %arg6[%c1_57, %c0_58, %c0_59], %129 {strides = array<i32>} : memref<2x8x128xf32, #tpu.memory_space<vmem>>, vector<1x8x128xf32>,
    %c0_60 = arith.constant 0 : index
    %c0_61 = arith.constant 0 : index
    %130 = vector.load %arg4[%c0_60, %c0_61] : memref<136x128xf32, #tpu.memory_space<vmem>>, vector<128x128xf32>
    %cst_62 = arith.constant dense<0.000000e+00> : vector<8x128xf32>
    %131 = tpu.matmul %126, %130, %cst_62 {dimension_numbers = #tpu.dot_dimension_numbers<[1], [0], [0], [1], [0, 0, 1, 1], [], []>, precision = #tpu.contract_precision<fp32>} : vector<8x128xf32>, vector<128x128xf32>, vector<8x128xf32> -> vector<8x128xf32>
    %c128_63 = arith.constant 128 : index
    %c0_64 = arith.constant 0 : index
    %132 = vector.load %arg4[%c128_63, %c0_64] : memref<136x128xf32, #tpu.memory_space<vmem>>, vector<1x128xf32>
    %133 = vector.broadcast %132 : vector<1x128xf32> to vector<8x128xf32>
    %134 = arith.addf %131, %133 : vector<8x128xf32>
    %c0_65 = arith.constant 0 : index
    %c0_66 = arith.constant 0 : index
    %c0_67 = arith.constant 0 : index
    %135 = vector.load %arg5[%c0_65, %c0_66, %c0_67] : memref<1x8x128xf32, #tpu.memory_space<vmem>>, vector<1x8x128xf32>
    %136 = vector.shape_cast %135 : vector<1x8x128xf32> to vector<8x128xf32>
    %137 = vector.shape_cast %134 : vector<8x128xf32> to vector<1x8x128xf32>
    tpu.vector_store %arg5[%c0_65, %c0_66, %c0_67], %137 {strides = array<i32>} : memref<1x8x128xf32, #tpu.memory_space<vmem>>, vector<1x8x128xf32>,
    %cst_68 = arith.constant dense<0xFF800000> : vector<8xf32>
    %138 = vector.multi_reduction <maximumf>, %134, %cst_68 [1] : vector<8x128xf32> to vector<8xf32>
    %139 = vector.shape_cast %138 : vector<8xf32> to vector<8x1xf32>
    %140 = tpu.iota {dimensions = array<i32: 1>} : vector<8x128xi32>
    %141 = vector.broadcast %139 : vector<8x1xf32> to vector<8x128xf32>
    %142 = arith.cmpf oeq, %134, %141 : vector<8x128xf32>
    %c1073741824_i32 = arith.constant 1073741824 : i32
    %143 = vector.broadcast %c1073741824_i32 : i32 to vector<8x128xi32>
    %144 = arith.select %142, %140, %143 : vector<8x128xi1>, vector<8x128xi32>
    %cst_69 = arith.constant dense<2147483647> : vector<8xi32>
    %145 = vector.multi_reduction <minsi>, %144, %cst_69 [1] : vector<8x128xi32> to vector<8xi32>
    %146 = vector.shape_cast %145 : vector<8xi32> to vector<8x1xi32>
    %147 = tpu.iota {dimensions = array<i32: 1>} : vector<8x48xi32>
    %148 = vector.broadcast %146 : vector<8x1xi32> to vector<8x48xi32>
    %149 = arith.cmpi eq, %147, %148 : vector<8x48xi32>
    %150 = arith.extui %149 : vector<8x48xi1> to vector<8x48xi32>
    %151 = arith.sitofp %150 : vector<8x48xi32> to vector<8x48xf32>
    %c0_70 = arith.constant 0 : index
    %c0_71 = arith.constant 0 : index
    %152 = vector.load %arg7[%c0_70, %c0_71] : memref<8x48xf32, #tpu.memory_space<vmem>>, vector<8x48xf32>
    tpu.vector_store %arg7[%c0_70, %c0_71], %151 {strides = array<i32>} : memref<8x48xf32, #tpu.memory_space<vmem>>, vector<8x48xf32>,
    return
  }
  func.func @transform_0(%arg0: i32) -> (i32, i32, i32) {
    %c0_i32 = arith.constant 0 : i32
    %c0_i32_0 = arith.constant 0 : i32
    %c0_i32_1 = arith.constant 0 : i32
    %c0_i32_2 = arith.constant 0 : i32
    return %c0_i32, %c0_i32_0, %c0_i32_1 : i32, i32, i32
  }
  func.func @transform_1(%arg0: i32) -> (i32, i32, i32) {
    %c0_i32 = arith.constant 0 : i32
    %c0_i32_0 = arith.constant 0 : i32
    %c0_i32_1 = arith.constant 0 : i32
    %c0_i32_2 = arith.constant 0 : i32
    return %c0_i32, %c0_i32_0, %c0_i32_1 : i32, i32, i32
  }
  func.func @transform_2(%arg0: i32) -> (i32, i32, i32) {
    %c0_i32 = arith.constant 0 : i32
    %c0_i32_0 = arith.constant 0 : i32
    %c0_i32_1 = arith.constant 0 : i32
    %c0_i32_2 = arith.constant 0 : i32
    return %c0_i32, %c0_i32_0, %c0_i32_1 : i32, i32, i32
  }
  func.func @transform_3(%arg0: i32) -> (i32, i32) {
    %c0_i32 = arith.constant 0 : i32
    %c0_i32_0 = arith.constant 0 : i32
    %c0_i32_1 = arith.constant 0 : i32
    return %c0_i32, %c0_i32_0 : i32, i32
  }
  func.func @transform_4(%arg0: i32) -> (i32, i32, i32) {
    %c0_i32 = arith.constant 0 : i32
    %c0_i32_0 = arith.constant 0 : i32
    %c0_i32_1 = arith.constant 0 : i32
    return %arg0, %c0_i32, %c0_i32_0 : i32, i32, i32
  }
}

</mosaic_0001>

<bundles_post_ra>
// kernel: tpu_custom_call.1
= control target key start
LH: loop header
LB: loop body
LE: loop exit
PB: predicated region body
PF: predicated region fallthrough
CT: control target
= control target key end

     0   :  { %9 = vsyncpa [#allocation5], 0  ;;  %s15371_s0 = inlined_call_operand.hbm [shape: f32[8,8,64], index: 0, kind: input, shape index: {}]   ;;  %s15372_s1 = inlined_call_operand.hbm [shape: f32[2,8,128], index: 1, kind: input, shape index: {}]   ;;  %s15373_s2 = inlined_call_operand.hbm [shape: f32[2,264,384], index: 2, kind: input, shape index: {}]   ;;  %s15374_s3 = inlined_call_operand.hbm [shape: f32[136,128], index: 3, kind: input, shape index: {}]   ;;  %s15375_s4 = inlined_call_operand.hbm [shape: f32[15,8,128], index: 4, kind: output, shape index: {}]  }
   0x1   :  { %10 = vsyncpa [#allocation8], 0 }
   0x2   :  { %11 = vsyncpa [#allocation11], 0 }
   0x3   :  { %12 = vsyncpa [#allocation6], 0 }
   0x4   :  { %14 = vsyncpa [#allocation6 + $0x1], 0  ;;  %s11869_s15 = smov 0   ;;  %s11871_s16 = smov 0  }
   0x5   :  { %s11873_s17 = smov 0   ;;  %s11875_s18 = smov 0  }
   0x6 LB: > { %s11890_s19 = sadd.s32 4294967295, %s11829_s18   ;;  %s8399_s20 = sadd.s32 4294967294, %s11829_s18   ;;  %s11829_s18 = sphi %s11875_s18, %s16434_s18   ;;  %s11825_s17 = sphi %s11873_s17, %s16433_s17   ;;  %s11821_s16 = sphi %s11871_s16, %s16432_s16   ;;  %s11817_s15 = sphi %s11869_s15, %s16431_s15  }
   0x7   : > { %s11894_s21 = sadd.s32 1, %s11829_s18   ;;  %s111_s22 = sadd.s32 1, %s11825_s17 }
   0x8   : > { %s108_s23 = ssub.s32 %s11829_s18, %s11894_s21  ;;  %p121_p0 = scmp.ne.s32.totalorder %s11825_s17, %s11821_s16 }
   0x9   : > { %p109_p1 = scmp.eq.s32.totalorder %s108_s23, 0  ;;  %p122_p2 = scmp.eq.s32.totalorder %s11890_s19, 14 }
   0xa   : > { %p127_p3 = scmp.ne.s32.totalorder %s11821_s16, %s11817_s15  ;;  %p128_p4 = scmp.eq.s32.totalorder %s8399_s20, 14 }
   0xb   : > { %s11905_s24 = scalar_select %p109_p1, %s11825_s17, %s111_s22  }
   0xc   : > { %p11907_p5 = por %p122_p2, %p121_p0  ;;  %p11911_p6 = por %p128_p4, %p127_p3 }
   0xd   : > { %p8400_p7 = scmp.ge.s32.totalorder %s11829_s18, 1  ;;  %p135_p8 = scmp.lt.s32.totalorder %s11829_s18, 16 }
   0xe   : > { %s15765_s25 = scalar_select %p11907_p5, 1, 0 }
   0xf   : > { %s15766_s26 = scalar_select %p11911_p6, 1, 0 }
  0x10   : > { %p15376_p10 = scmp.eq.s32.totalorder %s11890_s19, 0  ;;  %p11919_p11 = pnand %p8400_p7, %p135_p8 }
  0x11   : > { %s11831_s28 = smov [#allocation7]   ;;  %s11832_s5 = smov [#allocation4]  }
  0x12   : > { %s15767_s27 = scalar_select %p11919_p11, 1, 0 }
  0x13   : > { %p11536_p12 = pneg %p11919_p11  ;;  %s160_s29 = sshll.u32 %s11831_s28, 4  ;;  %s11925_s29 = int_to_ptr.vmem [resolvable:$true] %s160_s29 }
  0x14   : > { %s147_s6 = sshll.u32 %s11832_s5, 4  ;;  %s11833_s7 = smov [#allocation9]   ;;  %s11933_s6 = int_to_ptr.vmem [resolvable:$true] %s147_s6 }
  0x15   : > { %p11929_p13 = pnand %p15376_p10, %p11536_p12  ;;  %s11935_s8 = sshll.u32 %s11833_s7, 4  ;;  %s174_s8 = int_to_ptr.vmem [resolvable:$true] %s11935_s8 }
  0x16   : > { %s11643_s11 = scalar_lea.hbm %s15372_s1, 256 }
  0x17   : > { %p11644_p0 = scmp.ne.s32.totalorder %s15372_s1, %s11643_s11  ;;  %p11945_p1 = pneg %p11929_p13 }
  0x18   : > { %p11650_p4 = scmp.lt.u32.totalorder %s11643_s11, %s15372_s1 }
  0x19   : > { %p11646_p2 = pnand %p11945_p1, %p11644_p0 }
  0x1b   : > { %p11647_p3 = pneg %p11646_p2 }
  0x1d   : > { %p11652_p7 = pnand %p11650_p4, %p11647_p3 }
  0x1f   : > { %11655 = shalt.err (!%p11652_p7)
}
  0x20   : > { %s11656_s23 = scalar_lea.vmem %s11925_s29, 256  ;;  %p11664_p10 = scmp.lt.s32.totalorder %s11925_s29, %s11925_s29 }
  0x21   : > { %p11657_p8 = scmp.ne.s32.totalorder %s11925_s29, %s11656_s23  ;;  %p11665_p6 = scmp.lt.s32.totalorder %s11656_s23, %s11656_s23 }
  0x23   : > { %p11659_p12 = pnand %p11657_p8, %p11945_p1  ;;  %p11666_p0 = por %p11665_p6, %p11664_p10 }
  0x25   : > { %p11660_p9 = pneg %p11659_p12 }
  0x27   : > { %p11667_p2 = pnand %p11666_p0, %p11660_p9 }
  0x29   : > { %11670 = shalt.err (!%p11667_p2)
}
  0x2a   : > { %s15379_s28 = smov 128   ;;  %s15380_s5 = smov 8  }
  0x2b   : > { %11542 = dma.hbm_to_vmem [thread:$0]  (!%p11929_p13), %s15372_s1, 256, %s11925_s29, [#allocation8], %s15379_s28, %s15379_s28, %s15380_s5  }
  0x2c   : > { %s11671_s12 = scalar_lea.hbm %s15371_s0, 1024 }
  0x2d   : > { %p11672_p6 = scmp.ne.s32.totalorder %s15371_s0, %s11671_s12  ;;  %p11678_p3 = scmp.lt.u32.totalorder %s11671_s12, %s15371_s0 }
  0x2f   : > { %p11674_p9 = pnand %p11672_p6, %p11945_p1 }
  0x31   : > { %p11675_p10 = pneg %p11674_p9 }
  0x33   : > { %p11680_p4 = pnand %p11678_p3, %p11675_p10 }
  0x35   : > { %11683 = shalt.err (!%p11680_p4)
}
  0x36   : > { %s11684_s29 = scalar_lea.vmem %s11933_s6, 1024  ;;  %p11692_p0 = scmp.lt.s32.totalorder %s11933_s6, %s11933_s6 }
  0x37   : > { %p11685_p7 = scmp.ne.s32.totalorder %s11933_s6, %s11684_s29  ;;  %p11693_p2 = scmp.lt.s32.totalorder %s11684_s29, %s11684_s29 }
  0x39   : > { %p11687_p8 = pnand %p11685_p7, %p11945_p1  ;;  %p11694_p6 = por %p11693_p2, %p11692_p0 }
  0x3b   : > { %p11688_p12 = pneg %p11687_p8 }
  0x3d   : > { %p11695_p9 = pnand %p11694_p6, %p11688_p12 }
  0x3f   : > { %11698 = shalt.err (!%p11695_p9)
}
  0x40   : > { %11539 = dma.hbm_to_vmem [thread:$0]  (!%p11929_p13), %s15371_s0, 1024, %s11933_s6, [#allocation5], %s15379_s28, %s15379_s28, %s15380_s5  }
  0x41   : > { %s11699_s12 = scalar_lea.hbm %s15373_s2, 25344 }
  0x42   : > { %p11700_p10 = scmp.ne.s32.totalorder %s15373_s2, %s11699_s12  ;;  %p11706_p7 = scmp.lt.u32.totalorder %s11699_s12, %s15373_s2 }
  0x44   : > { %p11702_p3 = pnand %p11700_p10, %p11945_p1 }
  0x46   : > { %p11703_p4 = pneg %p11702_p3 }
  0x48   : > { %p11708_p8 = pnand %p11706_p7, %p11703_p4 }
  0x4a   : > { %11711 = shalt.err (!%p11708_p8)
}
  0x4b   : > { %s11712_s29 = scalar_lea.vmem %s174_s8, 25344  ;;  %p11720_p6 = scmp.lt.s32.totalorder %s174_s8, %s174_s8 }
  0x4c   : > { %p11713_p12 = scmp.ne.s32.totalorder %s174_s8, %s11712_s29  ;;  %p11721_p9 = scmp.lt.s32.totalorder %s11712_s29, %s11712_s29 }
  0x4e   : > { %p11715_p0 = pnand %p11713_p12, %p11945_p1  ;;  %p11722_p5 = por %p11721_p9, %p11720_p6 }
  0x50   : > { %p11716_p2 = pneg %p11715_p0 }
  0x52   : > { %p11723_p11 = pnand %p11722_p5, %p11716_p2 }
  0x54   : > { %11726 = shalt.err (!%p11723_p11)
}
  0x55   : > { %s11836_s6 = smov 384   ;;  %s11837_s7 = smov 24  }
  0x56   : > { %11545 = dma.hbm_to_vmem [thread:$0]  (!%p11929_p13), %s15373_s2, 25344, %s174_s8, [#allocation8], %s11836_s6, %s11836_s6, %s11837_s7  }
  0x57   : > { %s11838_s11 = smov [#allocation10]   ;;  %s11727_s22 = scalar_lea.hbm %s15374_s3, 2176 }
  0x58   : > { %s186_s12 = sshll.u32 %s11838_s11, 4  ;;  %p11728_p5 = scmp.ne.s32.totalorder %s15374_s3, %s11727_s22  ;;  %s187_s12 = int_to_ptr.vmem [resolvable:$true] %s186_s12 }
  0x59   : > { %p11734_p3 = scmp.lt.u32.totalorder %s11727_s22, %s15374_s3 }
  0x5a   : > { %p11730_p11 = pnand %p11728_p5, %p11945_p1 }
  0x5c   : > { %p11731_p10 = pneg %p11730_p11 }
  0x5e   : > { %p11736_p4 = pnand %p11734_p3, %p11731_p10 }
  0x60   : > { %11739 = shalt.err (!%p11736_p4)
}
  0x61   : > { %s11740_s8 = scalar_lea.vmem %s187_s12, 2176  ;;  %p11748_p0 = scmp.lt.s32.totalorder %s187_s12, %s187_s12 }
  0x62   : > { %p11741_p7 = scmp.ne.s32.totalorder %s187_s12, %s11740_s8  ;;  %p11749_p2 = scmp.lt.s32.totalorder %s11740_s8, %s11740_s8 }
  0x64   : > { %p11743_p8 = pnand %p11741_p7, %p11945_p1  ;;  %p11750_p6 = por %p11749_p2, %p11748_p0 }
  0x66   : > { %p11744_p12 = pneg %p11743_p8 }
  0x68   : > { %p11751_p9 = pnand %p11750_p6, %p11744_p12 }
  0x6a   : > { %11754 = shalt.err (!%p11751_p9)
}
  0x6b   : > { %s15770_s6 = smov 8   ;;  %s15771_s7 = smov 128  }
  0x6c   : > { %11548 = dma.hbm_to_vmem [thread:$0]  (!%p11929_p13), %s15374_s3, 2176, %s187_s12, [#allocation11], %s15771_s7, %s15771_s7, %s15770_s6  }
  0x6d   : > { %p15772_p5 = scmp.ne.s32.totalorder %s15767_s27, 0 }
  0x6f   : > { %202 = sbr.rel (%p15772_p5) target bundleno = 2836 (0xb14), region = 36 }
  0x76   : > { %p15773_p1 = scmp.eq.s32.totalorder %s11890_s19, 0 }
  0x78   : > { %11800 = dma.done.wait (%p15773_p1), [#allocation5], 1024   ;;  %p15774_p11 = pmov %p15773_p1 }
  0x79   : > { %p15775_p10 = pmov %p15773_p1 }
  0x7a   : > { %11802 = vsyncadd (%p15774_p11), [#allocation5], 4294966272 }
  0x7b   : > { %11804 = dma.done.wait (%p15775_p10), [#allocation8], 25600   ;;  %p15776_p3 = pmov %p15773_p1 }
  0x7c   : > { %p15777_p4 = pmov %p15773_p1 }
  0x7d   : > { %11806 = vsyncadd (%p15776_p3), [#allocation8], 4294941696 }
  0x7e   : > { %11808 = dma.done.wait (%p15777_p4), [#allocation11], 2176   ;;  %p15778_p13 = pmov %p15773_p1 }
  0x7f   : > { %s232_s27 = sand.u32 1, %s11821_s16   ;;  %p15779_p7 = scmp.ne.s32.totalorder %s11890_s19, 0 }
  0x80   : > { %11810 = vsyncadd (%p15778_p13), [#allocation11], 4294965120  ;;  %s12052_s30 = sshll.u32 %s232_s27, 3  ;;  %v239_v0 = vld [vmem:[#allocation7] sm:$0xff] (!%p15779_p7)  ;;  %v240_v1 = vld [vmem:[#allocation7 + $0x8] sm:$0xff] (!%p15779_p7)  ;;  %v243_v2 = vlaneseq (!%p15779_p7)  ;;  %vm248_vm0 = vcmask (!%p15779_p7), 392192  }
  0x81   : > { %s234_s14 = scalar_lea.vmem [#allocation12], %s12052_s30  ;;  %238 = sbr.rel (%p15779_p7) target bundleno = 136 (0x88), region = 56  ;;  %241 = vst [vmem:[#allocation2] sm:$0xff] (!%p15779_p7), %v239_v0  ;;  %242 = vst [vmem:[#allocation2 + $0x8] sm:$0xff] (!%p15779_p7), %v240_v1  ;;  %v11839_v4 = vmov (!%p15779_p7), 0.0  }
  0x82   : > { %v244_v3 = vand.u32 (!%p15779_p7), 127, %v243_v2 }
  0x84   : > { %vm245_vm1 = vcmp.eq.s32.totalorder (!%p15779_p7), %v244_v3, 41 }
  0x85   : > { %v8412_v5 = vsel (!%p15779_p7), %vm245_vm1, 1.0, %v11839_v4 }
  0x86   : > { %249 = vst.msk [vmem:[#allocation3] sm:$0xff] (!%p15779_p7), %vm248_vm0, %v8412_v5 }
  0x88 PF: > { %v251_v6 = vld [vmem:[#allocation4] sm:$0xff]  ;;  %vm281_vm2 = vcmask 523264   ;;  %v253_v8 = vld [vmem:[#allocation4 + $0x10] sm:$0xff]  ;;  %v252_v11 = vld [vmem:[#allocation4 + $0x8] sm:$0xff]  ;;  %v314_v35 = vlaneseq  ;;  %vm348_vm3 = vcmask 1041409   ;;  %vm350_vm4 = vcmask 1042434  }
  0x89   : > { %v8414_v7 = vld [vmem:[#allocation10 + $0x82] ss:$0 sm:$0xff]  ;;  %v254_v12 = vld [vmem:[#allocation4 + $0x18] sm:$0xff]  ;;  %v256_v16 = vld [vmem:[#allocation4 + $0x28] sm:$0xff]  ;;  %vm352_vm5 = vcmask 1043459   ;;  %vm354_vm6 = vcmask 1044484  }
  0x8a   : > { %v273_v9 = vmul.f32 %v8414_v7, %v251_v6  ;;  %v275_v10 = vmul.f32 %v8414_v7, %v253_v8  ;;  %v274_v13 = vmul.f32 %v8414_v7, %v252_v11  ;;  %v276_v14 = vmul.f32 %v8414_v7, %v254_v12  ;;  %v255_v15 = vld [vmem:[#allocation4 + $0x20] sm:$0xff]  ;;  %v257_v24 = vld [vmem:[#allocation4 + $0x30] sm:$0xff]  ;;  %v258_v25 = vld [vmem:[#allocation4 + $0x38] sm:$0xff]  ;;  %s8422_s10 = sshll.u32 %s11890_s19, 7  ;;  %s8309_s11 = sshll.u32 %s234_s14, 4  ;;  %s8310_s11 = int_to_ptr.vmem [resolvable:$true] %s8309_s11 }
  0x8b   : > { %v261_v19 = vld [vmem:[#allocation10 + $0x83] sm:$0x1]  ;;  %v277_v22 = vmul.f32 %v8414_v7, %v255_v15  ;;  %v278_v23 = vmul.f32 %v8414_v7, %v256_v16  ;;  %v279_v28 = vmul.f32 %v8414_v7, %v257_v24  ;;  %v280_v29 = vmul.f32 %v8414_v7, %v258_v25  ;;  %v250_v32 = vld [vmem:[#allocation2] sm:$0xff]  ;;  %v8413_v33 = vld [vmem:[#allocation10 + $0x81] ss:$0 sm:$0xff]  ;;  %s15330_s20 = scalar_lea.hbm %s15375_s4, %s8422_s10  ;;  %s8296_s22 = scalar_lea.sflag [#allocation6], %s232_s27 }
  0x8c   : > { %v282_v17 = vsel %vm281_vm2, %v273_v9, 0.0  ;;  %v288_v18 = vsel %vm281_vm2, %v275_v10, 0.0  ;;  %v285_v20 = vsel %vm281_vm2, %v274_v13, 0.0  ;;  %v291_v21 = vsel %vm281_vm2, %v276_v14, 0.0  ;;  %11516 = vpush %v261_v19  ;;  %v529_v9 = vld [vmem:[#allocation9 + $0xd0] sm:$0xff]  ;;  %v532_v10 = vld [vmem:[#allocation9 + $0xe8] sm:$0xff] }
  0x8d   : > { %283 = vadd.xlane.f32.xlu0 %v282_v17  ;;  %289 = vadd.xlane.f32.xlu1 %v288_v18  ;;  %v294_v26 = vsel %vm281_vm2, %v277_v22, 0.0  ;;  %v297_v27 = vsel %vm281_vm2, %v278_v23, 0.0  ;;  %v300_v30 = vsel %vm281_vm2, %v279_v28, 0.0  ;;  %v303_v31 = vsel %vm281_vm2, %v280_v29, 0.0  ;;  %v535_v11 = vld [vmem:[#allocation9 + $0x100] sm:$0xff]  ;;  %v538_v15 = vld [vmem:[#allocation9 + $0x118] sm:$0xff] }
  0x8e   : > { %v266_v34 = vmul.f32 %v8413_v33, %v250_v32  ;;  %v12065_v36 = vand.u32 127, %v314_v35  ;;  %v12067_v37 = vshrl.u32 %v314_v35, 7  ;;  %vm356_vm7 = vcmask 1045509   ;;  %v541_v17 = vld [vmem:[#allocation9 + $0x130] sm:$0xff]  ;;  %v544_v18 = vld [vmem:[#allocation9 + $0x148] sm:$0xff]  ;;  %s11755_s23 = scalar_lea.vmem %s8310_s11, 128 }
  0x8f   : > { %vm358_vm8 = vcmask 1046534   ;;  %vm360_vm9 = vcmask 1047559   ;;  %vm370_vm10 = vcmask 64512   ;;  %v15395_v12 = vmov 0.0|0.0   ;;  %v526_v23 = vld [vmem:[#allocation3] sm:$0xff]  ;;  %p11756_p8 = scmp.ne.s32.totalorder %s8310_s11, %s11755_s23  ;;  %p16429_p12 = scmp.ne.s32.totalorder %s15765_s25, 0 }
  0x90   : > { %15780 = vst [vmem:[#allocation17_spill] sm:$0xff] %v12065_v36  ;;  %v318_v40 = vsub.s32 %v12065_v36, %v12067_v37  ;;  %10045 = vmatprep.subr.bf16.mxu1 %v15395_v12  ;;  %v1145_v13 = vand.u32 4294901760, %v529_v9  ;;  %v1148_v14 = vand.u32 4294901760, %v532_v10  ;;  %v1151_v16 = vand.u32 4294901760, %v535_v11  ;;  %s11843_s29 = smov [#allocation12]  }
  0x91   : > { %286 = vadd.xlane.f32.xlu0 %v285_v20  ;;  %292 = vadd.xlane.f32.xlu1 %v291_v21  ;;  %vm11841_vm11 = vmmov 0   ;;  %v15388_v19 = vmov 0.0   ;;  %v1154_v20 = vand.u32 4294901760, %v538_v15  ;;  %v1157_v21 = vand.u32 4294901760, %v541_v17  ;;  %p11757_p0 = pnand %p11756_p8, %p16429_p12  ;;  %s11759_s8 = sshll.u32 %s11843_s29, 4  ;;  %s11760_s8 = int_to_ptr.vmem [resolvable:$false] %s11759_s8 }
  0x92   : > { %8941 = vmatprep.mubr.msk.f32.mxu1 %vm11841_vm11, %v15388_v19  ;;  %v1160_v22 = vand.u32 4294901760, %v544_v18  ;;  %vm545_vm12 = vcmask 392192   ;;  %625 = vmatprep.mubr.f32.mxu0 %v15388_v19  ;;  %v12085_v24 = vpack.c.bf16 %v1148_v14, %v1145_v13  ;;  %v12087_v25 = vsub.f32 %v529_v9, %v1145_v13  ;;  %v536_v9 = vld [vmem:[#allocation9 + $0x108] sm:$0xff]  ;;  %s11761_s6 = scalar_lea.vmem %s11760_s8, 256  ;;  %p11762_p6 = scmp.lt.s32.totalorder %s8310_s11, %s11760_s8 }
  0x93   : > { %v12093_v28 = vpack.c.bf16 %v1154_v20, %v1151_v16  ;;  %v12095_v29 = vsub.f32 %v538_v15, %v1154_v20  ;;  %v547_v32 = vsel %vm545_vm12, %v526_v23, 0  ;;  %v540_v15 = vld [vmem:[#allocation9 + $0x128] sm:$0xff]  ;;  %v542_v23 = vld [vmem:[#allocation9 + $0x138] sm:$0xff]  ;;  %p11758_p2 = pneg %p11757_p0  ;;  %p11763_p9 = scmp.lt.s32.totalorder %s11761_s6, %s11755_s23 }
  0x94   : > { %10047 = vmatpush3.bf16.msra.mxu1 %v12085_v24  ;;  %v1228_v33 = vand.u32 4294901760, %v12087_v25  ;;  %v12106_v35 = vand.u32 4294901760, %v547_v32 }
  0x95   : > { %295 = vadd.xlane.f32.xlu0 %v294_v26  ;;  %298 = vadd.xlane.f32.xlu1 %v297_v27  ;;  %v12089_v26 = vsub.f32 %v532_v10, %v1148_v14  ;;  %v12091_v27 = vsub.f32 %v535_v11, %v1151_v16  ;;  %v543_v16 = vld [vmem:[#allocation9 + $0x140] sm:$0xff]  ;;  %p11764_p5 = por %p11763_p9, %p11762_p6 }
  0x96   : > { %10048 = vmatprep.subr.bf16.mxu1 %v15395_v12 }
  0x97   : > { %p11765_p1 = pnand %p11764_p5, %p11758_p2 }
  0x98   : > { %10050 = vmatpush3.bf16.msra.mxu1 %v12093_v28 }
  0x99   : > { %301 = vadd.xlane.f32.xlu0 %v300_v30  ;;  %304 = vadd.xlane.f32.xlu1 %v303_v31  ;;  %v12097_v30 = vsub.f32 %v541_v17, %v1157_v21  ;;  %v12100_v31 = vsub.f32 %v544_v18, %v1160_v22  ;;  %v539_v17 = vld [vmem:[#allocation9 + $0x120] sm:$0xff] }
  0x9a   : > { %10051 = vmatprep.subr.bf16.mxu1 %v15395_v12 }
  0x9d   : > { %267 = vadd.xlane.f32.xlu0 %v266_v34  ;;  %v1235_v34 = vand.u32 4294901760, %v12089_v26 }
  0xbd   : > { %s11517_s9 = spop %11516 }
  0xbe   : > { %v366_v63 = vstv %s11517_s9 }
 0x11a   : > { %v284_v38 = vpop.xlane.xlu0 %283  ;;  %v290_v39 = vpop.xlane.xlu1 %289 }
 0x11b   : > { %v319_v43 = vrot.slane %v284_v38, %v318_v40  ;;  %v327_v46 = vrot.slane %v290_v39, %v318_v40  ;;  %v1242_v38 = vand.u32 4294901760, %v12091_v27  ;;  %v1249_v39 = vand.u32 4294901760, %v12095_v29 }
 0x11e   : > { %v287_v41 = vpop.xlane.xlu0 %286  ;;  %v293_v42 = vpop.xlane.xlu1 %292 }
 0x11f   : > { %v323_v44 = vrot.slane %v287_v41, %v318_v40  ;;  %v331_v45 = vrot.slane %v293_v42, %v318_v40  ;;  %v1229_v41 = vsub.f32 %v12087_v25, %v1228_v33  ;;  %v1236_v42 = vsub.f32 %v12089_v26, %v1235_v34 }
 0x121   : > { %v349_v47 = vsel %vm348_vm3, %v323_v44, %v319_v43  ;;  %v1263_v43 = vand.u32 4294901760, %v12100_v31  ;;  %v12119_v44 = vsub.f32 %v547_v32, %v12106_v35 }
 0x122   : > { %v351_v48 = vsel %vm350_vm4, %v327_v46, %v349_v47  ;;  %v296_v49 = vpop.xlane.xlu0 %295  ;;  %v299_v50 = vpop.xlane.xlu1 %298  ;;  %v1250_v46 = vsub.f32 %v12095_v29, %v1249_v39 }
 0x123   : > { %v353_v51 = vsel %vm352_vm5, %v331_v45, %v351_v48  ;;  %v335_v52 = vrot.slane %v296_v49, %v318_v40  ;;  %v339_v53 = vrot.slane %v299_v50, %v318_v40  ;;  %v1243_v45 = vsub.f32 %v12091_v27, %v1242_v38 }
 0x124   : > { %v12131_v48 = vpack.c.bf16 %v1160_v22, %v1157_v21  ;;  %v1230_v49 = vand.u32 4294901760, %v1229_v41  ;;  %v1237_v50 = vand.u32 4294901760, %v1236_v42 }
 0x125   : > { %v355_v54 = vsel %vm354_vm6, %v335_v52, %v353_v51  ;;  %v1264_v51 = vsub.f32 %v12100_v31, %v1263_v43  ;;  %v528_v52 = vld [vmem:[#allocation9 + $0xc8] sm:$0xff] }
 0x126   : > { %v302_v55 = vpop.xlane.xlu0 %301  ;;  %v305_v56 = vpop.xlane.xlu1 %304  ;;  %v357_v59 = vsel %vm356_vm7, %v339_v53, %v355_v54  ;;  %v531_v53 = vld [vmem:[#allocation9 + $0xe0] sm:$0xff]  ;;  %v12138_v54 = vand.u32 4294901760, %v12119_v44  ;;  %10053 = vmatpush3.bf16.msra.mxu1 %v12131_v48 }
 0x127   : > { %v343_v57 = vrot.slane %v302_v55, %v318_v40  ;;  %v347_v58 = vrot.slane %v305_v56, %v318_v40  ;;  %v1256_v40 = vand.u32 4294901760, %v12097_v30  ;;  %v1244_v55 = vand.u32 4294901760, %v1243_v45  ;;  %10054 = vmatprep.subr.bf16.mxu1 %v15395_v12 }
 0x128   : > { %v1251_v56 = vand.u32 4294901760, %v1250_v46  ;;  %v563_v45 = vand.u32 4294901760, %v536_v9 }
 0x129   : > { %v359_v60 = vsel %vm358_vm8, %v343_v57, %v357_v59  ;;  %v1257_v47 = vsub.f32 %v12097_v30, %v1256_v40  ;;  %v530_v59 = vld [vmem:[#allocation9 + $0xd8] sm:$0xff] }
 0x12a   : > { %v361_v61 = vsel %vm360_vm9, %v347_v58, %v359_v60  ;;  %v268_v62 = vpop.xlane.xlu0 %267  ;;  %v527_v58 = vld [vmem:[#allocation9 + $0xc0] sm:$0xff]  ;;  %v1265_v60 = vand.u32 4294901760, %v1264_v51 }
 0x12b   : > { %v363_v0 = vadd.f32 %v361_v61, %v268_v62  ;;  %v1258_v57 = vand.u32 4294901760, %v1257_v47  ;;  %v629_v61 = vsub.f32 %v12119_v44, %v12138_v54  ;;  %v10064_v62 = vpack.c.bf16 %v12089_v26, %v12087_v25 }
 0x12c   : > { %v565_v47 = vand.u32 4294901760, %v540_v15  ;;  %v10088_v25 = vpack.c.bf16 %v1263_v43, %v1256_v40 }
 0x12d   : > { %v368_v1 = vadd.f32 %v366_v63, %v363_v0  ;;  %v549_v63 = vand.u32 4294901760, %v528_v52  ;;  %v553_v0 = vand.u32 4294901760, %v531_v53  ;;  %v12146_v10 = vand.u32 4294901760, %v629_v61 }
 0x12e   : > { %v10061_v11 = vpack.c.bf16 %v1265_v60, %v1258_v57  ;;  %v12176_v57 = vsub.f32 %v536_v9, %v563_v45 }
 0x12f   : > { %11606 = vtanh.f32 %v368_v1  ;;  %v534_v1 = vld [vmem:[#allocation9 + $0xf8] sm:$0xff]  ;;  %v12148_v13 = vpack.c.bf16 %v553_v0, %v549_v63  ;;  %v12150_v14 = vsub.f32 %v528_v52, %v549_v63  ;;  %v12152_v18 = vsub.f32 %v531_v53, %v553_v0  ;;  %8942 = vmatmul.mubr.f32.vlgmr.msra.gmra.mrb[0].mxu1 %v12146_v10 }
 0x130   : > { %v557_v22 = vand.u32 4294901760, %v534_v1  ;;  %8956 = vmatprep.mubr.msk.f32.mxu1 %vm11841_vm11, %v15388_v19  ;;  %v15789_v43 = vand.u32 4294901760, %v12176_v57 }
 0x131   : > { %9974 = vmatprep.subr.bf16.mxu0 %v12148_v13  ;;  %v15781_v26 = vand.u32 4294901760, %v12152_v18 }
 0x132   : > { %v12164_v46 = vsub.f32 %v534_v1, %v557_v22  ;;  %v639_v1 = vand.u32 4294901760, %v12150_v14 }
 0x139   : > { %v11607_v2 = vpop.eup %11606 }
 0x13a   : > { %v371_v3 = vsel %vm370_vm10, %v11607_v2, -inf }
 0x13b   : > { %372 = vmax.xlane.f32.xlu1 %v371_v3  ;;  %v10058_v3 = vpack.c.bf16 %v1251_v56, %v1244_v55  ;;  %v571_v55 = vand.u32 4294901760, %v542_v23 }
 0x13d   : > { %v12189_v0 = vsub.f32 %v542_v23, %v571_v55 }
 0x1c8   : > { %v373_v4 = vpop.xlane.xlu1 %372 }
 0x1c9   : > { %v374_v5 = vsub.f32 %v11607_v2, %v373_v4  ;;  %v10055_v2 = vpack.c.bf16 %v1237_v50, %v1230_v49  ;;  %v551_v4 = vand.u32 4294901760, %v527_v58  ;;  %v569_v49 = vand.u32 4294901760, %v543_v16 }
 0x1ca   : > { %v567_v50 = vand.u32 4294901760, %v539_v17 }
 0x1cb   : > { %v375_v6 = vmul.f32 1.442695, %v374_v5  ;;  %v555_v5 = vand.u32 4294901760, %v530_v59  ;;  %v12156_v21 = vsub.f32 %v527_v58, %v551_v4  ;;  %10056 = vmatpush3.bf16.msra.mxu1 %v10055_v2  ;;  %v12178_v58 = vpack.c.bf16 %v569_v49, %v565_v47 }
 0x1cc   : > { %10057 = vmatprep.subr.bf16.mxu1 %v15395_v12  ;;  %v12183_v60 = vsub.f32 %v543_v16, %v569_v49  ;;  %v12185_v61 = vpack.c.bf16 %v571_v55, %v567_v50  ;;  %v12187_v63 = vsub.f32 %v539_v17, %v567_v50  ;;  %v15386_v2 = vand.u32 4294901760, %v12152_v18 }
 0x1cd   : > { %11608 = vpow2.f32 %v375_v6  ;;  %v537_v6 = vld [vmem:[#allocation9 + $0x110] sm:$0xff]  ;;  %v12154_v20 = vpack.c.bf16 %v555_v5, %v551_v4  ;;  %v12160_v32 = vsub.f32 %v530_v59, %v555_v5  ;;  %v12180_v59 = vsub.f32 %v540_v15, %v565_v47 }
 0x1ce   : > { %v561_v41 = vand.u32 4294901760, %v537_v6  ;;  %v15384_v4 = vand.u32 4294901760, %v12156_v21  ;;  %v640_v15 = vsub.f32 %v12150_v14, %v639_v1  ;;  %v652_v16 = vsub.f32 %v12152_v18, %v15386_v2 }
 0x1cf   : > { %9976 = vmatpush1.bf16.msra.mxu0 %v12154_v20  ;;  %10059 = vmatpush3.bf16.msra.mxu1 %v10058_v3  ;;  %v15383_v5 = vand.u32 4294901760, %v12160_v32  ;;  %v15387_v3 = vand.u32 4294901760, %v12176_v57  ;;  %v687_v2 = vand.u32 4294901760, %v12180_v59 }
 0x1d0   : > { %v12168_v51 = vpack.c.bf16 %v561_v41, %v557_v22  ;;  %v12170_v52 = vsub.f32 %v537_v6, %v561_v41  ;;  %10060 = vmatprep.subr.bf16.mxu1 %v15395_v12  ;;  %v15381_v6 = vand.u32 4294901760, %v12164_v46  ;;  %v646_v17 = vsub.f32 %v12156_v21, %v15384_v4 }
 0x1d1   : > { %v658_v22 = vsub.f32 %v12160_v32, %v15383_v5  ;;  %v641_v47 = vand.u32 4294901760, %v640_v15  ;;  %v653_v49 = vand.u32 4294901760, %v652_v16  ;;  %v693_v16 = vand.u32 4294901760, %v12187_v63 }
 0x1d2   : > { %9978 = vmatprep.subr.bf16.mxu0 %v12168_v51  ;;  %v664_v23 = vsub.f32 %v12164_v46, %v15381_v6  ;;  %v647_v50 = vand.u32 4294901760, %v646_v17  ;;  %v10067_v6 = vpack.c.bf16 %v12095_v29, %v12091_v27  ;;  %v705_v17 = vand.u32 4294901760, %v12189_v0 }
 0x1d3   : > { %10062 = vmatpush3.bf16.msra.mxu1 %v10061_v11  ;;  %v659_v55 = vand.u32 4294901760, %v658_v22  ;;  %v9985_v4 = vpack.c.bf16 %v653_v49, %v641_v47  ;;  %v10021_v27 = vpack.c.bf16 %v15781_v26, %v639_v1  ;;  %v15783_v29 = vand.u32 4294901760, %v12160_v32  ;;  %v515_v26 = vld [vmem:[#allocation9 + $0x68] sm:$0xff] }
 0x1d4   : > { %10063 = vmatprep.subr.bf16.mxu1 %v15395_v12 }
 0x1d5   : > { %v9987_v11 = vpack.c.bf16 %v659_v55, %v647_v50 }
 0x1d6   : > { %8957 = vmatmul.mubr.f32.vlgmr.msra.gmra.mrb[2].mxu1 %v12106_v35 }
 0x1d7   : > { %v12078_v7 = vpop.eup %11608  ;;  %10065 = vmatpush3.bf16.msra.mxu1 %v10064_v62  ;;  %8971 = vmatprep.mubr.msk.f32.mxu1 %vm11841_vm11, %v15388_v19  ;;  %v706_v62 = vsub.f32 %v12189_v0, %v705_v17 }
 0x1d8   : > { %v377_v8 = vsel %vm370_vm10, %v12078_v7, 0.0  ;;  %10066 = vmatprep.subr.bf16.mxu1 %v15395_v12 }
 0x1d9   : > { %378 = vadd.xlane.f32.xlu0 %v377_v8  ;;  %v533_v8 = vld [vmem:[#allocation9 + $0xf0] sm:$0xff]  ;;  %v707_v49 = vand.u32 4294901760, %v706_v62  ;;  %v505_v62 = vld [vmem:[#allocation9 + $0x18] sm:$0xff] }
 0x1da   : > { %v559_v42 = vand.u32 4294901760, %v533_v8 }
 0x1db   : > { %10068 = vmatpush3.bf16.msra.mxu1 %v10067_v6  ;;  %v9999_v6 = vpack.c.bf16 %v12160_v32, %v12156_v21  ;;  %v419_v32 = vsub.s32 5, %v12067_v37 }
 0x1dc   : > { %v12172_v53 = vpack.c.bf16 %v563_v45, %v559_v42  ;;  %v12174_v56 = vsub.f32 %v533_v8, %v559_v42  ;;  %v15382_v8 = vand.u32 4294901760, %v12170_v52  ;;  %v682_v45 = vsub.f32 %v12176_v57, %v15387_v3  ;;  %10069 = vmatprep.subr.bf16.mxu1 %v15395_v12 }
 0x1dd   : > { %v699_v3 = vand.u32 4294901760, %v12183_v60 }
 0x1de   : > { %9980 = vmatpush1.bf16.msra.mxu0 %v12172_v53  ;;  %v15385_v9 = vand.u32 4294901760, %v12174_v56  ;;  %v676_v41 = vsub.f32 %v12170_v52, %v15382_v8  ;;  %v665_v8 = vand.u32 4294901760, %v664_v23  ;;  %v683_v15 = vand.u32 4294901760, %v682_v45 }
 0x1df   : > { %9982 = vmatprep.subr.bf16.mxu0 %v12178_v58  ;;  %v688_v23 = vsub.f32 %v12180_v59, %v687_v2  ;;  %v15788_v40 = vand.u32 4294901760, %v12174_v56 }
 0x1e0   : > { %v670_v42 = vsub.f32 %v12174_v56, %v15385_v9  ;;  %v677_v5 = vand.u32 4294901760, %v676_v41  ;;  %v700_v41 = vsub.f32 %v12183_v60, %v699_v3 }
 0x1e2   : > { %9984 = vmatpush1.bf16.msra.mxu0 %v12185_v61  ;;  %v671_v9 = vand.u32 4294901760, %v670_v42  ;;  %v9989_v22 = vpack.c.bf16 %v677_v5, %v665_v8  ;;  %v694_v42 = vsub.f32 %v12187_v63, %v693_v16  ;;  %v689_v5 = vand.u32 4294901760, %v688_v23 }
 0x1e3   : > { %9986 = vmatprep.subr.bf16.mxu0 %v9985_v4  ;;  %v701_v8 = vand.u32 4294901760, %v700_v41  ;;  %v10070_v4 = vpack.c.bf16 %v12100_v31, %v12097_v30  ;;  %v10082_v23 = vpack.c.bf16 %v1235_v34, %v1228_v33  ;;  %v10085_v41 = vpack.c.bf16 %v1249_v39, %v1242_v38 }
 0x1e4   : > { %v9991_v45 = vpack.c.bf16 %v683_v15, %v671_v9  ;;  %v695_v47 = vand.u32 4294901760, %v694_v42  ;;  %v10001_v9 = vpack.c.bf16 %v12170_v52, %v12164_v46  ;;  %v10005_v15 = vpack.c.bf16 %v12183_v60, %v12180_v59  ;;  %v502_v42 = vld [vmem:[#allocation9] sm:$0xff] }
 0x1e5   : > { %631 = vmatmul.mubr.f32.vlgmr.msra.gmra.mrb[0].mxu0 %v12146_v10  ;;  %v9993_v50 = vpack.c.bf16 %v701_v8, %v689_v5  ;;  %10071 = vmatpush3.bf16.msra.mxu1 %v10070_v4  ;;  %v9997_v10 = vpack.c.bf16 %v12152_v18, %v12150_v14  ;;  %v15784_v31 = vand.u32 4294901760, %v12164_v46  ;;  %v15785_v33 = vand.u32 4294901760, %v12170_v52  ;;  %v509_v4 = vld [vmem:[#allocation9 + $0x38] sm:$0xff] }
 0x1e6   : > { %9988 = vmatpush1.bf16.msra.mxu0 %v9987_v11  ;;  %761 = vmatprep.mubr.f32.mxu0 %v15388_v19  ;;  %v9995_v55 = vpack.c.bf16 %v707_v49, %v695_v47  ;;  %v10003_v11 = vpack.c.bf16 %v12176_v57, %v12174_v56  ;;  %v12335_v38 = vsub.s32 1, %v12067_v37  ;;  %v12338_v39 = vsub.s32 0, %v12067_v37 }
 0x1e7   : > { %9990 = vmatprep.subr.bf16.mxu0 %v9989_v22  ;;  %10072 = vmatprep.subr.bf16.mxu1 %v15395_v12  ;;  %v10007_v22 = vpack.c.bf16 %v12189_v0, %v12187_v63  ;;  %v10025_v34 = vpack.c.bf16 %v15785_v33, %v15784_v31  ;;  %v10029_v14 = vpack.c.bf16 %v699_v3, %v687_v2  ;;  %v12353_v46 = vsub.s32 2, %v12067_v37  ;;  %v506_v3 = vld [vmem:[#allocation9 + $0x20] sm:$0xff]  ;;  %v516_v31 = vld [vmem:[#allocation9 + $0x70] sm:$0xff] }
 0x1e8   : > { %8972 = vmatmul.mubr.f32.vlgmr.msra.gmra.mrb[4].mxu1 %v12119_v44  ;;  %15786 = vst [vmem:[#allocation18_spill] sm:$0xff] %v12335_v38  ;;  %15787 = vst [vmem:[#allocation19_spill] sm:$0xff] %v12338_v39  ;;  %v433_v57 = vsub.s32 7, %v12067_v37  ;;  %v405_v59 = vsub.s32 3, %v12067_v37  ;;  %v412_v63 = vsub.s32 4, %v12067_v37  ;;  %v426_v2 = vsub.s32 6, %v12067_v37 }
 0x1e9   : > { %10074 = vmatpush3.bf16.msra.mxu1 %v12085_v24  ;;  %8986 = vmatprep.mubr.msk.f32.mxu1 %vm11841_vm11, %v15388_v19  ;;  %15790 = vst [vmem:[#allocation20_spill] sm:$0xff] %v12353_v46  ;;  %v1674_v5 = vand.u32 4294901760, %v502_v42  ;;  %v1678_v8 = vand.u32 4294901760, %v505_v62 }
 0x1ea   : > { %9992 = vmatpush1.bf16.msra.mxu0 %v9991_v45  ;;  %10075 = vmatprep.subr.bf16.mxu1 %v15395_v12 }
 0x1eb   : > { %9994 = vmatprep.subr.bf16.mxu0 %v9993_v50 }
 0x1ed   : > { %10077 = vmatpush3.bf16.msra.mxu1 %v12093_v28 }
 0x1ee   : > { %9996 = vmatpush1.bf16.msra.mxu0 %v9995_v55  ;;  %10078 = vmatprep.subr.bf16.mxu1 %v15395_v12  ;;  %v1680_v55 = vand.u32 4294901760, %v509_v4 }
 0x1ef   : > { %9998 = vmatprep.subr.bf16.mxu0 %v9997_v10 }
 0x1f1   : > { %763 = vmatmul.mubr.f32.vlgmr.msra.gmra.mrb[0].mxu0 %v12106_v35  ;;  %10080 = vmatpush3.bf16.msra.mxu1 %v12131_v48 }
 0x1f2   : > { %10000 = vmatpush1.bf16.msra.mxu0 %v9999_v6  ;;  %857 = vmatprep.mubr.f32.mxu0 %v15388_v19  ;;  %v508_v6 = vld [vmem:[#allocation9 + $0x30] sm:$0xff] }
 0x1f3   : > { %10002 = vmatprep.subr.bf16.mxu0 %v10001_v9  ;;  %10081 = vmatprep.subr.bf16.mxu1 %v15395_v12  ;;  %v511_v9 = vld [vmem:[#allocation9 + $0x48] sm:$0xff] }
 0x1f4   : > { %8987 = vmatmul.mubr.f32.vlgmr.msra.gmra.mrb[6].mxu1 %v12138_v54 }
 0x1f5   : > { %10083 = vmatpush3.bf16.msra.mxu1 %v10082_v23  ;;  %9001 = vmatprep.mubr.msk.f32.mxu1 %vm11841_vm11, %v15388_v19  ;;  %v513_v23 = vld [vmem:[#allocation9 + $0x58] sm:$0xff] }
 0x1f6   : > { %10004 = vmatpush1.bf16.msra.mxu0 %v10003_v11  ;;  %10084 = vmatprep.subr.bf16.mxu1 %v15395_v12  ;;  %v510_v11 = vld [vmem:[#allocation9 + $0x40] sm:$0xff] }
 0x1f7   : > { %10006 = vmatprep.subr.bf16.mxu0 %v10005_v15  ;;  %v1682_v15 = vand.u32 4294901760, %v508_v6 }
 0x1f9   : > { %10086 = vmatpush3.bf16.msra.mxu1 %v10085_v41  ;;  %v2326_v41 = vand.u32 4294901760, %v510_v11 }
 0x1fa   : > { %10008 = vmatpush1.bf16.msra.mxu0 %v10007_v22  ;;  %10087 = vmatprep.subr.bf16.mxu1 %v15395_v12  ;;  %v1686_v22 = vand.u32 4294901760, %v511_v9 }
 0x1fb   : > { %10010 = vmatprep.subr.bf16.mxu0 %v12148_v13 }
 0x1fd   : > { %860 = vmatmul.mubr.f32.vlgmr.msra.gmra.mrb[0].mxu0 %v12119_v44  ;;  %10089 = vmatpush3.bf16.msra.mxu1 %v10088_v25  ;;  %v10027_v44 = vpack.c.bf16 %v15789_v43, %v15788_v40  ;;  %v2329_v25 = vand.u32 4294901760, %v513_v23  ;;  %v2332_v43 = vand.u32 4294901760, %v516_v31 }
 0x1fe   : > { %10012 = vmatpush1.bf16.msra.mxu0 %v12154_v20  ;;  %942 = vmatprep.mubr.f32.mxu0 %v15388_v19 }
 0x1ff   : > { %10014 = vmatprep.subr.bf16.mxu0 %v12168_v51  ;;  %10090 = vmatprep.subr.bf16.mxu1 %v15395_v12 }
 0x200   : > { %9002 = vmatmul.mubr.f32.vlgmr.msra.gmra.mrb[8].mxu1 %v12106_v35 }
 0x201   : > { %10092 = vmatpush3.bf16.msra.mxu1 %v12085_v24  ;;  %9016 = vmatprep.mubr.msk.f32.mxu1 %vm11841_vm11, %v15388_v19 }
 0x202   : > { %10016 = vmatpush1.bf16.msra.mxu0 %v12172_v53  ;;  %10093 = vmatprep.subr.bf16.mxu1 %v15395_v12 }
 0x203   : > { %10018 = vmatprep.subr.bf16.mxu0 %v12178_v58 }
 0x205   : > { %10095 = vmatpush3.bf16.msra.mxu1 %v12093_v28  ;;  %v15782_v28 = vand.u32 4294901760, %v12156_v21 }
 0x206   : > { %10020 = vmatpush1.bf16.msra.mxu0 %v12185_v61  ;;  %10096 = vmatprep.subr.bf16.mxu1 %v15395_v12 }
 0x207   : > { %v10023_v30 = vpack.c.bf16 %v15783_v29, %v15782_v28  ;;  %10022 = vmatprep.subr.bf16.mxu0 %v10021_v27  ;;  %v518_v27 = vld [vmem:[#allocation9 + $0x80] sm:$0xff]  ;;  %v12388_v28 = vpack.c.bf16 %v2329_v25, %v2326_v41  ;;  %v1688_v29 = vand.u32 4294901760, %v515_v26 }
 0x208   : > { %v1692_v33 = vand.u32 4294901760, %v518_v27 }
 0x209   : > { %946 = vmatmul.mubr.f32.vlgmr.msra.gmra.mrb[0].mxu0 %v12138_v54  ;;  %10098 = vmatpush3.bf16.msra.mxu1 %v12131_v48  ;;  %15796 = vst [vmem:[#allocation26_spill] sm:$0xff] %v12388_v28 }
 0x20a   : > { %1052 = vmatprep.mubr.f32.mxu0 %v15388_v19  ;;  %10195 = vmatprep.subr.bf16.mxu1 %v15395_v12 }
 0x20b   : > { %10024 = vmatpush1.bf16.msra.mxu0 %v10023_v30  ;;  %v514_v30 = vld [vmem:[#allocation9 + $0x60] sm:$0xff] }
 0x20c   : > { %9017 = vmatmul.mubr.f32.vlgmr.msra.gmra.mrb[10].mxu1 %v12106_v35  ;;  %10026 = vmatprep.subr.bf16.mxu0 %v10025_v34  ;;  %v1690_v34 = vand.u32 4294901760, %v514_v30 }
 0x20d   : > { %9035 = vmatprep.mubr.msk.f32.mxu1 %vm11841_vm11, %v15388_v19 }
 0x20f   : > { %10028 = vmatpush1.bf16.msra.mxu0 %v10027_v44 }
 0x210   : > { %10030 = vmatprep.subr.bf16.mxu0 %v10029_v14  ;;  %v12397_v14 = vsub.f32 %v505_v62, %v1678_v8  ;;  %v525_v62 = vld [vmem:[#allocation9 + $0xb8] sm:$0xff] }
 0x266   : > { %v379_v24 = vpop.xlane.xlu0 %378 }
 0x267   : > { %11610 = vrcp.f32 %v379_v24  ;;  %v12385_v24 = vpack.c.bf16 %v1686_v22, %v1682_v15 }
 0x269   : > { %15795 = vst [vmem:[#allocation25_spill] sm:$0xff] %v12385_v24 }
 0x271   : > { %v11611_v48 = vpop.eup %11610 }
 0x272   : > { %v381_v54 = vmul.f32 %v11611_v48, %v12078_v7  ;;  %v10031_v7 = vpack.c.bf16 %v705_v17, %v693_v16  ;;  %v1676_v17 = vand.u32 4294901760, %v506_v3 }
 0x274   : > { %v392_v18 = vrot.slane %v381_v54, %v12335_v38  ;;  %v385_v21 = vrot.slane %v381_v54, %v12338_v39  ;;  %v420_v52 = vrot.slane %v381_v54, %v419_v32  ;;  %v399_v56 = vrot.slane %v381_v54, %v12353_v46  ;;  %10032 = vmatpush1.bf16.msra.mxu0 %v10031_v7 }
 0x275   : > { %10034 = vmatprep.subr.bf16.mxu0 %v12148_v13  ;;  %v434_v60 = vrot.slane %v381_v54, %v433_v57  ;;  %v406_v1 = vrot.slane %v381_v54, %v405_v59  ;;  %v413_v0 = vrot.slane %v381_v54, %v412_v63  ;;  %v503_v13 = vld [vmem:[#allocation9 + $0x8] sm:$0xff]  ;;  %v427_v37 = vrot.slane %v381_v54, %v426_v2  ;;  %v524_v63 = vld [vmem:[#allocation9 + $0xb0] sm:$0xff] }
 0x276   : > { %394 = vbcast.lane.b32.xlu0 %v392_v18, 256  ;;  %387 = vbcast.lane.b32.xlu1 %v385_v21, 256  ;;  %v1672_v16 = vand.u32 4294901760, %v503_v13  ;;  %v12393_v48 = vsub.f32 %v506_v3, %v1676_v17  ;;  %v12395_v54 = vsub.f32 %v502_v42, %v1674_v5  ;;  %v12404_v32 = vsub.f32 %v509_v4, %v1680_v55  ;;  %v523_v2 = vld [vmem:[#allocation9 + $0xa8] sm:$0xff]  ;;  %v522_v42 = vld [vmem:[#allocation9 + $0xa0] sm:$0xff] }
 0x277   : > { %1054 = vmatmul.mubr.f32.vlgmr.msra.gmra.mrb[0].mxu0 %v12106_v35  ;;  %v12409_v57 = vsub.f32 %v508_v6, %v1682_v15  ;;  %v12411_v59 = vsub.f32 %v511_v9, %v1686_v22  ;;  %v12420_v3 = vsub.f32 %v515_v26, %v1688_v29  ;;  %v1702_v4 = vand.u32 4294901760, %v523_v2 }
 0x278   : > { %10036 = vmatpush1.bf16.msra.mxu0 %v12154_v20  ;;  %1136 = vmatprep.mubr.f32.mxu0 %v15388_v19  ;;  %v504_v20 = vld [vmem:[#allocation9 + $0x10] sm:$0xff]  ;;  %v12371_v47 = vpack.c.bf16 %v1676_v17, %v1672_v16  ;;  %v12391_v44 = vsub.f32 %v503_v13, %v1672_v16  ;;  %v12418_v13 = vpack.c.bf16 %v1692_v33, %v1688_v29  ;;  %v2341_v6 = vand.u32 4294901760, %v525_v62 }
 0x279   : > { %10038 = vmatprep.subr.bf16.mxu0 %v12168_v51  ;;  %v507_v51 = vld [vmem:[#allocation9 + $0x28] sm:$0xff]  ;;  %v2320_v45 = vand.u32 4294901760, %v504_v20  ;;  %v12422_v16 = vsub.f32 %v518_v27, %v1692_v33 }
 0x27a   : > { %422 = vbcast.lane.b32.xlu0 %v420_v52, 256  ;;  %401 = vbcast.lane.b32.xlu1 %v399_v56, 256  ;;  %15791 = vst [vmem:[#allocation21_spill] sm:$0xff] %v12371_v47  ;;  %v2323_v49 = vand.u32 4294901760, %v507_v51  ;;  %v519_v52 = vld [vmem:[#allocation9 + $0x88] sm:$0xff]  ;;  %v521_v56 = vld [vmem:[#allocation9 + $0x98] sm:$0xff]  ;;  %v12457_v27 = vsub.f32 %v525_v62, %v2341_v6 }
 0x27b   : > { %v12400_v18 = vsub.f32 %v504_v20, %v2320_v45  ;;  %15797 = vst [vmem:[#allocation27_spill] sm:$0xff] %v12418_v13  ;;  %v12426_v20 = vsub.f32 %v514_v30, %v1690_v34  ;;  %v15406_v29 = vand.u32 4294901760, %v12391_v44  ;;  %v15404_v30 = vand.u32 4294901760, %v12393_v48 }
 0x27c   : > { %10040 = vmatpush1.bf16.msra.mxu0 %v12172_v53  ;;  %v12374_v53 = vpack.c.bf16 %v1678_v8, %v1674_v5  ;;  %v12377_v50 = vpack.c.bf16 %v2323_v49, %v2320_v45  ;;  %v12402_v21 = vsub.f32 %v507_v51, %v2323_v49  ;;  %v2335_v8 = vand.u32 4294901760, %v519_v52  ;;  %15806 = vst [vmem:[#allocation36_spill] sm:$0xff] %v12457_v27 }
 0x27d   : > { %10042 = vmatprep.subr.bf16.mxu0 %v12178_v58  ;;  %v512_v58 = vld [vmem:[#allocation9 + $0x50] sm:$0xff]  ;;  %v12430_v51 = vsub.f32 %v516_v31, %v2332_v43  ;;  %v1696_v45 = vand.u32 4294901760, %v521_v56  ;;  %v1700_v49 = vand.u32 4294901760, %v524_v63  ;;  %v15391_v31 = vand.u32 4294901760, %v12397_v14 }
 0x27e   : > { %436 = vbcast.lane.b32.xlu0 %v434_v60, 256  ;;  %408 = vbcast.lane.b32.xlu1 %v406_v1, 256  ;;  %15792 = vst [vmem:[#allocation22_spill] sm:$0xff] %v12374_v53  ;;  %15793 = vst [vmem:[#allocation23_spill] sm:$0xff] %v12377_v50  ;;  %v1684_v10 = vand.u32 4294901760, %v512_v58  ;;  %v12413_v60 = vsub.f32 %v510_v11, %v2326_v41  ;;  %v12415_v1 = vsub.f32 %v513_v23, %v2329_v25 }
 0x27f   : > { %10197 = vmatpush3.bf16.msra.mxu1 %v12377_v50  ;;  %v12438_v9 = vpack.c.bf16 %v1700_v49, %v1696_v45  ;;  %v12440_v11 = vsub.f32 %v521_v56, %v1696_v45  ;;  %v12442_v15 = vsub.f32 %v524_v63, %v1700_v49  ;;  %v12449_v41 = vsub.f32 %v523_v2, %v1702_v4 }
 0x280   : > { %10044 = vmatpush1.bf16.msra.mxu0 %v12185_v61  ;;  %v12381_v61 = vpack.c.bf16 %v1684_v10, %v1680_v55  ;;  %10198 = vmatprep.subr.bf16.mxu1 %v15395_v12  ;;  %v12406_v7 = vsub.f32 %v512_v58, %v1684_v10  ;;  %v12434_v58 = vpack.c.bf16 %v2335_v8, %v2332_v43  ;;  %v2338_v10 = vand.u32 4294901760, %v522_v42 }
 0x281   : > { %10100 = vmatprep.subr.bf16.mxu0 %v12371_v47  ;;  %v12436_v55 = vsub.f32 %v519_v52, %v2335_v8  ;;  %15800 = vst [vmem:[#allocation30_spill] sm:$0xff] %v12438_v9  ;;  %15803 = vst [vmem:[#allocation33_spill] sm:$0xff] %v12449_v41  ;;  %v15390_v33 = vand.u32 4294901760, %v12400_v18  ;;  %v1767_v43 = vsub.f32 %v12391_v44, %v15406_v29  ;;  %v2454_v39 = vand.u32 4294901760, %v12457_v27 }
 0x282   : > { %415 = vbcast.lane.b32.xlu1 %v413_v0, 256  ;;  %15794 = vst [vmem:[#allocation24_spill] sm:$0xff] %v12381_v61  ;;  %v520_v0 = vld [vmem:[#allocation9 + $0x90] sm:$0xff]  ;;  %15799 = vst [vmem:[#allocation29_spill] sm:$0xff] %v12434_v58  ;;  %v12451_v25 = vpack.c.bf16 %v2341_v6, %v2338_v10  ;;  %v12453_v26 = vsub.f32 %v522_v42, %v2338_v10  ;;  %v1779_v52 = vsub.f32 %v12393_v48, %v15404_v30 }
 0x283   : > { %1138 = vmatmul.mubr.f32.vlgmr.msra.gmra.mrb[0].mxu0 %v12106_v35  ;;  %v517_v35 = vld [vmem:[#allocation9 + $0x78] sm:$0xff]  ;;  %10200 = vmatpush3.bf16.msra.mxu1 %v12388_v28  ;;  %v15402_v63 = vand.u32 4294901760, %v12406_v7  ;;  %v2406_v2 = vsub.f32 %v12400_v18, %v15390_v33  ;;  %v1768_v8 = vand.u32 4294901760, %v1767_v43  ;;  %v1838_v30 = vand.u32 4294901760, %v12440_v11 }
 0x284   : > { %10102 = vmatpush1.bf16.msra.mxu0 %v12374_v53  ;;  %1752 = vmatprep.mubr.f32.mxu0 %v15388_v19  ;;  %v1694_v40 = vand.u32 4294901760, %v517_v35  ;;  %15804 = vst [vmem:[#allocation34_spill] sm:$0xff] %v12451_v25  ;;  %15805 = vst [vmem:[#allocation35_spill] sm:$0xff] %v12453_v26  ;;  %v1780_v45 = vand.u32 4294901760, %v1779_v52  ;;  %v15398_v52 = vand.u32 4294901760, %v12413_v60 }
 0x285   : > { %10104 = vmatprep.subr.bf16.mxu0 %v12381_v61  ;;  %10201 = vmatprep.subr.bf16.mxu1 %v15395_v12  ;;  %v2407_v10 = vand.u32 4294901760, %v2406_v2 }
 0x286   : > { %429 = vbcast.lane.b32.xlu1 %v427_v37, 256  ;;  %v12424_v17 = vpack.c.bf16 %v1694_v40, %v1690_v34  ;;  %v12428_v5 = vsub.f32 %v517_v35, %v1694_v40  ;;  %v1698_v37 = vand.u32 4294901760, %v520_v0  ;;  %v15393_v35 = vand.u32 4294901760, %v12395_v54 }
 0x287   : > { %10203 = vmatpush3.bf16.msra.mxu1 %v12434_v58  ;;  %v15392_v34 = vand.u32 4294901760, %v12402_v21  ;;  %v15394_v40 = vand.u32 4294901760, %v12404_v32  ;;  %v10115_v33 = vpack.c.bf16 %v1780_v45, %v1768_v8 }
 0x288   : > { %10106 = vmatpush1.bf16.msra.mxu0 %v12385_v24  ;;  %15798 = vst [vmem:[#allocation28_spill] sm:$0xff] %v12424_v17  ;;  %v12444_v22 = vpack.c.bf16 %v1702_v4, %v1698_v37  ;;  %v12447_v23 = vsub.f32 %v520_v0, %v1698_v37  ;;  %10204 = vmatprep.subr.bf16.mxu1 %v15395_v12 }
 0x289   : > { %10108 = vmatprep.subr.bf16.mxu0 %v12418_v13  ;;  %v1773_v56 = vsub.f32 %v12395_v54, %v15393_v35  ;;  %v1785_v0 = vsub.f32 %v12397_v14, %v15391_v31  ;;  %v2413_v42 = vsub.f32 %v12402_v21, %v15392_v34  ;;  %v1791_v62 = vsub.f32 %v12404_v32, %v15394_v40  ;;  %v11633_v13 = vld [vmem:[#allocation4] sm:$0xff] }
 0x28a   : > { %15801 = vst [vmem:[#allocation31_spill] sm:$0xff] %v12444_v22  ;;  %15802 = vst [vmem:[#allocation32_spill] sm:$0xff] %v12447_v23  ;;  %v1803_v37 = vsub.f32 %v12406_v7, %v15402_v63  ;;  %v15401_v34 = vand.u32 4294901760, %v12409_v57  ;;  %v15399_v35 = vand.u32 4294901760, %v12411_v59 }
 0x28b   : > { %10206 = vmatpush3.bf16.msra.mxu1 %v12451_v25  ;;  %v1774_v49 = vand.u32 4294901760, %v1773_v56  ;;  %v1786_v4 = vand.u32 4294901760, %v1785_v0  ;;  %v2414_v6 = vand.u32 4294901760, %v2413_v42  ;;  %v1792_v19 = vand.u32 4294901760, %v1791_v62 }
 0x28c   : > { %10110 = vmatpush1.bf16.msra.mxu0 %v12424_v17  ;;  %10207 = vmatprep.subr.bf16.mxu1 %v15395_v12  ;;  %v1804_v31 = vand.u32 4294901760, %v1803_v37  ;;  %v15397_v56 = vand.u32 4294901760, %v12415_v1  ;;  %v1797_v0 = vsub.f32 %v12409_v57, %v15401_v34  ;;  %v1809_v2 = vsub.f32 %v12411_v59, %v15399_v35 }
 0x28d   : > { %10112 = vmatprep.subr.bf16.mxu0 %v12438_v9  ;;  %v12496_v40 = vpack.c.bf16 %v1786_v4, %v1774_v49  ;;  %v12498_v43 = vpack.c.bf16 %v2414_v6, %v2407_v10  ;;  %v15400_v42 = vand.u32 4294901760, %v12420_v3  ;;  %v2420_v62 = vsub.f32 %v12413_v60, %v15398_v52 }
 0x28e   : > { %v12502_v12 = vpack.c.bf16 %v1804_v31, %v1792_v19  ;;  %v15403_v19 = vand.u32 4294901760, %v12422_v16  ;;  %v15405_v31 = vand.u32 4294901760, %v12426_v20  ;;  %v1798_v8 = vand.u32 4294901760, %v1797_v0 }
 0x28f   : > { %v1810_v45 = vand.u32 4294901760, %v1809_v2  ;;  %v1815_v49 = vsub.f32 %v12420_v3, %v15400_v42  ;;  %v1832_v37 = vand.u32 4294901760, %v12428_v5  ;;  %v2421_v4 = vand.u32 4294901760, %v2420_v62 }
 0x290   : > { %10114 = vmatpush1.bf16.msra.mxu0 %v12444_v22  ;;  %v1827_v6 = vsub.f32 %v12422_v16, %v15403_v19  ;;  %v2433_v35 = vand.u32 4294901760, %v12430_v51  ;;  %v2455_v9 = vsub.f32 %v12457_v27, %v2454_v39 }
 0x291   : > { %10116 = vmatprep.subr.bf16.mxu0 %v10115_v33  ;;  %v2427_v33 = vsub.f32 %v12415_v1, %v15397_v56  ;;  %v1821_v56 = vsub.f32 %v12426_v20, %v15405_v31  ;;  %v12529_v52 = vpack.c.bf16 %v1810_v45, %v1798_v8  ;;  %v1816_v0 = vand.u32 4294901760, %v1815_v49 }
 0x292   : > { %v1833_v2 = vsub.f32 %v12428_v5, %v1832_v37  ;;  %v1828_v34 = vand.u32 4294901760, %v1827_v6  ;;  %v2434_v19 = vsub.f32 %v12430_v51, %v2433_v35  ;;  %v1850_v31 = vand.u32 4294901760, %v12442_v15 }
 0x293   : > { %v2428_v10 = vand.u32 4294901760, %v2427_v33  ;;  %v1822_v62 = vand.u32 4294901760, %v1821_v56  ;;  %v2440_v33 = vand.u32 4294901760, %v12436_v55  ;;  %v1844_v49 = vand.u32 4294901760, %v12447_v23 }
 0x294   : > { %v1834_v63 = vand.u32 4294901760, %v1833_v2  ;;  %v12539_v8 = vpack.c.bf16 %v1828_v34, %v1816_v0  ;;  %v2435_v56 = vand.u32 4294901760, %v2434_v19  ;;  %v1839_v6 = vsub.f32 %v12440_v11, %v1838_v30 }
 0x295   : > { %v12533_v42 = vpack.c.bf16 %v2428_v10, %v2421_v4  ;;  %v2441_v45 = vsub.f32 %v12436_v55, %v2440_v33  ;;  %v1856_v4 = vand.u32 4294901760, %v12449_v41  ;;  %v1851_v2 = vsub.f32 %v12442_v15, %v1850_v31 }
 0x296   : > { %v12544_v10 = vpack.c.bf16 %v1834_v63, %v1822_v62  ;;  %v1845_v36 = vsub.f32 %v12447_v23, %v1844_v49  ;;  %v2447_v34 = vand.u32 4294901760, %v12453_v26  ;;  %v1840_v0 = vand.u32 4294901760, %v1839_v6 }
 0x297   : > { %v2442_v29 = vand.u32 4294901760, %v2441_v45  ;;  %v1857_v46 = vsub.f32 %v12449_v41, %v1856_v4  ;;  %v1852_v38 = vand.u32 4294901760, %v1851_v2 }
 0x298   : > { %v1846_v19 = vand.u32 4294901760, %v1845_v36  ;;  %v2448_v22 = vsub.f32 %v12453_v26, %v2447_v34 }
 0x299   : > { %v12554_v62 = vpack.c.bf16 %v2442_v29, %v2435_v56  ;;  %v1858_v25 = vand.u32 4294901760, %v1857_v46  ;;  %v12557_v45 = vpack.c.bf16 %v1852_v38, %v1840_v0  ;;  %v2456_v46 = vand.u32 4294901760, %v2455_v9 }
 0x29a   : > { %v2449_v17 = vand.u32 4294901760, %v2448_v22  ;;  %v15807_v38 = vand.u32 4294901760, %v12391_v44  ;;  %v15808_v56 = vand.u32 4294901760, %v12393_v48  ;;  %v15814_v0 = vand.u32 4294901760, %v12402_v21 }
 0x29b   : > { %v12564_v2 = vpack.c.bf16 %v1858_v25, %v1846_v19  ;;  %v15813_v25 = vand.u32 4294901760, %v12400_v18  ;;  %v15816_v19 = vand.u32 4294901760, %v12404_v32  ;;  %v15817_v29 = vand.u32 4294901760, %v12406_v7 }
 0x29c   : > { %v12576_v6 = vpack.c.bf16 %v2456_v46, %v2449_v17  ;;  %v12590_v36 = vpack.c.bf16 %v15808_v56, %v15807_v38  ;;  %v15810_v17 = vand.u32 4294901760, %v12395_v54  ;;  %v15811_v46 = vand.u32 4294901760, %v12397_v14 }
 0x29d   : > { %v12602_v9 = vpack.c.bf16 %v15814_v0, %v15813_v25  ;;  %v12608_v58 = vpack.c.bf16 %v15817_v29, %v15816_v19  ;;  %v15819_v38 = vand.u32 4294901760, %v12409_v57  ;;  %v15820_v56 = vand.u32 4294901760, %v12411_v59 }
 0x29e   : > { %15809 = vst [vmem:[#allocation37_spill] sm:$0xff] %v12590_v36  ;;  %v12596_v22 = vpack.c.bf16 %v15811_v46, %v15810_v17  ;;  %v15822_v17 = vand.u32 4294901760, %v12413_v60  ;;  %v15823_v46 = vand.u32 4294901760, %v12415_v1  ;;  %v15825_v0 = vand.u32 4294901760, %v12420_v3 }
 0x29f   : > { %15815 = vst [vmem:[#allocation39_spill] sm:$0xff] %v12602_v9  ;;  %15818 = vst [vmem:[#allocation40_spill] sm:$0xff] %v12608_v58  ;;  %v12614_v63 = vpack.c.bf16 %v15820_v56, %v15819_v38  ;;  %v15826_v25 = vand.u32 4294901760, %v12422_v16  ;;  %v15828_v29 = vand.u32 4294901760, %v12426_v20  ;;  %v12632_v58 = vpack.c.bf16 %v2440_v33, %v2433_v35 }
 0x2a0   : > { %15812 = vst [vmem:[#allocation38_spill] sm:$0xff] %v12596_v22  ;;  %v12620_v22 = vpack.c.bf16 %v15823_v46, %v15822_v17  ;;  %v12634_v38 = vpack.c.bf16 %v1850_v31, %v1838_v30  ;;  %v12636_v56 = vpack.c.bf16 %v1856_v4, %v1844_v49  ;;  %v11634_v30 = vld [vmem:[#allocation4 + $0x28] sm:$0xff]  ;;  %v11635_v49 = vld [vmem:[#allocation4 + $0x10] sm:$0xff] }
 0x2a1   : > { %15821 = vst [vmem:[#allocation41_spill] sm:$0xff] %v12614_v63  ;;  %v12626_v9 = vpack.c.bf16 %v15826_v25, %v15825_v0  ;;  %v12630_v19 = vpack.c.bf16 %v1832_v37, %v15828_v29  ;;  %15830 = vst [vmem:[#allocation45_spill] sm:$0xff] %v12632_v58  ;;  %v12638_v63 = vpack.c.bf16 %v2454_v39, %v2447_v34 }
 0x2a2   : > { %15824 = vst [vmem:[#allocation42_spill] sm:$0xff] %v12620_v22  ;;  %15831 = vst [vmem:[#allocation46_spill] sm:$0xff] %v12634_v38  ;;  %v11632_v22 = vld [vmem:[#allocation4 + $0x8] sm:$0xff]  ;;  %v11636_v38 = vld [vmem:[#allocation4 + $0x38] sm:$0xff] }
 0x2a3   : > { %15827 = vst [vmem:[#allocation43_spill] sm:$0xff] %v12626_v9  ;;  %15829 = vst [vmem:[#allocation44_spill] sm:$0xff] %v12630_v19  ;;  %v11637_v19 = vld [vmem:[#allocation4 + $0x18] sm:$0xff] }
 0x2a4   : > { %15832 = vst [vmem:[#allocation47_spill] sm:$0xff] %v12636_v56  ;;  %15833 = vst [vmem:[#allocation48_spill] sm:$0xff] %v12638_v63 }
 0x2e8   : > { %v395_v17 = vpop.permute.xlu0 %394  ;;  %v388_v46 = vpop.permute.xlu1 %387 }
 0x2e9   : > { %v439_v36 = vmul.f32 %v11632_v22, %v395_v17  ;;  %v438_v28 = vmul.f32 %v11633_v13, %v388_v46 }
 0x2eb   : > { %v453_v0 = vsel %vm281_vm2, %v439_v36, 0.0  ;;  %v446_v25 = vsel %vm281_vm2, %v438_v28, 0.0 }
 0x2ec   : > { %v454_v37 = vrot.slane %v453_v0, 4  ;;  %v447_v29 = vrot.slane %v446_v25, 4  ;;  %v423_v35 = vpop.permute.xlu0 %422  ;;  %v402_v33 = vpop.permute.xlu1 %401 }
 0x2ed   : > { %v443_v31 = vmul.f32 %v11634_v30, %v423_v35  ;;  %v440_v4 = vmul.f32 %v11635_v49, %v402_v33 }
 0x2ee   : > { %v455_v39 = vadd.f32 %v454_v37, %v453_v0  ;;  %v448_v34 = vadd.f32 %v447_v29, %v446_v25 }
 0x2ef   : > { %v481_v63 = vsel %vm281_vm2, %v443_v31, 0.0  ;;  %v460_v22 = vsel %vm281_vm2, %v440_v4, 0.0  ;;  %v11638_v4 = vld [vmem:[#allocation4 + $0x20] sm:$0xff] }
 0x2f0   : > { %v456_v17 = vrot.slane %v455_v39, 2  ;;  %v449_v13 = vrot.slane %v448_v34, 2  ;;  %v461_v46 = vrot.slane %v460_v22, 4  ;;  %v437_v36 = vpop.permute.xlu0 %436  ;;  %v409_v56 = vpop.permute.xlu1 %408  ;;  %v482_v28 = vrot.slane %v481_v63, 4 }
 0x2f1   : > { %v445_v58 = vmul.f32 %v11636_v38, %v437_v36  ;;  %v441_v9 = vmul.f32 %v11637_v19, %v409_v56 }
 0x2f2   : > { %v462_v24 = vadd.f32 %v461_v46, %v460_v22  ;;  %v457_v25 = vadd.f32 %v456_v17, %v455_v39  ;;  %v450_v37 = vadd.f32 %v449_v13, %v448_v34  ;;  %v483_v30 = vadd.f32 %v482_v28, %v481_v63  ;;  %v11639_v39 = vld [vmem:[#allocation4 + $0x30] sm:$0xff] }
 0x2f3   : > { %v495_v35 = vsel %vm281_vm2, %v445_v58, 0.0  ;;  %v467_v0 = vsel %vm281_vm2, %v441_v9, 0.0 }
 0x2f4   : > { %v463_v29 = vrot.slane %v462_v24, 2  ;;  %v416_v33 = vpop.permute.xlu1 %415  ;;  %v496_v31 = vrot.slane %v495_v35, 4  ;;  %v468_v49 = vrot.slane %v467_v0, 4  ;;  %v458_v19 = vrot.slane %v457_v25, 1 }
 0x2f5   : > { %v442_v61 = vmul.f32 %v11638_v4, %v416_v33  ;;  %v451_v58 = vrot.slane %v450_v37, 1  ;;  %v484_v46 = vrot.slane %v483_v30, 2 }
 0x2f6   : > { %v464_v50 = vadd.f32 %v463_v29, %v462_v24  ;;  %v497_v53 = vadd.f32 %v496_v31, %v495_v35  ;;  %v469_v47 = vadd.f32 %v468_v49, %v467_v0  ;;  %v459_v35 = vadd.f32 %v458_v19, %v457_v25 }
 0x2f7   : > { %v474_v38 = vsel %vm281_vm2, %v442_v61, 0.0  ;;  %v452_v0 = vadd.f32 %v451_v58, %v450_v37  ;;  %v485_v29 = vadd.f32 %v484_v46, %v483_v30 }
 0x2f8   : > { %v475_v56 = vrot.slane %v474_v38, 4  ;;  %v430_v22 = vpop.permute.xlu1 %429  ;;  %v470_v9 = vrot.slane %v469_v47, 2  ;;  %v465_v17 = vrot.slane %v464_v50, 1  ;;  %v498_v63 = vrot.slane %v497_v53, 2 }
 0x2f9   : > { %v444_v34 = vmul.f32 %v11639_v39, %v430_v22  ;;  %v1663_v22 = vsel %vm348_vm3, %v459_v35, %v452_v0  ;;  %v15836_v0 = vpack.c.bf16 %v12393_v48, %v12391_v44  ;;  %v15839_v44 = vpack.c.bf16 %v12406_v7, %v12404_v32 }
 0x2fa   : > { %v476_v13 = vadd.f32 %v475_v56, %v474_v38  ;;  %v471_v36 = vadd.f32 %v470_v9, %v469_v47  ;;  %v466_v31 = vadd.f32 %v465_v17, %v464_v50  ;;  %v499_v26 = vadd.f32 %v498_v63, %v497_v53 }
 0x2fb   : > { %v488_v28 = vsel %vm281_vm2, %v444_v34, 0.0  ;;  %v486_v38 = vrot.slane %v485_v29, 1  ;;  %v15844_v7 = vpack.c.bf16 %v12428_v5, %v12426_v20  ;;  %v15853_v20 = vld [vmem:[#allocation21_spill] sm:$0xff]  ;;  %v15854_v5 = vld [vmem:[#allocation22_spill] sm:$0xff] }
 0x2fc   : > { %v477_v33 = vrot.slane %v476_v13, 2  ;;  %v489_v24 = vrot.slane %v488_v28, 4  ;;  %v472_v61 = vrot.slane %v471_v36, 1  ;;  %v1664_v47 = vsel %vm350_vm4, %v466_v31, %v1663_v22  ;;  %v15861_v22 = vld [vmem:[#allocation29_spill] sm:$0xff] }
 0x2fd   : > { %v500_v39 = vrot.slane %v499_v26, 1  ;;  %v487_v50 = vadd.f32 %v486_v38, %v485_v29  ;;  %v15862_v38 = vld [vmem:[#allocation30_spill] sm:$0xff] }
 0x2fe   : > { %v478_v49 = vadd.f32 %v477_v33, %v476_v13  ;;  %v490_v4 = vadd.f32 %v489_v24, %v488_v28  ;;  %v473_v27 = vadd.f32 %v472_v61, %v471_v36  ;;  %v15835_v36 = vmov 0.0   ;;  %v1221_v28 = vpop.f32.mrb[0].mxu1  ;;  %v15851_v61 = vld [vmem:[#allocation35_spill] sm:$0xff] }
 0x2ff   : > { %v501_v58 = vadd.f32 %v500_v39, %v499_v26  ;;  %v15834_v26 = vmov 0.0|0.0   ;;  %v15866_v39 = vld [vmem:[#allocation38_spill] sm:$0xff] }
 0x300   : > { %v479_v23 = vrot.slane %v478_v49, 1  ;;  %v491_v41 = vrot.slane %v490_v4, 2  ;;  %v1665_v25 = vsel %vm352_vm5, %v473_v27, %v1664_v47  ;;  %v15863_v47 = vld [vmem:[#allocation31_spill] sm:$0xff] }
 0x302   : > { %v480_v56 = vadd.f32 %v479_v23, %v478_v49  ;;  %v492_v9 = vadd.f32 %v491_v41, %v490_v4  ;;  %v15859_v49 = vld [vmem:[#allocation27_spill] sm:$0xff]  ;;  %v15860_v4 = vld [vmem:[#allocation28_spill] sm:$0xff] }
 0x304   : > { %v1666_v37 = vsel %vm354_vm6, %v480_v56, %v1665_v25  ;;  %v493_v30 = vrot.slane %v492_v9, 1  ;;  %v15864_v56 = vld [vmem:[#allocation34_spill] sm:$0xff]  ;;  %v15867_v25 = vld [vmem:[#allocation39_spill] sm:$0xff] }
 0x305   : > { %v1667_v53 = vsel %vm356_vm7, %v487_v50, %v1666_v37  ;;  %v15868_v37 = vld [vmem:[#allocation40_spill] sm:$0xff]  ;;  %v15870_v50 = vld [vmem:[#allocation42_spill] sm:$0xff] }
 0x306   : > { %v494_v19 = vadd.f32 %v493_v30, %v492_v9  ;;  %v15865_v9 = vld [vmem:[#allocation37_spill] sm:$0xff] }
 0x307   : > { %v15869_v30 = vld [vmem:[#allocation41_spill] sm:$0xff] }
 0x308   : > { %v1668_v46 = vsel %vm358_vm8, %v494_v19, %v1667_v53  ;;  %v15871_v19 = vld [vmem:[#allocation43_spill] sm:$0xff]  ;;  %v15873_v53 = vld [vmem:[#allocation45_spill] sm:$0xff] }
 0x309   : > { %v1669_v34 = vsel %vm360_vm9, %v501_v58, %v1668_v46  ;;  %v15872_v58 = vld [vmem:[#allocation44_spill] sm:$0xff]  ;;  %v15874_v46 = vld [vmem:[#allocation46_spill] sm:$0xff] }
 0x30a   : > { %v1670_v17 = vsel %vm281_vm2, %v1669_v34, 0  ;;  %v15875_v34 = vld [vmem:[#allocation47_spill] sm:$0xff] }
 0x30b   : > { %v12656_v13 = vand.u32 4294901760, %v1670_v17 }
 0x30d   : > { %v1754_v23 = vsub.f32 %v1670_v17, %v12656_v13  ;;  %v15876_v17 = vld [vmem:[#allocation48_spill] sm:$0xff] }
 0x30f   : > { %v12659_v41 = vand.u32 4294901760, %v1754_v23 }
 0x311   : > { %v1756_v27 = vsub.f32 %v1754_v23, %v12659_v41 }
 0x313   : > { %v1757_v63 = vand.u32 4294901760, %v1756_v27 }
 0x315   : > { %1758 = vmatmul.mubr.f32.vlgmr.msra.gmra.mrb[0].mxu0 %v1757_v63  ;;  %9036 = vmatmul.mubr.f32.vlgmr.msra.gmra.mrb[12].mxu1 %v1757_v63 }
 0x316   : > { %10118 = vmatpush1.bf16.msra.mxu0 %v12496_v40  ;;  %10209 = vmatpush3.bf16.msra.mxu1 %v12498_v43  ;;  %v8943_v40 = vpop.f32.mrb[1].mxu1 }
 0x317   : > { %10120 = vmatprep.subr.bf16.mxu0 %v12502_v12  ;;  %10210 = vmatprep.subr.bf16.mxu1 %v15834_v26  ;;  %v1322_v43 = vpop.f32.mrb[2].mxu1  ;;  %v2880_v40 = vld [vmem:[#allocation9 + $0x198] sm:$0xff] }
 0x318   : > { %1908 = vmatprep.mubr.f32.mxu0 %v15835_v36  ;;  %9054 = vmatprep.mubr.msk.f32.mxu1 %vm11841_vm11, %v15835_v36  ;;  %v8958_v33 = vpop.f32.mrb[3].mxu1 }
 0x319   : > { %v1406_v12 = vpop.f32.mrb[4].mxu1  ;;  %v2887_v33 = vld [vmem:[#allocation9 + $0x1d0] sm:$0xff] }
 0x31a   : > { %10122 = vmatpush1.bf16.msra.mxu0 %v12529_v52  ;;  %10212 = vmatpush3.bf16.msra.mxu1 %v12533_v42  ;;  %v8973_v52 = vpop.f32.mrb[5].mxu1 }
 0x31b   : > { %10124 = vmatprep.subr.bf16.mxu0 %v12539_v8  ;;  %10213 = vmatprep.subr.bf16.mxu1 %v15834_v26  ;;  %v1485_v24 = vpop.f32.mrb[6].mxu1  ;;  %v1323_v8 = vadd.f32 %v1322_v43, %v1221_v28  ;;  %v2877_v28 = vld [vmem:[#allocation9 + $0x180] sm:$0xff]  ;;  %v2884_v43 = vld [vmem:[#allocation9 + $0x1b8] sm:$0xff]  ;;  %v2949_v52 = vand.u32 4294901760, %v2880_v40 }
 0x31c   : > { %v8988_v42 = vpop.f32.mrb[7].mxu1 }
 0x31d   : > { %v1574_v35 = vpop.f32.mrb[8].mxu1  ;;  %v2951_v42 = vand.u32 4294901760, %v2884_v43 }
 0x31e   : > { %10126 = vmatpush1.bf16.msra.mxu0 %v12544_v10  ;;  %10215 = vmatpush3.bf16.msra.mxu1 %v12554_v62  ;;  %v9003_v10 = vpop.f32.mrb[9].mxu1  ;;  %v1407_v62 = vadd.f32 %v1406_v12, %v1323_v8  ;;  %v2945_v12 = vand.u32 4294901760, %v2877_v28  ;;  %v2955_v8 = vand.u32 4294901760, %v2887_v33 }
 0x31f   : > { %10128 = vmatprep.subr.bf16.mxu0 %v12557_v45  ;;  %10216 = vmatprep.subr.bf16.mxu1 %v15834_v26  ;;  %v1651_v45 = vpop.f32.mrb[10].mxu1  ;;  %v11640_v10 = vld [vmem:[#allocation2] sm:$0xff] }
 0x320   : > { %v9018_v29 = vpop.f32.mrb[11].mxu1  ;;  %v1486_v48 = vadd.f32 %v1485_v24, %v1407_v62  ;;  %v12787_v62 = vand.u32 4294901760, %v11640_v10 }
 0x322   : > { %10130 = vmatpush1.bf16.msra.mxu0 %v12564_v2  ;;  %10218 = vmatpush3.bf16.msra.mxu1 %v12576_v6  ;;  %v15837_v2 = vpack.c.bf16 %v12397_v14, %v12395_v54  ;;  %v15838_v6 = vpack.c.bf16 %v12402_v21, %v12400_v18  ;;  %v15840_v54 = vpack.c.bf16 %v12411_v59, %v12409_v57 }
 0x323   : > { %10132 = vmatprep.subr.bf16.mxu0 %v15836_v0  ;;  %10219 = vmatprep.subr.bf16.mxu1 %v15834_v26  ;;  %v15841_v14 = vpack.c.bf16 %v12415_v1, %v12413_v60  ;;  %v1575_v18 = vadd.f32 %v1574_v35, %v1486_v48  ;;  %v15842_v21 = vpack.c.bf16 %v12422_v16, %v12420_v3  ;;  %v15847_v60 = vld [vmem:[#allocation33_spill] sm:$0xff]  ;;  %v15848_v1 = vld [vmem:[#allocation32_spill] sm:$0xff]  ;;  %v2883_v35 = vld [vmem:[#allocation9 + $0x1b0] sm:$0xff] }
 0x324   : > { %v15845_v57 = vpack.c.bf16 %v12436_v55, %v12430_v51  ;;  %v15846_v59 = vpack.c.bf16 %v12442_v15, %v12440_v11  ;;  %v15849_v3 = vpack.c.bf16 %v15847_v60, %v15848_v1  ;;  %v15850_v16 = vld [vmem:[#allocation36_spill] sm:$0xff]  ;;  %v15855_v51 = vld [vmem:[#allocation23_spill] sm:$0xff]  ;;  %v15857_v11 = vld [vmem:[#allocation25_spill] sm:$0xff]  ;;  %15878 = vst [vmem:[#allocation32_spill] sm:$0xff] %v12787_v62  ;;  %v2953_v29 = vand.u32 4294901760, %v2883_v35 }
 0x325   : > { %1910 = vmatmul.mubr.f32.vlgmr.msra.gmra.mrb[0].mxu0 %v12656_v13  ;;  %9055 = vmatmul.mubr.f32.vlgmr.msra.gmra.mrb[14].mxu1 %v12656_v13  ;;  %v12708_v32 = vadd.f32 %v1651_v45, %v1575_v18  ;;  %v15852_v31 = vpack.c.bf16 %v15850_v16, %v15851_v61  ;;  %v15856_v55 = vld [vmem:[#allocation24_spill] sm:$0xff]  ;;  %v15858_v15 = vld [vmem:[#allocation26_spill] sm:$0xff]  ;;  %v2886_v0 = vld [vmem:[#allocation9 + $0x1c8] sm:$0xff] }
 0x326   : > { %10134 = vmatpush1.bf16.msra.mxu0 %v15837_v2  ;;  %10221 = vmatpush3.bf16.msra.mxu1 %v15838_v6  ;;  %v2890_v45 = vld [vmem:[#allocation9 + $0x1e8] sm:$0xff]  ;;  %v2893_v2 = vld [vmem:[#allocation9 + $0x200] sm:$0xff]  ;;  %v12791_v6 = vpack.c.bf16 %v2949_v52, %v2945_v12  ;;  %v2899_v60 = vld [vmem:[#allocation9 + $0x230] sm:$0xff] }
 0x327   : > { %10136 = vmatprep.subr.bf16.mxu0 %v15839_v44  ;;  %10222 = vmatprep.subr.bf16.mxu1 %v15834_v26  ;;  %15843 = vst [vmem:[#allocation49_spill] sm:$0xff] %v12708_v32  ;;  %v2957_v44 = vand.u32 4294901760, %v2886_v0  ;;  %v2889_v48 = vld [vmem:[#allocation9 + $0x1e0] sm:$0xff]  ;;  %v2959_v18 = vand.u32 4294901760, %v2890_v45 }
 0x328   : > { %2012 = vmatprep.mubr.f32.mxu0 %v15835_v36  ;;  %9073 = vmatprep.mubr.msk.f32.mxu1 %vm11841_vm11, %v15835_v36  ;;  %15879 = vst [vmem:[#allocation36_spill] sm:$0xff] %v12791_v6  ;;  %v2961_v16 = vand.u32 4294901760, %v2889_v48 }
 0x32a   : > { %10138 = vmatpush1.bf16.msra.mxu0 %v15840_v54  ;;  %10224 = vmatpush3.bf16.msra.mxu1 %v15841_v14  ;;  %v2892_v54 = vld [vmem:[#allocation9 + $0x1f8] sm:$0xff]  ;;  %v12795_v14 = vpack.c.bf16 %v2955_v8, %v2951_v42 }
 0x32b   : > { %10140 = vmatprep.subr.bf16.mxu0 %v15842_v21  ;;  %10225 = vmatprep.subr.bf16.mxu1 %v15834_v26  ;;  %v2963_v21 = vand.u32 4294901760, %v2893_v2  ;;  %v2965_v61 = vand.u32 4294901760, %v2892_v54 }
 0x32c   : > { %15880 = vst [vmem:[#allocation35_spill] sm:$0xff] %v12795_v14 }
 0x32e   : > { %10142 = vmatpush1.bf16.msra.mxu0 %v15844_v7  ;;  %10227 = vmatpush3.bf16.msra.mxu1 %v15845_v57  ;;  %v12798_v7 = vsub.f32 %v11640_v10, %v12787_v62 }
 0x32f   : > { %10144 = vmatprep.subr.bf16.mxu0 %v15846_v59  ;;  %10228 = vmatprep.subr.bf16.mxu1 %v15834_v26  ;;  %v2896_v59 = vld [vmem:[#allocation9 + $0x218] sm:$0xff] }
 0x330   : > { %15881 = vst [vmem:[#allocation21_spill] sm:$0xff] %v12798_v7 }
 0x332   : > { %10146 = vmatpush1.bf16.msra.mxu0 %v15849_v3  ;;  %10230 = vmatpush3.bf16.msra.mxu1 %v15852_v31  ;;  %v12806_v3 = vsub.f32 %v2877_v28, %v2945_v12  ;;  %v12809_v31 = vsub.f32 %v2880_v40, %v2949_v52  ;;  %v2914_v52 = vld [vmem:[#allocation9 + $0x2a8] sm:$0xff] }
 0x333   : > { %10148 = vmatprep.subr.bf16.mxu0 %v15853_v20  ;;  %10231 = vmatprep.subr.bf16.mxu1 %v15834_v26 }
 0x335   : > { %2015 = vmatmul.mubr.f32.vlgmr.msra.gmra.mrb[0].mxu0 %v1754_v23  ;;  %9074 = vmatmul.mubr.f32.vlgmr.msra.gmra.mrb[16].mxu1 %v1754_v23  ;;  %v2878_v23 = vld [vmem:[#allocation9 + $0x188] sm:$0xff] }
 0x336   : > { %10150 = vmatpush1.bf16.msra.mxu0 %v15854_v5  ;;  %10233 = vmatpush3.bf16.msra.mxu1 %v15855_v51  ;;  %v2943_v27 = vand.u32 4294901760, %v2878_v23 }
 0x337   : > { %10152 = vmatprep.subr.bf16.mxu0 %v15856_v55  ;;  %10234 = vmatprep.subr.bf16.mxu1 %v15834_v26 }
 0x338   : > { %2101 = vmatprep.mubr.f32.mxu0 %v15835_v36  ;;  %9092 = vmatprep.mubr.msk.f32.mxu1 %vm11841_vm11, %v15835_v36  ;;  %v12800_v57 = vsub.f32 %v2878_v23, %v2943_v27  ;;  %v2907_v23 = vld [vmem:[#allocation9 + $0x270] sm:$0xff] }
 0x33a   : > { %10154 = vmatpush1.bf16.msra.mxu0 %v15857_v11  ;;  %10236 = vmatpush3.bf16.msra.mxu1 %v15858_v15 }
 0x33b   : > { %10156 = vmatprep.subr.bf16.mxu0 %v15859_v49  ;;  %10237 = vmatprep.subr.bf16.mxu1 %v15834_v26 }
 0x33e   : > { %10158 = vmatpush1.bf16.msra.mxu0 %v15860_v4  ;;  %10239 = vmatpush3.bf16.msra.mxu1 %v15861_v22 }
 0x33f   : > { %10160 = vmatprep.subr.bf16.mxu0 %v15862_v38  ;;  %10240 = vmatprep.subr.bf16.mxu1 %v15834_v26 }
 0x342   : > { %10162 = vmatpush1.bf16.msra.mxu0 %v15863_v47  ;;  %10242 = vmatpush3.bf16.msra.mxu1 %v15864_v56 }
 0x343   : > { %10164 = vmatprep.subr.bf16.mxu0 %v15865_v9  ;;  %10243 = vmatprep.subr.bf16.mxu1 %v15834_v26  ;;  %v2901_v9 = vld [vmem:[#allocation9 + $0x240] sm:$0xff] }
 0x344   : > { %v2977_v40 = vand.u32 4294901760, %v2901_v9 }
 0x345   : > { %2105 = vmatmul.mubr.f32.vlgmr.msra.gmra.mrb[0].mxu0 %v12659_v41  ;;  %9093 = vmatmul.mubr.f32.vlgmr.msra.gmra.mrb[18].mxu1 %v12659_v41  ;;  %v2881_v41 = vld [vmem:[#allocation9 + $0x1a0] sm:$0xff] }
 0x346   : > { %10166 = vmatpush1.bf16.msra.mxu0 %v15866_v39  ;;  %10245 = vmatpush3.bf16.msra.mxu1 %v15867_v25  ;;  %v2947_v63 = vand.u32 4294901760, %v2881_v41  ;;  %v12830_v39 = vsub.f32 %v2893_v2, %v2963_v21  ;;  %v12832_v25 = vpack.c.bf16 %v2965_v61, %v2961_v16 }
 0x347   : > { %10168 = vmatprep.subr.bf16.mxu0 %v15868_v37  ;;  %10246 = vmatprep.subr.bf16.mxu1 %v15834_v26 }
 0x348   : > { %2223 = vmatprep.mubr.f32.mxu0 %v15835_v36  ;;  %9111 = vmatprep.mubr.msk.f32.mxu1 %vm11841_vm11, %v15835_v36  ;;  %v12785_v24 = vpack.c.bf16 %v2947_v63, %v2943_v27  ;;  %v12804_v1 = vsub.f32 %v2881_v41, %v2947_v63  ;;  %15887 = vst [vmem:[#allocation27_spill] sm:$0xff] %v12832_v25  ;;  %v2910_v41 = vld [vmem:[#allocation9 + $0x288] sm:$0xff] }
 0x349   : > { %v2989_v10 = vand.u32 4294901760, %v2910_v41 }
 0x34a   : > { %10170 = vmatpush1.bf16.msra.mxu0 %v15869_v30  ;;  %10248 = vmatpush3.bf16.msra.mxu1 %v15870_v50  ;;  %15877 = vst [vmem:[#allocation33_spill] sm:$0xff] %v12785_v24  ;;  %v2904_v50 = vld [vmem:[#allocation9 + $0x258] sm:$0xff] }
 0x34b   : > { %10172 = vmatprep.subr.bf16.mxu0 %v15871_v19  ;;  %10249 = vmatprep.subr.bf16.mxu1 %v15834_v26  ;;  %v2908_v19 = vld [vmem:[#allocation9 + $0x278] sm:$0xff] }
 0x34e   : > { %10174 = vmatpush1.bf16.msra.mxu0 %v15872_v58  ;;  %10251 = vmatpush3.bf16.msra.mxu1 %v15873_v53  ;;  %v2911_v58 = vld [vmem:[#allocation9 + $0x290] sm:$0xff]  ;;  %v12836_v53 = vsub.f32 %v2889_v48, %v2961_v16  ;;  %v2916_v48 = vld [vmem:[#allocation9 + $0x2b8] sm:$0xff] }
 0x34f   : > { %10176 = vmatprep.subr.bf16.mxu0 %v15874_v46  ;;  %10252 = vmatprep.subr.bf16.mxu1 %v15834_v26  ;;  %v12838_v46 = vsub.f32 %v2892_v54, %v2965_v61  ;;  %v2987_v12 = vand.u32 4294901760, %v2911_v58 }
 0x352   : > { %10178 = vmatpush1.bf16.msra.mxu0 %v15875_v34  ;;  %10254 = vmatpush3.bf16.msra.mxu1 %v15876_v17 }
 0x353   : > { %10180 = vmatprep.subr.bf16.mxu0 %v15853_v20  ;;  %10255 = vmatprep.subr.bf16.mxu1 %v15834_v26  ;;  %v12812_v20 = vsub.f32 %v2884_v43, %v2951_v42  ;;  %v2981_v43 = vand.u32 4294901760, %v2904_v50  ;;  %v2917_v42 = vld [vmem:[#allocation9 + $0x2c0] sm:$0xff] }
 0x355   : > { %2225 = vmatmul.mubr.f32.vlgmr.msra.gmra.mrb[0].mxu0 %v12656_v13  ;;  %9112 = vmatmul.mubr.f32.vlgmr.msra.gmra.mrb[20].mxu1 %v12656_v13  ;;  %15882 = vst [vmem:[#allocation22_spill] sm:$0xff] %v12812_v20  ;;  %v12868_v16 = vsub.f32 %v2904_v50, %v2981_v43 }
 0x356   : > { %10182 = vmatpush1.bf16.msra.mxu0 %v15854_v5  ;;  %10257 = vmatpush3.bf16.msra.mxu1 %v15855_v51  ;;  %v12814_v5 = vpack.c.bf16 %v2957_v44, %v2953_v29  ;;  %v2895_v51 = vld [vmem:[#allocation9 + $0x210] sm:$0xff] }
 0x357   : > { %10184 = vmatprep.subr.bf16.mxu0 %v15856_v55  ;;  %10258 = vmatprep.subr.bf16.mxu1 %v15834_v26  ;;  %v2898_v55 = vld [vmem:[#allocation9 + $0x228] sm:$0xff]  ;;  %v2969_v37 = vand.u32 4294901760, %v2895_v51  ;;  %15897 = vst [vmem:[#allocation41_spill] sm:$0xff] %v12868_v16 }
 0x358   : > { %2311 = vmatprep.mubr.f32.mxu0 %v15835_v36  ;;  %9130 = vmatprep.mubr.msk.f32.mxu1 %vm11841_vm11, %v15835_v36  ;;  %15883 = vst [vmem:[#allocation23_spill] sm:$0xff] %v12814_v5  ;;  %v2973_v30 = vand.u32 4294901760, %v2898_v55 }
 0x35a   : > { %10186 = vmatpush1.bf16.msra.mxu0 %v15857_v11  ;;  %10260 = vmatpush3.bf16.msra.mxu1 %v15858_v15  ;;  %v12820_v11 = vpack.c.bf16 %v2963_v21, %v2959_v18  ;;  %v2967_v15 = vand.u32 4294901760, %v2896_v59  ;;  %v2991_v21 = vand.u32 4294901760, %v2914_v52 }
 0x35b   : > { %10188 = vmatprep.subr.bf16.mxu0 %v15859_v49  ;;  %10261 = vmatprep.subr.bf16.mxu1 %v15834_v26  ;;  %v2971_v49 = vand.u32 4294901760, %v2899_v60 }
 0x35c   : > { %15885 = vst [vmem:[#allocation25_spill] sm:$0xff] %v12820_v11  ;;  %v12844_v63 = vsub.f32 %v2896_v59, %v2967_v15  ;;  %v2995_v59 = vand.u32 4294901760, %v2917_v42 }
 0x35d   : > { %v12842_v27 = vpack.c.bf16 %v2971_v49, %v2967_v15  ;;  %v12846_v28 = vsub.f32 %v2899_v60, %v2971_v49  ;;  %v12866_v60 = vpack.c.bf16 %v2981_v43, %v2977_v40  ;;  %v2923_v15 = vld [vmem:[#allocation9 + $0x2f0] sm:$0xff]  ;;  %v12874_v49 = vsub.f32 %v2911_v58, %v2987_v12 }
 0x35e   : > { %10190 = vmatpush1.bf16.msra.mxu0 %v15860_v4  ;;  %10263 = vmatpush3.bf16.msra.mxu1 %v15861_v22  ;;  %v2902_v4 = vld [vmem:[#allocation9 + $0x248] sm:$0xff]  ;;  %v2905_v22 = vld [vmem:[#allocation9 + $0x260] sm:$0xff]  ;;  %v12888_v58 = vpack.c.bf16 %v2995_v59, %v2991_v21 }
 0x35f   : > { %10192 = vmatprep.subr.bf16.mxu0 %v15862_v38  ;;  %10264 = vmatprep.subr.bf16.mxu1 %v15834_v26  ;;  %v12822_v38 = vsub.f32 %v2883_v35, %v2953_v29  ;;  %v2975_v34 = vand.u32 4294901760, %v2902_v4  ;;  %v2979_v17 = vand.u32 4294901760, %v2905_v22  ;;  %15888 = vst [vmem:[#allocation28_spill] sm:$0xff] %v12842_v27  ;;  %15889 = vst [vmem:[#allocation29_spill] sm:$0xff] %v12846_v28  ;;  %v3077_v26 = vand.u32 4294901760, %v12812_v20 }
 0x360   : > { %v12850_v35 = vsub.f32 %v2895_v51, %v2969_v37  ;;  %15896 = vst [vmem:[#allocation40_spill] sm:$0xff] %v12866_v60  ;;  %15900 = vst [vmem:[#allocation44_spill] sm:$0xff] %v12874_v49 }
 0x361   : > { %v12856_v2 = vpack.c.bf16 %v2979_v17, %v2975_v34  ;;  %v12858_v29 = vsub.f32 %v2902_v4, %v2975_v34  ;;  %v12862_v54 = vsub.f32 %v2905_v22, %v2979_v17  ;;  %v12882_v34 = vsub.f32 %v2910_v41, %v2989_v10  ;;  %15902 = vst [vmem:[#allocation46_spill] sm:$0xff] %v12888_v58 }
 0x362   : > { %10194 = vmatpush1.bf16.msra.mxu0 %v15863_v47  ;;  %10266 = vmatpush3.bf16.msra.mxu1 %v15864_v56  ;;  %v12824_v47 = vsub.f32 %v2886_v0, %v2957_v44  ;;  %v12826_v56 = vsub.f32 %v2890_v45, %v2959_v18  ;;  %15891 = vst [vmem:[#allocation31_spill] sm:$0xff] %v12850_v35  ;;  %v2985_v0 = vand.u32 4294901760, %v2907_v23  ;;  %v2913_v44 = vld [vmem:[#allocation9 + $0x2a0] sm:$0xff]  ;;  %v3065_v17 = vand.u32 4294901760, %v12804_v1 }
 0x363   : > { %10268 = vmatprep.subr.bf16.mxu1 %v12785_v24  ;;  %10364 = vmatprep.subr.bf16.mxu0 %v12785_v24  ;;  %v12854_v45 = vsub.f32 %v2898_v55, %v2973_v30  ;;  %15892 = vst [vmem:[#allocation34_spill] sm:$0xff] %v12856_v2  ;;  %15893 = vst [vmem:[#allocation37_spill] sm:$0xff] %v12858_v29  ;;  %v12864_v18 = vsub.f32 %v2901_v9, %v2977_v40  ;;  %v2920_v55 = vld [vmem:[#allocation9 + $0x2d8] sm:$0xff]  ;;  %v2993_v22 = vand.u32 4294901760, %v2913_v44  ;;  %v2919_v9 = vld [vmem:[#allocation9 + $0x2d0] sm:$0xff] }
 0x364   : > { %15886 = vst [vmem:[#allocation26_spill] sm:$0xff] %v12824_v47  ;;  %15894 = vst [vmem:[#allocation38_spill] sm:$0xff] %v12862_v54  ;;  %v12876_v4 = vpack.c.bf16 %v2989_v10, %v2985_v0  ;;  %v12880_v50 = vsub.f32 %v2907_v23, %v2985_v0  ;;  %v12890_v40 = vsub.f32 %v2914_v52, %v2991_v21  ;;  %v2999_v43 = vand.u32 4294901760, %v2920_v55 }
 0x365   : > { %2313 = vmatmul.mubr.f32.vlgmr.msra.gmra.mrb[0].mxu0 %v12656_v13  ;;  %9131 = vmatmul.mubr.f32.vlgmr.msra.gmra.mrb[22].mxu1 %v12656_v13  ;;  %v12817_v13 = vsub.f32 %v2887_v33, %v2955_v8  ;;  %v2983_v33 = vand.u32 4294901760, %v2908_v19  ;;  %v12848_v8 = vpack.c.bf16 %v2973_v30, %v2969_v37  ;;  %15895 = vst [vmem:[#allocation39_spill] sm:$0xff] %v12864_v18  ;;  %v2997_v37 = vand.u32 4294901760, %v2916_v48  ;;  %v2922_v30 = vld [vmem:[#allocation9 + $0x2e8] sm:$0xff] }
 0x366   : > { %10270 = vmatpush1.bf16.msra.mxu1 %v12791_v6  ;;  %10366 = vmatpush1.bf16.msra.mxu0 %v12791_v6  ;;  %15901 = vst [vmem:[#allocation45_spill] sm:$0xff] %v12876_v4  ;;  %v3005_v32 = vand.u32 4294901760, %v2922_v30  ;;  %v3059_v23 = vand.u32 4294901760, %v12806_v3  ;;  %v3071_v41 = vand.u32 4294901760, %v12809_v31  ;;  %v12894_v0 = vsub.f32 %v2917_v42, %v2995_v59 }
 0x367   : > { %10272 = vmatprep.subr.bf16.mxu1 %v12795_v14  ;;  %15884 = vst [vmem:[#allocation24_spill] sm:$0xff] %v12817_v13  ;;  %10368 = vmatprep.subr.bf16.mxu0 %v12795_v14  ;;  %15890 = vst [vmem:[#allocation30_spill] sm:$0xff] %v12848_v8  ;;  %v12870_v61 = vpack.c.bf16 %v2987_v12, %v2983_v33  ;;  %v12872_v51 = vsub.f32 %v2908_v19, %v2983_v33  ;;  %v3053_v19 = vand.u32 4294901760, %v12800_v57 }
 0x368   : > { %3039 = vmatprep.mubr.f32.mxu1 %v15835_v36  ;;  %3516 = vmatprep.mubr.f32.mxu0 %v15835_v36  ;;  %v3003_v33 = vand.u32 4294901760, %v2923_v15  ;;  %v3001_v12 = vand.u32 4294901760, %v2919_v9  ;;  %v12896_v10 = vpack.c.bf16 %v2997_v37, %v2993_v22  ;;  %v12902_v52 = vsub.f32 %v2913_v44, %v2993_v22 }
 0x369   : > { %15898 = vst [vmem:[#allocation42_spill] sm:$0xff] %v12870_v61  ;;  %15899 = vst [vmem:[#allocation43_spill] sm:$0xff] %v12872_v51  ;;  %v3054_v21 = vsub.f32 %v12800_v57, %v3053_v19  ;;  %v12911_v42 = vsub.f32 %v2916_v48, %v2997_v37  ;;  %v3060_v22 = vsub.f32 %v12806_v3, %v3059_v23  ;;  %v3095_v48 = vand.u32 4294901760, %v12824_v47 }
 0x36a   : > { %10274 = vmatpush1.bf16.msra.mxu1 %v12814_v5  ;;  %10370 = vmatpush1.bf16.msra.mxu0 %v12814_v5  ;;  %15903 = vst [vmem:[#allocation47_spill] sm:$0xff] %v12896_v10  ;;  %v12913_v59 = vpack.c.bf16 %v3003_v33, %v2999_v43  ;;  %v12919_v44 = vpack.c.bf16 %v3005_v32, %v3001_v12  ;;  %v3101_v62 = vand.u32 4294901760, %v12826_v56 }
 0x36b   : > { %10276 = vmatprep.subr.bf16.mxu1 %v12820_v11  ;;  %10372 = vmatprep.subr.bf16.mxu0 %v12820_v11  ;;  %v3072_v11 = vsub.f32 %v12809_v31, %v3071_v41  ;;  %v3078_v5 = vsub.f32 %v12812_v20, %v3077_v26  ;;  %v10395_v6 = vpack.c.bf16 %v3065_v17, %v3053_v19  ;;  %v3061_v20 = vand.u32 4294901760, %v3060_v22 }
 0x36c   : > { %15905 = vst [vmem:[#allocation50_spill] sm:$0xff] %v12913_v59  ;;  %15906 = vst [vmem:[#allocation51_spill] sm:$0xff] %v12919_v44  ;;  %v3096_v24 = vsub.f32 %v12824_v47, %v3095_v48  ;;  %v10397_v19 = vpack.c.bf16 %v3071_v41, %v3059_v23  ;;  %v3137_v22 = vand.u32 4294901760, %v12846_v28  ;;  %v3131_v41 = vand.u32 4294901760, %v12850_v35 }
 0x36e   : > { %10278 = vmatpush1.bf16.msra.mxu1 %v12832_v25  ;;  %10374 = vmatpush1.bf16.msra.mxu0 %v12832_v25  ;;  %v12915_v25 = vsub.f32 %v2920_v55, %v2999_v43  ;;  %v12929_v55 = vsub.f32 %v2919_v9, %v3001_v12  ;;  %v3107_v9 = vand.u32 4294901760, %v12836_v53  ;;  %v3079_v12 = vand.u32 4294901760, %v3078_v5 }
 0x36f   : > { %10280 = vmatprep.subr.bf16.mxu1 %v12842_v27  ;;  %10376 = vmatprep.subr.bf16.mxu0 %v12842_v27  ;;  %v12907_v27 = vand.u32 4294901760, %v12798_v7  ;;  %v3102_v5 = vsub.f32 %v12826_v56, %v3101_v62 }
 0x371   : > { %15904 = vst [vmem:[#allocation48_spill] sm:$0xff] %v12907_v27  ;;  %v3043_v43 = vsub.f32 %v12798_v7, %v12907_v27 }
 0x372   : > { %10282 = vmatpush1.bf16.msra.mxu1 %v12848_v8  ;;  %10378 = vmatpush1.bf16.msra.mxu0 %v12848_v8  ;;  %v3066_v8 = vsub.f32 %v12804_v1, %v3065_v17 }
 0x373   : > { %10284 = vmatprep.subr.bf16.mxu1 %v12856_v2  ;;  %10380 = vmatprep.subr.bf16.mxu0 %v12856_v2  ;;  %v3089_v2 = vand.u32 4294901760, %v12817_v13 }
 0x374   : > { %v3067_v37 = vand.u32 4294901760, %v3066_v8  ;;  %v3119_v8 = vand.u32 4294901760, %v12838_v46 }
 0x375   : > { %v3090_v14 = vsub.f32 %v12817_v13, %v3089_v2  ;;  %v3113_v13 = vand.u32 4294901760, %v12830_v39  ;;  %v10399_v17 = vpack.c.bf16 %v3089_v2, %v3077_v26  ;;  %v3097_v2 = vand.u32 4294901760, %v3096_v24 }
 0x376   : > { %10286 = vmatpush1.bf16.msra.mxu1 %v12866_v60  ;;  %10382 = vmatpush1.bf16.msra.mxu0 %v12866_v60  ;;  %v12917_v60 = vsub.f32 %v2923_v15, %v3003_v33  ;;  %v3055_v15 = vand.u32 4294901760, %v3054_v21  ;;  %v12935_v33 = vsub.f32 %v2922_v30, %v3005_v32  ;;  %v12945_v30 = vand.u32 4294901760, %v3043_v43 }
 0x377   : > { %10288 = vmatprep.subr.bf16.mxu1 %v12870_v61  ;;  %10384 = vmatprep.subr.bf16.mxu0 %v12870_v61  ;;  %v3083_v61 = vand.u32 4294901760, %v12822_v38  ;;  %v3091_v21 = vand.u32 4294901760, %v3090_v14  ;;  %v3114_v14 = vsub.f32 %v12830_v39, %v3113_v13  ;;  %v10403_v43 = vpack.c.bf16 %v3113_v13, %v3101_v62 }
 0x378   : > { %v10299_v32 = vpack.c.bf16 %v3067_v37, %v3055_v15  ;;  %15907 = vst [vmem:[#allocation52_spill] sm:$0xff] %v12945_v30  ;;  %v3108_v15 = vsub.f32 %v12836_v53, %v3107_v9  ;;  %v3120_v37 = vsub.f32 %v12838_v46, %v3119_v8  ;;  %v3138_v24 = vsub.f32 %v12846_v28, %v3137_v22 }
 0x379   : > { %v3084_v7 = vsub.f32 %v12822_v38, %v3083_v61  ;;  %v10401_v47 = vpack.c.bf16 %v3095_v48, %v3083_v61  ;;  %v10303_v23 = vpack.c.bf16 %v3091_v21, %v3079_v12  ;;  %v3103_v61 = vand.u32 4294901760, %v3102_v5 }
 0x37a   : > { %10290 = vmatpush1.bf16.msra.mxu1 %v12876_v4  ;;  %10386 = vmatpush1.bf16.msra.mxu0 %v12876_v4  ;;  %v3073_v4 = vand.u32 4294901760, %v3072_v11  ;;  %v3125_v11 = vand.u32 4294901760, %v12844_v63  ;;  %v3109_v48 = vand.u32 4294901760, %v3108_v15  ;;  %v3121_v12 = vand.u32 4294901760, %v3120_v37 }
 0x37b   : > { %10292 = vmatprep.subr.bf16.mxu1 %v12888_v58  ;;  %10388 = vmatprep.subr.bf16.mxu0 %v12888_v58  ;;  %v3085_v26 = vand.u32 4294901760, %v3084_v7  ;;  %v3155_v21 = vand.u32 4294901760, %v12864_v18  ;;  %v3167_v62 = vand.u32 4294901760, %v12868_v16  ;;  %v3185_v5 = vand.u32 4294901760, %v12874_v49 }
 0x37c   : > { %v10301_v58 = vpack.c.bf16 %v3073_v4, %v3061_v20  ;;  %v3161_v20 = vand.u32 4294901760, %v12862_v54  ;;  %v3115_v4 = vand.u32 4294901760, %v3114_v14  ;;  %v3126_v7 = vsub.f32 %v12844_v63, %v3125_v11 }
 0x37d   : > { %v10305_v13 = vpack.c.bf16 %v3097_v2, %v3085_v26  ;;  %v3139_v26 = vand.u32 4294901760, %v3138_v24  ;;  %v10309_v2 = vpack.c.bf16 %v3121_v12, %v3109_v48  ;;  %v3168_v28 = vsub.f32 %v12868_v16, %v3167_v62 }
 0x37e   : > { %10294 = vmatpush1.bf16.msra.mxu1 %v12896_v10  ;;  %10390 = vmatpush1.bf16.msra.mxu0 %v12896_v10  ;;  %v3149_v10 = vand.u32 4294901760, %v12858_v29  ;;  %v3162_v37 = vsub.f32 %v12862_v54, %v3161_v20  ;;  %v10407_v24 = vpack.c.bf16 %v3137_v22, %v3125_v11  ;;  %v3197_v48 = vand.u32 4294901760, %v12890_v40 }
 0x37f   : > { %10296 = vmatprep.subr.bf16.mxu1 %v12913_v59  ;;  %10392 = vmatprep.subr.bf16.mxu0 %v12913_v59  ;;  %v3143_v59 = vand.u32 4294901760, %v12854_v45  ;;  %v3209_v12 = vand.u32 4294901760, %v12894_v0  ;;  %v3169_v16 = vand.u32 4294901760, %v3168_v28  ;;  %v3215_v11 = vand.u32 4294901760, %v12911_v42 }
 0x380   : > { %v3150_v15 = vsub.f32 %v12858_v29, %v3149_v10  ;;  %v10413_v22 = vpack.c.bf16 %v3167_v62, %v3155_v21 }
 0x381   : > { %v3144_v14 = vsub.f32 %v12854_v45, %v3143_v59  ;;  %v3210_v28 = vsub.f32 %v12894_v0, %v3209_v12 }
 0x382   : > { %10298 = vmatpush1.bf16.msra.mxu1 %v12919_v44  ;;  %10394 = vmatpush1.bf16.msra.mxu0 %v12919_v44  ;;  %v10405_v44 = vpack.c.bf16 %v3119_v8, %v3107_v9 }
 0x383   : > { %10300 = vmatprep.subr.bf16.mxu1 %v10299_v32  ;;  %10396 = vmatprep.subr.bf16.mxu0 %v10395_v6  ;;  %v3132_v32 = vsub.f32 %v12850_v35, %v3131_v41  ;;  %v3173_v6 = vand.u32 4294901760, %v12872_v51  ;;  %v3156_v35 = vsub.f32 %v12864_v18, %v3155_v21  ;;  %v3145_v8 = vand.u32 4294901760, %v3144_v14 }
 0x384   : > { %v10411_v18 = vpack.c.bf16 %v3161_v20, %v3149_v10  ;;  %v3221_v10 = vand.u32 4294901760, %v12915_v25 }
 0x385   : > { %3045 = vmatmul.mubr.f32.vlgmr.msra.gmra.mrb[24].mxu1 %v12945_v30  ;;  %3520 = vmatmul.mubr.f32.vlgmr.msra.gmra.mrb[2].mxu0 %v12907_v27  ;;  %v10307_v30 = vpack.c.bf16 %v3115_v4, %v3103_v61  ;;  %v3127_v27 = vand.u32 4294901760, %v3126_v7  ;;  %v3133_v9 = vand.u32 4294901760, %v3132_v32  ;;  %v3151_v61 = vand.u32 4294901760, %v3150_v15 }
 0x386   : > { %10302 = vmatpush1.bf16.msra.mxu1 %v10301_v58  ;;  %10398 = vmatpush1.bf16.msra.mxu0 %v10397_v19  ;;  %v3174_v58 = vsub.f32 %v12872_v51, %v3173_v6  ;;  %v3186_v19 = vsub.f32 %v12874_v49, %v3185_v5  ;;  %v3163_v4 = vand.u32 4294901760, %v3162_v37  ;;  %v10409_v51 = vpack.c.bf16 %v3143_v59, %v3131_v41 }
 0x387   : > { %10304 = vmatprep.subr.bf16.mxu1 %v10303_v23  ;;  %10400 = vmatprep.subr.bf16.mxu0 %v10399_v17  ;;  %v3179_v23 = vand.u32 4294901760, %v12880_v50  ;;  %v3191_v17 = vand.u32 4294901760, %v12882_v34  ;;  %v10311_v7 = vpack.c.bf16 %v3139_v26, %v3127_v27  ;;  %v3157_v49 = vand.u32 4294901760, %v3156_v35 }
 0x388   : > { %3275 = vmatprep.mubr.f32.mxu1 %v15835_v36  ;;  %3686 = vmatprep.mubr.f32.mxu0 %v15835_v36  ;;  %v3175_v54 = vand.u32 4294901760, %v3174_v58  ;;  %v3187_v29 = vand.u32 4294901760, %v3186_v19  ;;  %v3203_v27 = vand.u32 4294901760, %v12902_v52  ;;  %v3198_v35 = vsub.f32 %v12890_v40, %v3197_v48 }
 0x389   : > { %v3233_v59 = vand.u32 4294901760, %v12917_v60  ;;  %v10415_v41 = vpack.c.bf16 %v3185_v5, %v3173_v6  ;;  %v10317_v20 = vpack.c.bf16 %v3169_v16, %v3157_v49  ;;  %v3216_v37 = vsub.f32 %v12911_v42, %v3215_v11 }
 0x38a   : > { %10306 = vmatpush1.bf16.msra.mxu1 %v10305_v13  ;;  %10402 = vmatpush1.bf16.msra.mxu0 %v10401_v47  ;;  %v3180_v47 = vsub.f32 %v12880_v50, %v3179_v23  ;;  %v3192_v13 = vsub.f32 %v12882_v34, %v3191_v17  ;;  %v3204_v15 = vsub.f32 %v12902_v52, %v3203_v27  ;;  %v3227_v26 = vand.u32 4294901760, %v12929_v55 }
 0x38b   : > { %10308 = vmatprep.subr.bf16.mxu1 %v10307_v30  ;;  %10404 = vmatprep.subr.bf16.mxu0 %v10403_v43  ;;  %v10313_v30 = vpack.c.bf16 %v3145_v8, %v3133_v9  ;;  %v10315_v43 = vpack.c.bf16 %v3163_v4, %v3151_v61  ;;  %v3199_v58 = vand.u32 4294901760, %v3198_v35  ;;  %v3211_v19 = vand.u32 4294901760, %v3210_v28  ;;  %v15911_v35 = vld [vmem:[#allocation32_spill] sm:$0xff] }
 0x38c   : > { %v3181_v32 = vand.u32 4294901760, %v3180_v47  ;;  %v3193_v14 = vand.u32 4294901760, %v3192_v13  ;;  %v3222_v21 = vsub.f32 %v12915_v25, %v3221_v10  ;;  %v10417_v16 = vpack.c.bf16 %v3191_v17, %v3179_v23  ;;  %v15912_v28 = vld [vmem:[#allocation36_spill] sm:$0xff] }
 0x38d   : > { %v3217_v49 = vand.u32 4294901760, %v3216_v37  ;;  %v3228_v62 = vsub.f32 %v12929_v55, %v3227_v26  ;;  %v10323_v5 = vpack.c.bf16 %v3211_v19, %v3199_v58  ;;  %v10421_v4 = vpack.c.bf16 %v3215_v11, %v3203_v27  ;;  %v15910_v27 = vld [vmem:[#allocation24_spill] sm:$0xff]  ;;  %v15925_v37 = vld [vmem:[#allocation41_spill] sm:$0xff] }
 0x38e   : > { %10310 = vmatpush1.bf16.msra.mxu1 %v10309_v2  ;;  %10406 = vmatpush1.bf16.msra.mxu0 %v10405_v44  ;;  %v10319_v44 = vpack.c.bf16 %v3187_v29, %v3175_v54  ;;  %v3239_v2 = vand.u32 4294901760, %v12935_v33  ;;  %v3234_v29 = vsub.f32 %v12917_v60, %v3233_v59  ;;  %v10321_v54 = vpack.c.bf16 %v3193_v14, %v3181_v32  ;;  %v15921_v32 = vld [vmem:[#allocation37_spill] sm:$0xff]  ;;  %v15922_v14 = vld [vmem:[#allocation38_spill] sm:$0xff]  ;;  %v15928_v58 = vld [vmem:[#allocation44_spill] sm:$0xff] }
 0x38f   : > { %10312 = vmatprep.subr.bf16.mxu1 %v10311_v7  ;;  %10408 = vmatprep.subr.bf16.mxu0 %v10407_v24  ;;  %v3223_v9 = vand.u32 4294901760, %v3222_v21  ;;  %v3229_v7 = vand.u32 4294901760, %v3228_v62  ;;  %v10423_v24 = vpack.c.bf16 %v3233_v59, %v3221_v10  ;;  %v15914_v10 = vld [vmem:[#allocation35_spill] sm:$0xff]  ;;  %v10341_v59 = vpack.c.bf16 %v12838_v46, %v12836_v53  ;;  %v15923_v53 = vld [vmem:[#allocation30_spill] sm:$0xff] }
 0x390   : > { %v3240_v6 = vsub.f32 %v12935_v33, %v3239_v2  ;;  %v3235_v8 = vand.u32 4294901760, %v3234_v29  ;;  %v10425_v13 = vpack.c.bf16 %v3239_v2, %v3227_v26  ;;  %v15924_v46 = vld [vmem:[#allocation39_spill] sm:$0xff]  ;;  %v10353_v21 = vpack.c.bf16 %v12882_v34, %v12880_v50  ;;  %v15930_v29 = vld [vmem:[#allocation42_spill] sm:$0xff]  ;;  %v2882_v50 = vld [vmem:[#allocation9 + $0x1a8] sm:$0xff] }
 0x391   : > { %v10349_v26 = vpack.c.bf16 %v15925_v37, %v15924_v46  ;;  %v15927_v2 = vld [vmem:[#allocation43_spill] sm:$0xff]  ;;  %v10359_v62 = vpack.c.bf16 %v12917_v60, %v12915_v25 }
 0x392   : > { %10314 = vmatpush1.bf16.msra.mxu1 %v10313_v30  ;;  %10410 = vmatpush1.bf16.msra.mxu0 %v10409_v51  ;;  %v3205_v51 = vand.u32 4294901760, %v3204_v15  ;;  %v3241_v23 = vand.u32 4294901760, %v3240_v6  ;;  %v10327_v17 = vpack.c.bf16 %v3235_v8, %v3223_v9  ;;  %v15908_v30 = vld [vmem:[#allocation33_spill] sm:$0xff]  ;;  %v10347_v15 = vpack.c.bf16 %v15922_v14, %v15921_v32  ;;  %v2879_v6 = vld [vmem:[#allocation9 + $0x190] sm:$0xff]  ;;  %v15933_v34 = vld [vmem:[#allocation47_spill] sm:$0xff] }
 0x393   : > { %10316 = vmatprep.subr.bf16.mxu1 %v10315_v43  ;;  %10412 = vmatprep.subr.bf16.mxu0 %v10411_v18  ;;  %v10419_v18 = vpack.c.bf16 %v3209_v12, %v3197_v48  ;;  %v10331_v48 = vpack.c.bf16 %v12804_v1, %v12800_v57  ;;  %v10333_v12 = vpack.c.bf16 %v12809_v31, %v12806_v3  ;;  %v15909_v43 = vld [vmem:[#allocation22_spill] sm:$0xff]  ;;  %v15915_v31 = vld [vmem:[#allocation23_spill] sm:$0xff] }
 0x394   : > { %v10325_v61 = vpack.c.bf16 %v3217_v49, %v3205_v51  ;;  %v10329_v47 = vpack.c.bf16 %v3241_v23, %v3229_v7  ;;  %v10335_v11 = vpack.c.bf16 %v15910_v27, %v15909_v43  ;;  %v15913_v57 = vld [vmem:[#allocation26_spill] sm:$0xff]  ;;  %v10339_v3 = vpack.c.bf16 %v12830_v39, %v12826_v56  ;;  %v15919_v56 = vld [vmem:[#allocation31_spill] sm:$0xff]  ;;  %v2894_v7 = vld [vmem:[#allocation9 + $0x208] sm:$0xff] }
 0x395   : > { %v10337_v1 = vpack.c.bf16 %v15913_v57, %v12822_v38  ;;  %v15917_v38 = vld [vmem:[#allocation29_spill] sm:$0xff]  ;;  %v10345_v39 = vpack.c.bf16 %v12854_v45, %v15919_v56  ;;  %v10351_v19 = vpack.c.bf16 %v15928_v58, %v15927_v2  ;;  %v15929_v45 = vld [vmem:[#allocation40_spill] sm:$0xff]  ;;  %v10357_v51 = vpack.c.bf16 %v12911_v42, %v12902_v52  ;;  %v15932_v49 = vld [vmem:[#allocation46_spill] sm:$0xff] }
 0x396   : > { %10318 = vmatpush1.bf16.msra.mxu1 %v10317_v20  ;;  %10414 = vmatpush1.bf16.msra.mxu0 %v10413_v22  ;;  %v15916_v22 = vld [vmem:[#allocation25_spill] sm:$0xff]  ;;  %v15918_v20 = vld [vmem:[#allocation27_spill] sm:$0xff]  ;;  %v2885_v52 = vld [vmem:[#allocation9 + $0x1c0] sm:$0xff] }
 0x397   : > { %10320 = vmatprep.subr.bf16.mxu1 %v10319_v44  ;;  %10416 = vmatprep.subr.bf16.mxu0 %v10415_v41  ;;  %v10343_v41 = vpack.c.bf16 %v15917_v38, %v12844_v63  ;;  %v15920_v44 = vld [vmem:[#allocation28_spill] sm:$0xff]  ;;  %v15926_v63 = vld [vmem:[#allocation34_spill] sm:$0xff]  ;;  %v2888_v42 = vld [vmem:[#allocation9 + $0x1d8] sm:$0xff]  ;;  %v3805_v25 = vand.u32 4294901760, %v2885_v52 }
 0x398   : > { %v15935_v9 = vld [vmem:[#allocation51_spill] sm:$0xff]  ;;  %v3808_v60 = vand.u32 4294901760, %v2888_v42  ;;  %v15937_v23 = vld [vmem:[#allocation21_spill] sm:$0xff]  ;;  %v2909_v57 = vld [vmem:[#allocation9 + $0x280] sm:$0xff] }
 0x399   : > { %v2906_v43 = vld [vmem:[#allocation9 + $0x268] sm:$0xff]  ;;  %v2915_v38 = vld [vmem:[#allocation9 + $0x2b0] sm:$0xff]  ;;  %v13092_v46 = vld [vmem:[#allocation9 + $0x2f8] sm:$0xff] }
 0x39a   : > { %10322 = vmatpush1.bf16.msra.mxu1 %v10321_v54  ;;  %10418 = vmatpush1.bf16.msra.mxu0 %v10417_v16  ;;  %v10355_v54 = vpack.c.bf16 %v12894_v0, %v12890_v40  ;;  %v15931_v16 = vld [vmem:[#allocation45_spill] sm:$0xff]  ;;  %v10361_v40 = vpack.c.bf16 %v12935_v33, %v12929_v55  ;;  %v3799_v0 = vand.u32 4294901760, %v2879_v6  ;;  %v13057_v55 = vpack.c.bf16 %v3808_v60, %v3805_v25 }
 0x39b   : > { %10324 = vmatprep.subr.bf16.mxu1 %v10323_v5  ;;  %10420 = vmatprep.subr.bf16.mxu0 %v10419_v18  ;;  %v3802_v5 = vand.u32 4294901760, %v2882_v50  ;;  %v15934_v18 = vld [vmem:[#allocation50_spill] sm:$0xff]  ;;  %v13083_v56 = vsub.f32 %v2888_v42, %v3808_v60  ;;  %v3835_v14 = vand.u32 4294901760, %v2915_v38 }
 0x39d   : > { %v13051_v8 = vpack.c.bf16 %v3802_v5, %v3799_v0  ;;  %v3913_v58 = vand.u32 4294901760, %v13083_v56 }
 0x39e   : > { %10326 = vmatpush1.bf16.msra.mxu1 %v10325_v61  ;;  %10422 = vmatpush1.bf16.msra.mxu0 %v10421_v4  ;;  %v15936_v61 = vmov 0.0|0.0   ;;  %v2891_v4 = vld [vmem:[#allocation9 + $0x1f0] sm:$0xff] }
 0x39f   : > { %10328 = vmatprep.subr.bf16.mxu1 %v10327_v17  ;;  %10424 = vmatprep.subr.bf16.mxu0 %v10423_v24  ;;  %v3811_v33 = vand.u32 4294901760, %v2891_v4  ;;  %v3814_v17 = vand.u32 4294901760, %v2894_v7  ;;  %v2897_v24 = vld [vmem:[#allocation9 + $0x220] sm:$0xff] }
 0x3a1   : > { %v13094_v37 = vsub.f32 %v2891_v4, %v3811_v33 }
 0x3a2   : > { %10330 = vmatpush1.bf16.msra.mxu1 %v10329_v47  ;;  %10426 = vmatpush1.bf16.msra.mxu0 %v10425_v13  ;;  %v2900_v47 = vld [vmem:[#allocation9 + $0x238] sm:$0xff]  ;;  %v13064_v13 = vpack.c.bf16 %v3814_v17, %v3811_v33 }
 0x3a3   : > { %10332 = vmatprep.subr.bf16.mxu1 %v10331_v48  ;;  %10428 = vmatprep.subr.bf16.mxu0 %v15908_v30  ;;  %v3817_v48 = vand.u32 4294901760, %v2897_v24  ;;  %v2903_v30 = vld [vmem:[#allocation9 + $0x250] sm:$0xff] }
 0x3a5   : > { %3277 = vmatmul.mubr.f32.vlgmr.msra.gmra.mrb[24].mxu1 %v15911_v35  ;;  %3688 = vmatmul.mubr.f32.vlgmr.msra.gmra.mrb[2].mxu0 %v15911_v35 }
 0x3a6   : > { %10334 = vmatpush1.bf16.msra.mxu1 %v10333_v12  ;;  %10430 = vmatpush1.bf16.msra.mxu0 %v15912_v28  ;;  %v3820_v12 = vand.u32 4294901760, %v2900_v47  ;;  %v3826_v28 = vand.u32 4294901760, %v2906_v43 }
 0x3a7   : > { %10336 = vmatprep.subr.bf16.mxu1 %v10335_v11  ;;  %10432 = vmatprep.subr.bf16.mxu0 %v15914_v10  ;;  %v3823_v11 = vand.u32 4294901760, %v2903_v30  ;;  %v13071_v10 = vsub.f32 %v2879_v6, %v3799_v0 }
 0x3a8   : > { %3411 = vmatprep.mubr.f32.mxu1 %v15835_v36  ;;  %3790 = vmatprep.mubr.f32.mxu0 %v15835_v36  ;;  %v13068_v27 = vpack.c.bf16 %v3820_v12, %v3817_v48  ;;  %v13119_v6 = vsub.f32 %v2900_v47, %v3820_v12 }
 0x3a9   : > { %v13127_v0 = vsub.f32 %v2903_v30, %v3823_v11 }
 0x3aa   : > { %10338 = vmatpush1.bf16.msra.mxu1 %v10337_v1  ;;  %10434 = vmatpush1.bf16.msra.mxu0 %v15915_v31  ;;  %v2912_v1 = vld [vmem:[#allocation9 + $0x298] sm:$0xff]  ;;  %v13076_v31 = vpack.c.bf16 %v3826_v28, %v3823_v11  ;;  %v3941_v4 = vand.u32 4294901760, %v13119_v6 }
 0x3ab   : > { %10340 = vmatprep.subr.bf16.mxu1 %v10339_v3  ;;  %10436 = vmatprep.subr.bf16.mxu0 %v15916_v22  ;;  %v13073_v3 = vsub.f32 %v2882_v50, %v3802_v5  ;;  %v3832_v22 = vand.u32 4294901760, %v2912_v1  ;;  %v13129_v5 = vsub.f32 %v2906_v43, %v3826_v28  ;;  %v13157_v28 = vsub.f32 %v2915_v38, %v3835_v14 }
 0x3ac   : > { %v3942_v11 = vsub.f32 %v13119_v6, %v3941_v4 }
 0x3ae   : > { %10342 = vmatpush1.bf16.msra.mxu1 %v10341_v59  ;;  %10438 = vmatpush1.bf16.msra.mxu0 %v15918_v20  ;;  %v3829_v59 = vand.u32 4294901760, %v2909_v57  ;;  %v13081_v20 = vsub.f32 %v2885_v52, %v3805_v25 }
 0x3af   : > { %10344 = vmatprep.subr.bf16.mxu1 %v10343_v41  ;;  %10440 = vmatprep.subr.bf16.mxu0 %v15920_v44  ;;  %v13079_v41 = vld [vmem:[#allocation9 + $0x2c8] sm:$0xff]  ;;  %v3899_v44 = vand.u32 4294901760, %v13073_v3 }
 0x3b0   : > { %v13088_v32 = vpack.c.bf16 %v3832_v22, %v3829_v59  ;;  %v3906_v2 = vand.u32 4294901760, %v13081_v20  ;;  %v13142_v33 = vsub.f32 %v2909_v57, %v3829_v59  ;;  %v15939_v59 = vld [vmem:[#allocation49_spill] sm:$0xff] }
 0x3b2   : > { %10346 = vmatpush1.bf16.msra.mxu1 %v10345_v39  ;;  %10442 = vmatpush1.bf16.msra.mxu0 %v15923_v53  ;;  %v3892_v39 = vand.u32 4294901760, %v13071_v10  ;;  %v2921_v53 = vld [vmem:[#allocation9 + $0x2e0] sm:$0xff] }
 0x3b3   : > { %10348 = vmatprep.subr.bf16.mxu1 %v10347_v15  ;;  %10444 = vmatprep.subr.bf16.mxu0 %v15926_v63  ;;  %v3838_v15 = vand.u32 4294901760, %v13079_v41  ;;  %v3900_v63 = vsub.f32 %v13073_v3, %v3899_v44 }
 0x3b6   : > { %10350 = vmatpush1.bf16.msra.mxu1 %v10349_v26  ;;  %10446 = vmatpush1.bf16.msra.mxu0 %v15929_v45  ;;  %v3893_v26 = vsub.f32 %v13071_v10, %v3892_v39  ;;  %v13107_v45 = vpack.c.bf16 %v3838_v15, %v3835_v14 }
 0x3b7   : > { %10352 = vmatprep.subr.bf16.mxu1 %v10351_v19  ;;  %10448 = vmatprep.subr.bf16.mxu0 %v15930_v29  ;;  %v13104_v19 = vsub.f32 %v2894_v7, %v3814_v17  ;;  %v3844_v29 = vand.u32 4294901760, %v13092_v46  ;;  %v3948_v7 = vand.u32 4294901760, %v13127_v0  ;;  %v13144_v17 = vsub.f32 %v2912_v1, %v3832_v22 }
 0x3b9   : > { %v3949_v1 = vsub.f32 %v13127_v0, %v3948_v7 }
 0x3ba   : > { %10354 = vmatpush1.bf16.msra.mxu1 %v10353_v21  ;;  %10450 = vmatpush1.bf16.msra.mxu0 %v15931_v16  ;;  %v3841_v21 = vand.u32 4294901760, %v2921_v53  ;;  %v3894_v16 = vand.u32 4294901760, %v3893_v26 }
 0x3bb   : > { %10356 = vmatprep.subr.bf16.mxu1 %v10355_v54  ;;  %10452 = vmatprep.subr.bf16.mxu0 %v15932_v49  ;;  %v13111_v54 = vsub.f32 %v2897_v24, %v3817_v48  ;;  %v3907_v49 = vsub.f32 %v13081_v20, %v3906_v2  ;;  %v15938_v24 = vld [vmem:[#allocation52_spill] sm:$0xff]  ;;  %v3955_v48 = vand.u32 4294901760, %v13129_v5 }
 0x3bc   : > { %v13122_v50 = vpack.c.bf16 %v3844_v29, %v3841_v21 }
 0x3bd   : > { %v3908_v52 = vand.u32 4294901760, %v3907_v49  ;;  %v3934_v60 = vand.u32 4294901760, %v13111_v54  ;;  %v13169_v49 = vsub.f32 %v13079_v41, %v3838_v15  ;;  %v13181_v41 = vsub.f32 %v13092_v46, %v3844_v29 }
 0x3be   : > { %10358 = vmatpush1.bf16.msra.mxu1 %v10357_v51  ;;  %10454 = vmatpush1.bf16.msra.mxu0 %v15933_v34  ;;  %v3901_v51 = vand.u32 4294901760, %v3900_v63  ;;  %v3920_v34 = vand.u32 4294901760, %v13094_v37  ;;  %v3956_v63 = vsub.f32 %v13129_v5, %v3955_v48 }
 0x3bf   : > { %10360 = vmatprep.subr.bf16.mxu1 %v10359_v62  ;;  %10456 = vmatprep.subr.bf16.mxu0 %v15934_v18  ;;  %v3914_v62 = vsub.f32 %v13083_v56, %v3913_v58  ;;  %v3935_v43 = vsub.f32 %v13111_v54, %v3934_v60 }
 0x3c0   : > { %v10484_v18 = vpack.c.bf16 %v3901_v51, %v3894_v16  ;;  %v3962_v16 = vand.u32 4294901760, %v13142_v33  ;;  %v3969_v51 = vand.u32 4294901760, %v13144_v17 }
 0x3c1   : > { %v3915_v42 = vand.u32 4294901760, %v3914_v62  ;;  %v3936_v14 = vand.u32 4294901760, %v3935_v43  ;;  %v3943_v62 = vand.u32 4294901760, %v3942_v11  ;;  %v3997_v43 = vand.u32 4294901760, %v13181_v41 }
 0x3c2   : > { %10362 = vmatpush1.bf16.msra.mxu1 %v10361_v40  ;;  %10458 = vmatpush1.bf16.msra.mxu0 %v15935_v9  ;;  %v3927_v40 = vand.u32 4294901760, %v13104_v19  ;;  %v3921_v9 = vsub.f32 %v13094_v37, %v3920_v34 }
 0x3c3   : > { %10459 = vmatprep.subr.bf16.mxu1 %v15936_v61  ;;  %v10487_v47 = vpack.c.bf16 %v3915_v42, %v3908_v52  ;;  %v3950_v52 = vand.u32 4294901760, %v3949_v1  ;;  %v3957_v42 = vand.u32 4294901760, %v3956_v63  ;;  %v10493_v15 = vpack.c.bf16 %v3943_v62, %v3936_v14 }
 0x3c4   : > { %v3928_v25 = vsub.f32 %v13104_v19, %v3927_v40  ;;  %v3922_v12 = vand.u32 4294901760, %v3921_v9  ;;  %v3963_v9 = vsub.f32 %v13142_v33, %v3962_v16 }
 0x3c5   : > { %3414 = vmatmul.mubr.f32.vlgmr.msra.gmra.mrb[24].mxu1 %v15937_v23  ;;  %3792 = vmatmul.mubr.f32.vlgmr.msra.gmra.mrb[2].mxu0 %v15911_v35 }
 0x3c6   : > { %10461 = vmatpush3.bf16.msra.mxu1 %v13051_v8  ;;  %9165 = vmatprep.mubr.msk.f32.mxu1 %vm11841_vm11, %v15835_v36  ;;  %v3929_v30 = vand.u32 4294901760, %v3928_v25  ;;  %v3970_v25 = vsub.f32 %v13144_v17, %v3969_v51 }
 0x3c7   : > { %10462 = vmatprep.subr.bf16.mxu1 %v15936_v61  ;;  %4626 = vmatprep.mubr.f32.mxu0 %v15835_v36 }
 0x3c8   : > { %v10490_v38 = vpack.c.bf16 %v3929_v30, %v3922_v12  ;;  %v3971_v12 = vand.u32 4294901760, %v3970_v25  ;;  %v10508_v25 = vpack.c.bf16 %v13073_v3, %v13071_v10  ;;  %v10562_v10 = vpack.c.bf16 %v3927_v40, %v3920_v34 }
 0x3c9   : > { %v10565_v3 = vpack.c.bf16 %v3941_v4, %v3934_v60  ;;  %v13347_v4 = vld [vmem:[#allocation9 + $0x318] sm:$0xff] }
 0x3ca   : > { %10464 = vmatpush3.bf16.msra.mxu1 %v13057_v55 }
 0x3cb   : > { %10465 = vmatprep.subr.bf16.mxu1 %v15936_v61 }
 0x3ce   : > { %10467 = vmatpush3.bf16.msra.mxu1 %v13064_v13 }
 0x3cf   : > { %10468 = vmatprep.subr.bf16.mxu1 %v15936_v61 }
 0x3d2   : > { %10470 = vmatpush3.bf16.msra.mxu1 %v13068_v27 }
 0x3d3   : > { %10471 = vmatprep.subr.bf16.mxu1 %v15936_v61 }
 0x3d6   : > { %10473 = vmatpush3.bf16.msra.mxu1 %v13076_v31 }
 0x3d7   : > { %10474 = vmatprep.subr.bf16.mxu1 %v15936_v61 }
 0x3da   : > { %10476 = vmatpush3.bf16.msra.mxu1 %v13088_v32 }
 0x3db   : > { %10477 = vmatprep.subr.bf16.mxu1 %v15936_v61 }
 0x3de   : > { %10479 = vmatpush3.bf16.msra.mxu1 %v13107_v45 }
 0x3df   : > { %10480 = vmatprep.subr.bf16.mxu1 %v15936_v61 }
 0x3e2   : > { %10482 = vmatpush3.bf16.msra.mxu1 %v13122_v50 }
 0x3e3   : > { %10483 = vmatprep.subr.bf16.mxu1 %v15936_v61 }
 0x3e5   : > { %9166 = vmatmul.mubr.f32.vlgmr.msra.gmra.mrb[26].mxu1 %v15938_v24  ;;  %v3976_v24 = vand.u32 4294901760, %v13157_v28 }
 0x3e6   : > { %10485 = vmatpush3.bf16.msra.mxu1 %v10484_v18  ;;  %9200 = vmatprep.mubr.msk.f32.mxu1 %vm11841_vm11, %v15835_v36  ;;  %v13172_v18 = vsub.f32 %v2921_v53, %v3841_v21  ;;  %v3983_v53 = vand.u32 4294901760, %v13169_v49  ;;  %v10496_v21 = vpack.c.bf16 %v3957_v42, %v3950_v52 }
 0x3e7   : > { %10486 = vmatprep.subr.bf16.mxu1 %v15936_v61  ;;  %v3977_v30 = vsub.f32 %v13157_v28, %v3976_v24 }
 0x3e8   : > { %v2398_v57 = vpop.f32.mrb[12].mxu1  ;;  %v3984_v46 = vsub.f32 %v13169_v49, %v3983_v53  ;;  %v3990_v29 = vand.u32 4294901760, %v13172_v18 }
 0x3e9   : > { %v2399_v22 = vadd.f32 %v2398_v57, %v15939_v59  ;;  %v9037_v26 = vpop.f32.mrb[13].mxu1  ;;  %v3978_v57 = vand.u32 4294901760, %v3977_v30  ;;  %v10517_v30 = vpack.c.bf16 %v13119_v6, %v13111_v54 }
 0x3ea   : > { %10488 = vmatpush3.bf16.msra.mxu1 %v10487_v47  ;;  %v3964_v47 = vand.u32 4294901760, %v3963_v9  ;;  %v3985_v1 = vand.u32 4294901760, %v3984_v46  ;;  %v3991_v59 = vsub.f32 %v13172_v18, %v3990_v29  ;;  %v3998_v26 = vsub.f32 %v13181_v41, %v3997_v43 }
 0x3eb   : > { %10489 = vmatprep.subr.bf16.mxu1 %v15936_v61  ;;  %v10520_v46 = vpack.c.bf16 %v13129_v5, %v13127_v0 }
 0x3ec   : > { %v10499_v11 = vpack.c.bf16 %v3971_v12, %v3964_v47  ;;  %v10502_v62 = vpack.c.bf16 %v3985_v1, %v3978_v57  ;;  %v3992_v52 = vand.u32 4294901760, %v3991_v59  ;;  %v3999_v42 = vand.u32 4294901760, %v3998_v26 }
 0x3ed   : > { %v10514_v12 = vpack.c.bf16 %v13104_v19, %v13094_v37  ;;  %v10526_v26 = vpack.c.bf16 %v13169_v49, %v13157_v28  ;;  %v13355_v28 = vld [vmem:[#allocation9 + $0x340] sm:$0xff] }
 0x3ee   : > { %10491 = vmatpush3.bf16.msra.mxu1 %v10490_v38  ;;  %v10505_v9 = vpack.c.bf16 %v3999_v42, %v3992_v52  ;;  %v4465_v42 = vld [vmem:[#allocation9 + $0x320] sm:$0xff] }
 0x3ef   : > { %10492 = vmatprep.subr.bf16.mxu1 %v15936_v61 }
 0x3f2   : > { %10494 = vmatpush3.bf16.msra.mxu1 %v10493_v15 }
 0x3f3   : > { %10495 = vmatprep.subr.bf16.mxu1 %v15936_v61 }
 0x3f6   : > { %10497 = vmatpush3.bf16.msra.mxu1 %v10496_v21 }
 0x3f7   : > { %10498 = vmatprep.subr.bf16.mxu1 %v15936_v61 }
 0x3f8   : > { %v2509_v63 = vpop.f32.mrb[14].mxu1 }
 0x3f9   : > { %v2510_v38 = vadd.f32 %v2509_v63, %v2399_v22  ;;  %v9056_v14 = vpop.f32.mrb[15].mxu1  ;;  %v10511_v22 = vpack.c.bf16 %v13083_v56, %v13081_v20  ;;  %v10529_v63 = vpack.c.bf16 %v13181_v41, %v13172_v18  ;;  %v10568_v20 = vpack.c.bf16 %v3955_v48, %v3948_v7  ;;  %v13349_v7 = vld [vmem:[#allocation9 + $0x330] sm:$0xff]  ;;  %v13367_v41 = vld [vmem:[#allocation9 + $0x368] sm:$0xff] }
 0x3fa   : > { %10500 = vmatpush3.bf16.msra.mxu1 %v10499_v11  ;;  %v10523_v11 = vpack.c.bf16 %v13144_v17, %v13142_v33  ;;  %v10571_v56 = vpack.c.bf16 %v3969_v51, %v3962_v16  ;;  %v13351_v33 = vld [vmem:[#allocation9 + $0x328] sm:$0xff]  ;;  %v15500_v17 = vand.u32 4294901760, %v13347_v4  ;;  %v15499_v48 = vand.u32 4294901760, %v13349_v7  ;;  %v13365_v18 = vld [vmem:[#allocation9 + $0x350] sm:$0xff] }
 0x3fb   : > { %10501 = vmatprep.subr.bf16.mxu1 %v15936_v61  ;;  %v15498_v16 = vand.u32 4294901760, %v13351_v33  ;;  %v15495_v51 = vand.u32 4294901760, %v13355_v28 }
 0x3fc   : > { %v13363_v49 = vpack.c.bf16 %v15499_v48, %v15500_v17  ;;  %v4494_v48 = vld [vmem:[#allocation9 + $0x408] sm:$0xff]  ;;  %v4497_v17 = vld [vmem:[#allocation9 + $0x420] sm:$0xff] }
 0x3fe   : > { %10503 = vmatpush3.bf16.msra.mxu1 %v10502_v62  ;;  %15951 = vst [vmem:[#allocation25_spill] sm:$0xff] %v13363_v49 }
 0x3ff   : > { %10504 = vmatprep.subr.bf16.mxu1 %v15936_v61 }
 0x402   : > { %10506 = vmatpush3.bf16.msra.mxu1 %v10505_v9  ;;  %v4468_v9 = vld [vmem:[#allocation9 + $0x338] sm:$0xff] }
 0x403   : > { %10507 = vmatprep.subr.bf16.mxu1 %v15936_v61 }
 0x405   : > { %9201 = vmatmul.mubr.f32.vlgmr.msra.gmra.mrb[26].mxu1 %v15911_v35 }
 0x406   : > { %10509 = vmatpush3.bf16.msra.mxu1 %v10508_v25  ;;  %9235 = vmatprep.mubr.msk.f32.mxu1 %vm11841_vm11, %v15835_v36 }
 0x407   : > { %10510 = vmatprep.subr.bf16.mxu1 %v15936_v61 }
 0x408   : > { %v2597_v15 = vpop.f32.mrb[16].mxu1 }
 0x409   : > { %v2598_v21 = vadd.f32 %v2597_v15, %v2510_v38  ;;  %v9075_v47 = vpop.f32.mrb[17].mxu1 }
 0x40a   : > { %10512 = vmatpush3.bf16.msra.mxu1 %v10511_v22  ;;  %v4534_v47 = vand.u32 4294901760, %v4468_v9 }
 0x40b   : > { %10513 = vmatprep.subr.bf16.mxu1 %v15936_v61 }
 0x40e   : > { %10515 = vmatpush3.bf16.msra.mxu1 %v10514_v12 }
 0x40f   : > { %10516 = vmatprep.subr.bf16.mxu1 %v15936_v61 }
 0x412   : > { %10518 = vmatpush3.bf16.msra.mxu1 %v10517_v30 }
 0x413   : > { %10519 = vmatprep.subr.bf16.mxu1 %v15936_v61 }
 0x416   : > { %10521 = vmatpush3.bf16.msra.mxu1 %v10520_v46  ;;  %v13257_v46 = vsub.f32 %v4468_v9, %v4534_v47  ;;  %v13404_v9 = vld [vmem:[#allocation9 + $0x380] sm:$0xff] }
 0x417   : > { %10522 = vmatprep.subr.bf16.mxu1 %v15936_v61 }
 0x418   : > { %v2678_v57 = vpop.f32.mrb[18].mxu1  ;;  %15943 = vst [vmem:[#allocation32_spill] sm:$0xff] %v13257_v46 }
 0x419   : > { %v2679_v1 = vadd.f32 %v2678_v57, %v2598_v21  ;;  %v9094_v59 = vpop.f32.mrb[19].mxu1  ;;  %v4530_v21 = vand.u32 4294901760, %v4465_v42  ;;  %v15944_v57 = vld [vmem:[#allocation48_spill] sm:$0xff] }
 0x41a   : > { %10524 = vmatpush3.bf16.msra.mxu1 %v10523_v11  ;;  %v10556_v11 = vpack.c.bf16 %v3899_v44, %v3892_v39  ;;  %v10574_v39 = vpack.c.bf16 %v3983_v53, %v3976_v24  ;;  %v10577_v44 = vpack.c.bf16 %v3997_v43, %v3990_v29  ;;  %v13373_v24 = vpack.c.bf16 %v15495_v51, %v15498_v16  ;;  %v13377_v43 = vld [vmem:[#allocation9 + $0x348] sm:$0xff]  ;;  %v13379_v59 = vld [vmem:[#allocation9 + $0x360] sm:$0xff] }
 0x41b   : > { %10525 = vmatprep.subr.bf16.mxu1 %v15936_v61  ;;  %v13253_v12 = vpack.c.bf16 %v4534_v47, %v4530_v21  ;;  %v13255_v30 = vsub.f32 %v4465_v42, %v4530_v21  ;;  %v15494_v53 = vand.u32 4294901760, %v13365_v18  ;;  %v15493_v29 = vand.u32 4294901760, %v13367_v41  ;;  %v13526_v51 = vld [vmem:[#allocation9 + $0x428] sm:$0xff] }
 0x41c   : > { %15952 = vst [vmem:[#allocation29_spill] sm:$0xff] %v13373_v24  ;;  %v15484_v21 = vand.u32 4294901760, %v13404_v9  ;;  %v4574_v16 = vand.u32 4294901760, %v13526_v51 }
 0x41d   : > { %15941 = vst [vmem:[#allocation22_spill] sm:$0xff] %v13253_v12  ;;  %15942 = vst [vmem:[#allocation24_spill] sm:$0xff] %v13255_v30  ;;  %10604 = vmatprep.subr.bf16.mxu0 %v13253_v12 }
 0x41e   : > { %10527 = vmatpush3.bf16.msra.mxu1 %v10526_v26  ;;  %v13381_v26 = vld [vmem:[#allocation9 + $0x358] sm:$0xff]  ;;  %10606 = vmatpush1.bf16.msra.mxu0 %v13363_v49 }
 0x41f   : > { %10528 = vmatprep.subr.bf16.mxu1 %v15936_v61 }
 0x422   : > { %10530 = vmatpush3.bf16.msra.mxu1 %v10529_v63  ;;  %v15492_v63 = vand.u32 4294901760, %v13377_v43 }
 0x423   : > { %10531 = vmatprep.subr.bf16.mxu1 %v15936_v61 }
 0x425   : > { %9236 = vmatmul.mubr.f32.vlgmr.msra.gmra.mrb[26].mxu1 %v15937_v23 }
 0x426   : > { %10533 = vmatpush3.bf16.msra.mxu1 %v13051_v8  ;;  %9270 = vmatprep.mubr.msk.f32.mxu1 %vm11841_vm11, %v15835_v36 }
 0x427   : > { %10534 = vmatprep.subr.bf16.mxu1 %v15936_v61 }
 0x428   : > { %v2773_v38 = vpop.f32.mrb[20].mxu1 }
 0x429   : > { %v2774_v14 = vadd.f32 %v2773_v38, %v2679_v1  ;;  %v9113_v62 = vpop.f32.mrb[21].mxu1  ;;  %v10559_v1 = vpack.c.bf16 %v3913_v58, %v3906_v2  ;;  %v15489_v38 = vand.u32 4294901760, %v13379_v59 }
 0x42a   : > { %10536 = vmatpush3.bf16.msra.mxu1 %v13057_v55  ;;  %v15488_v62 = vand.u32 4294901760, %v13381_v26 }
 0x42b   : > { %10537 = vmatprep.subr.bf16.mxu1 %v15936_v61  ;;  %v13402_v42 = vpack.c.bf16 %v15489_v38, %v15492_v63  ;;  %v13506_v38 = vld [vmem:[#allocation9 + $0x400] sm:$0xff] }
 0x42c   : > { %v15509_v63 = vand.u32 4294901760, %v13506_v38 }
 0x42d   : > { %15954 = vst [vmem:[#allocation31_spill] sm:$0xff] %v13402_v42 }
 0x42e   : > { %10539 = vmatpush3.bf16.msra.mxu1 %v13064_v13 }
 0x42f   : > { %10540 = vmatprep.subr.bf16.mxu1 %v15936_v61 }
 0x432   : > { %10542 = vmatpush3.bf16.msra.mxu1 %v13068_v27 }
 0x433   : > { %10543 = vmatprep.subr.bf16.mxu1 %v15936_v61 }
 0x436   : > { %10545 = vmatpush3.bf16.msra.mxu1 %v13076_v31 }
 0x437   : > { %10546 = vmatprep.subr.bf16.mxu1 %v15936_v61 }
 0x438   : > { %v13245_v23 = vpop.f32.mrb[0].mxu0  ;;  %v2852_v52 = vpop.f32.mrb[22].mxu1 }
 0x439   : > { %v13247_v25 = vadd.f32 %v2852_v52, %v2774_v14  ;;  %v13249_v22 = vpop.f32.mrb[1].mxu0  ;;  %v9132_v15 = vpop.f32.mrb[23].mxu1  ;;  %v13386_v14 = vld [vmem:[#allocation9 + $0x370] sm:$0xff] }
 0x43a   : > { %10548 = vmatpush3.bf16.msra.mxu1 %v13088_v32  ;;  %v15487_v52 = vand.u32 4294901760, %v13386_v14 }
 0x43b   : > { %15940 = vst [vmem:[#allocation33_spill] sm:$0xff] %v13247_v25  ;;  %10549 = vmatprep.subr.bf16.mxu1 %v15936_v61 }
 0x43c   : > { %v13413_v15 = vpack.c.bf16 %v15487_v52, %v15488_v62 }
 0x43e   : > { %10551 = vmatpush3.bf16.msra.mxu1 %v13107_v45  ;;  %15955 = vst [vmem:[#allocation28_spill] sm:$0xff] %v13413_v15 }
 0x43f   : > { %10552 = vmatprep.subr.bf16.mxu1 %v15936_v61 }
 0x442   : > { %10554 = vmatpush3.bf16.msra.mxu1 %v13122_v50 }
 0x443   : > { %10555 = vmatprep.subr.bf16.mxu1 %v15936_v61 }
 0x445   : > { %9271 = vmatmul.mubr.f32.vlgmr.msra.gmra.mrb[26].mxu1 %v15944_v57  ;;  %v13419_v57 = vld [vmem:[#allocation9 + $0x390] sm:$0xff] }
 0x446   : > { %10557 = vmatpush3.bf16.msra.mxu1 %v10556_v11  ;;  %9305 = vmatprep.mubr.msk.f32.mxu1 %vm11841_vm11, %v15835_v36  ;;  %v13417_v11 = vld [vmem:[#allocation9 + $0x378] sm:$0xff] }
 0x447   : > { %10558 = vmatprep.subr.bf16.mxu1 %v15936_v61 }
 0x44a   : > { %10560 = vmatpush3.bf16.msra.mxu1 %v10559_v1  ;;  %v13421_v1 = vld [vmem:[#allocation9 + $0x388] sm:$0xff] }
 0x44b   : > { %10561 = vmatprep.subr.bf16.mxu1 %v15936_v61 }
 0x44e   : > { %10563 = vmatpush3.bf16.msra.mxu1 %v10562_v10  ;;  %v15480_v10 = vand.u32 4294901760, %v13417_v11 }
 0x44f   : > { %10564 = vmatprep.subr.bf16.mxu1 %v15936_v61 }
 0x452   : > { %10566 = vmatpush3.bf16.msra.mxu1 %v10565_v3  ;;  %v15479_v3 = vand.u32 4294901760, %v13419_v57 }
 0x453   : > { %10567 = vmatprep.subr.bf16.mxu1 %v15936_v61 }
 0x456   : > { %10569 = vmatpush3.bf16.msra.mxu1 %v10568_v20  ;;  %v13426_v20 = vld [vmem:[#allocation9 + $0x3a0] sm:$0xff] }
 0x457   : > { %10570 = vmatprep.subr.bf16.mxu1 %v15936_v61 }
 0x45a   : > { %10572 = vmatpush3.bf16.msra.mxu1 %v10571_v56  ;;  %v15478_v56 = vand.u32 4294901760, %v13421_v1 }
 0x45b   : > { %10573 = vmatprep.subr.bf16.mxu1 %v15936_v61 }
 0x45e   : > { %10575 = vmatpush3.bf16.msra.mxu1 %v10574_v39 }
 0x45f   : > { %10576 = vmatprep.subr.bf16.mxu1 %v15936_v61 }
 0x462   : > { %10578 = vmatpush3.bf16.msra.mxu1 %v10577_v44  ;;  %v15477_v44 = vand.u32 4294901760, %v13426_v20 }
 0x463   : > { %10579 = vmatprep.subr.bf16.mxu1 %v15936_v61 }
 0x465   : > { %9306 = vmatmul.mubr.f32.vlgmr.msra.gmra.mrb[26].mxu1 %v15911_v35 }
 0x466   : > { %10581 = vmatpush3.bf16.msra.mxu1 %v13051_v8  ;;  %9340 = vmatprep.mubr.msk.f32.mxu1 %vm11841_vm11, %v15835_v36  ;;  %v13329_v8 = vld [vmem:[#allocation9 + $0x300] ss:$8 sm:$0x7] }
 0x467   : > { %10582 = vmatprep.subr.bf16.mxu1 %v15936_v61  ;;  %15945 = vst [vmem:[#allocation36_spill] sm:$0xff] %v13329_v8 }
 0x46a   : > { %10584 = vmatpush3.bf16.msra.mxu1 %v13057_v55  ;;  %v15946_v55 = vld [vmem:[#allocation19_spill] sm:$0xff] }
 0x46b   : > { %10585 = vmatprep.subr.bf16.mxu1 %v15936_v61 }
 0x46e   : > { %10587 = vmatpush3.bf16.msra.mxu1 %v13064_v13  ;;  %v2862_v13 = vrot.slane %v13329_v8, %v15946_v55 }
 0x46f   : > { %10588 = vmatprep.subr.bf16.mxu1 %v15936_v61 }
 0x470   : > { %v11419_v37 = vadd.f32 %v2862_v13, %v13245_v23  ;;  %v13394_v23 = vpack.c.bf16 %v15493_v29, %v15494_v53  ;;  %v13442_v13 = vpack.c.bf16 %v15479_v3, %v15480_v10  ;;  %v13484_v3 = vld [vmem:[#allocation9 + $0x3e0] sm:$0xff]  ;;  %v13486_v10 = vld [vmem:[#allocation9 + $0x3f8] sm:$0xff]  ;;  %v13524_v53 = vld [vmem:[#allocation9 + $0x410] sm:$0xff] }
 0x472   : > { %10590 = vmatpush3.bf16.msra.mxu1 %v13068_v27  ;;  %v15947_v27 = vld [vmem:[#allocation18_spill] sm:$0xff]  ;;  %15953 = vst [vmem:[#allocation27_spill] sm:$0xff] %v13394_v23  ;;  %10608 = vmatprep.subr.bf16.mxu0 %v13394_v23  ;;  %15957 = vst [vmem:[#allocation38_spill] sm:$0xff] %v13442_v13  ;;  %v4505_v23 = vld [vmem:[#allocation9 + $0x460] sm:$0xff] }
 0x473   : > { %10591 = vmatprep.subr.bf16.mxu1 %v15936_v61  ;;  %10610 = vmatpush1.bf16.msra.mxu0 %v13402_v42  ;;  %v4502_v42 = vld [vmem:[#allocation9 + $0x448] sm:$0xff] }
 0x474   : > { %v5422_v12 = vand.u32 4294901760, %v4502_v42 }
 0x476   : > { %10593 = vmatpush3.bf16.msra.mxu1 %v13076_v31  ;;  %v2866_v31 = vrot.slane %v13329_v8, %v15947_v27  ;;  %v15970_v8 = vand.u32 4294901760, %v13349_v7 }
 0x477   : > { %10594 = vmatprep.subr.bf16.mxu1 %v15936_v61 }
 0x47a   : > { %10596 = vmatpush3.bf16.msra.mxu1 %v13088_v32  ;;  %v13335_v32 = vld [vmem:[#allocation9 + $0x301] ss:$8 sm:$0x7] }
 0x47b   : > { %10597 = vmatprep.subr.bf16.mxu1 %v15936_v61  ;;  %15948 = vst [vmem:[#allocation26_spill] sm:$0xff] %v13335_v32  ;;  %v2931_v2 = vrot.slane %v13335_v32, %v15946_v55  ;;  %v2935_v58 = vrot.slane %v13335_v32, %v15947_v27  ;;  %v4576_v27 = vand.u32 4294901760, %v4497_v17  ;;  %v4499_v55 = vld [vmem:[#allocation9 + $0x430] sm:$0xff]  ;;  %v13562_v32 = vsub.f32 %v13349_v7, %v15970_v8 }
 0x47c   : > { %v15977_v8 = vand.u32 4294901760, %v13367_v41 }
 0x47d   : > { %v11420_v19 = vadd.f32 %v11419_v37, %v2931_v2  ;;  %v13446_v37 = vld [vmem:[#allocation9 + $0x3c8] sm:$0xff]  ;;  %v13453_v2 = vpack.c.bf16 %v15477_v44, %v15478_v56  ;;  %15971 = vst [vmem:[#allocation50_spill] sm:$0xff] %v13562_v32 }
 0x47e   : > { %10599 = vmatpush3.bf16.msra.mxu1 %v13107_v45  ;;  %v13583_v7 = vsub.f32 %v13367_v41, %v15977_v8  ;;  %v15981_v41 = vand.u32 4294901760, %v13386_v14 }
 0x47f   : > { %10600 = vmatprep.subr.bf16.mxu1 %v15936_v61  ;;  %15958 = vst [vmem:[#allocation30_spill] sm:$0xff] %v13453_v2 }
 0x480   : > { %v13604_v8 = vsub.f32 %v13386_v14, %v15981_v41  ;;  %v15986_v41 = vand.u32 4294901760, %v13421_v1 }
 0x482   : > { %10602 = vmatpush3.bf16.msra.mxu1 %v13122_v50 }
 0x483   : > { %10795 = vmatprep.subr.bf16.mxu1 %v15936_v61 }
 0x485   : > { %9341 = vmatmul.mubr.f32.vlgmr.msra.gmra.mrb[26].mxu1 %v15911_v35  ;;  %v11423_v35 = vadd.f32 %v2866_v31, %v13249_v22  ;;  %v13406_v22 = vld [vmem:[#allocation9 + $0x398] sm:$0xff]  ;;  %v13444_v31 = vld [vmem:[#allocation9 + $0x3b0] sm:$0xff] }
 0x486   : > { %9375 = vmatprep.mubr.msk.f32.mxu1 %vm11841_vm11, %v15835_v36  ;;  %10797 = vmatpush3.bf16.msra.mxu1 %v13373_v24  ;;  %v15483_v47 = vand.u32 4294901760, %v13406_v22  ;;  %v5425_v36 = vand.u32 4294901760, %v4505_v23 }
 0x487   : > { %v11424_v54 = vadd.f32 %v11423_v35, %v2935_v58  ;;  %10798 = vmatprep.subr.bf16.mxu1 %v15936_v61  ;;  %v15482_v35 = vand.u32 4294901760, %v13444_v31  ;;  %v15481_v58 = vand.u32 4294901760, %v13446_v37 }
 0x488   : > { %v13434_v39 = vpack.c.bf16 %v15483_v47, %v15484_v21  ;;  %v15496_v47 = vand.u32 4294901760, %v13486_v10  ;;  %v13497_v21 = vld [vmem:[#allocation9 + $0x3d8] sm:$0xff] }
 0x489   : > { %v15502_v52 = vand.u32 4294901760, %v13497_v21 }
 0x48a   : > { %10800 = vmatpush3.bf16.msra.mxu1 %v13413_v15  ;;  %15956 = vst [vmem:[#allocation37_spill] sm:$0xff] %v13434_v39  ;;  %10612 = vmatprep.subr.bf16.mxu0 %v13434_v39  ;;  %v4500_v39 = vld [vmem:[#allocation9 + $0x438] sm:$0xff]  ;;  %v4503_v15 = vld [vmem:[#allocation9 + $0x450] sm:$0xff] }
 0x48b   : > { %10801 = vmatprep.subr.bf16.mxu1 %v15936_v61  ;;  %10614 = vmatpush1.bf16.msra.mxu0 %v13442_v13  ;;  %v4584_v49 = vand.u32 4294901760, %v4503_v15 }
 0x48e   : > { %10803 = vmatpush3.bf16.msra.mxu1 %v13453_v2 }
 0x48f   : > { %10804 = vmatprep.subr.bf16.mxu1 %v15936_v61 }
 0x498   : > { %v3415_v45 = vpop.f32.mrb[24].mxu1  ;;  %v3793_v6 = vpop.f32.mrb[2].mxu0 }
 0x499   : > { %v11421_v50 = vadd.f32 %v11420_v19, %v3415_v45  ;;  %v3417_v34 = vpop.f32.mrb[25].mxu1  ;;  %v3795_v40 = vpop.f32.mrb[3].mxu0  ;;  %v13457_v19 = vld [vmem:[#allocation9 + $0x3a8] sm:$0xff]  ;;  %v13459_v45 = vld [vmem:[#allocation9 + $0x3c0] sm:$0xff] }
 0x49a   : > { %v11425_v0 = vadd.f32 %v11424_v54, %v3417_v34  ;;  %v13461_v54 = vld [vmem:[#allocation9 + $0x3b8] sm:$0xff]  ;;  %v13466_v34 = vld [vmem:[#allocation9 + $0x3d0] sm:$0xff] }
 0x49b   : > { %v13343_v5 = vadd.f32 %v11421_v50, %v3793_v6  ;;  %v15486_v6 = vand.u32 4294901760, %v13457_v19  ;;  %v15485_v50 = vand.u32 4294901760, %v13459_v45  ;;  %v15490_v44 = vand.u32 4294901760, %v13466_v34 }
 0x49c   : > { %v13345_v60 = vadd.f32 %v11425_v0, %v3795_v40  ;;  %v15491_v40 = vand.u32 4294901760, %v13461_v54  ;;  %v13474_v0 = vpack.c.bf16 %v15481_v58, %v15482_v35  ;;  %v15497_v35 = vand.u32 4294901760, %v13484_v3 }
 0x49d   : > { %15949 = vst [vmem:[#allocation35_spill] sm:$0xff] %v13343_v5  ;;  %v13482_v56 = vpack.c.bf16 %v15485_v50, %v15486_v6  ;;  %v13499_v50 = vld [vmem:[#allocation9 + $0x3f0] sm:$0xff]  ;;  %v13501_v6 = vld [vmem:[#allocation9 + $0x3e8] sm:$0xff] }
 0x49e   : > { %15950 = vst [vmem:[#allocation23_spill] sm:$0xff] %v13345_v60  ;;  %15959 = vst [vmem:[#allocation39_spill] sm:$0xff] %v13474_v0  ;;  %10616 = vmatprep.subr.bf16.mxu0 %v13474_v0  ;;  %v13493_v58 = vpack.c.bf16 %v15490_v44, %v15491_v40  ;;  %v15501_v62 = vand.u32 4294901760, %v13499_v50  ;;  %v15510_v44 = vand.u32 4294901760, %v13501_v6  ;;  %v13514_v40 = vpack.c.bf16 %v15496_v47, %v15497_v35  ;;  %v4504_v0 = vld [vmem:[#allocation9 + $0x458] sm:$0xff] }
 0x49f   : > { %15960 = vst [vmem:[#allocation41_spill] sm:$0xff] %v13482_v56  ;;  %10618 = vmatpush1.bf16.msra.mxu0 %v13482_v56  ;;  %v4570_v35 = vand.u32 4294901760, %v13524_v53  ;;  %v4501_v56 = vld [vmem:[#allocation9 + $0x440] sm:$0xff]  ;;  %v4582_v13 = vand.u32 4294901760, %v4504_v0 }
 0x4a0   : > { %15961 = vst [vmem:[#allocation34_spill] sm:$0xff] %v13493_v58  ;;  %10806 = vmatpush3.bf16.msra.mxu1 %v13493_v58  ;;  %15962 = vst [vmem:[#allocation43_spill] sm:$0xff] %v13514_v40  ;;  %v13522_v29 = vpack.c.bf16 %v15501_v62, %v15502_v52  ;;  %10620 = vmatprep.subr.bf16.mxu0 %v13514_v40  ;;  %v13533_v47 = vpack.c.bf16 %v15509_v63, %v15510_v44  ;;  %v13537_v62 = vld [vmem:[#allocation9 + $0x418] sm:$0xff]  ;;  %v4572_v52 = vand.u32 4294901760, %v4494_v48 }
 0x4a1   : > { %10807 = vmatprep.subr.bf16.mxu1 %v15936_v61  ;;  %v5416_v40 = vand.u32 4294901760, %v13537_v62  ;;  %v13542_v58 = vpack.c.bf16 %v4574_v16, %v4570_v35  ;;  %v5419_v63 = vand.u32 4294901760, %v4499_v55 }
 0x4a2   : > { %15963 = vst [vmem:[#allocation44_spill] sm:$0xff] %v13522_v29  ;;  %15964 = vst [vmem:[#allocation40_spill] sm:$0xff] %v13533_v47  ;;  %v13545_v44 = vpack.c.bf16 %v4576_v27, %v4572_v52 }
 0x4a3   : > { %10622 = vmatpush1.bf16.msra.mxu0 %v13522_v29  ;;  %15965 = vst [vmem:[#allocation42_spill] sm:$0xff] %v13542_v58  ;;  %v13548_v2 = vpack.c.bf16 %v5419_v63, %v5416_v40  ;;  %v4578_v29 = vand.u32 4294901760, %v4501_v56 }
 0x4a4   : > { %10809 = vmatpush3.bf16.msra.mxu1 %v13533_v47  ;;  %15966 = vst [vmem:[#allocation45_spill] sm:$0xff] %v13545_v44  ;;  %10624 = vmatprep.subr.bf16.mxu0 %v13542_v58  ;;  %v4580_v47 = vand.u32 4294901760, %v4500_v39  ;;  %v15969_v58 = vand.u32 4294901760, %v13347_v4 }
 0x4a5   : > { %10810 = vmatprep.subr.bf16.mxu1 %v15936_v61  ;;  %15967 = vst [vmem:[#allocation46_spill] sm:$0xff] %v13548_v2  ;;  %v13552_v24 = vpack.c.bf16 %v4582_v13, %v4578_v29 }
 0x4a6   : > { %v13557_v25 = vsub.f32 %v13347_v4, %v15969_v58  ;;  %v15975_v4 = vand.u32 4294901760, %v13365_v18 }
 0x4a7   : > { %10626 = vmatpush1.bf16.msra.mxu0 %v13545_v44  ;;  %15968 = vst [vmem:[#allocation47_spill] sm:$0xff] %v13552_v24  ;;  %v15972_v44 = vand.u32 4294901760, %v13351_v33 }
 0x4a8   : > { %10812 = vmatpush3.bf16.msra.mxu1 %v13548_v2  ;;  %v15974_v2 = vand.u32 4294901760, %v13355_v28  ;;  %v13578_v58 = vsub.f32 %v13365_v18, %v15975_v4  ;;  %10628 = vmatprep.subr.bf16.mxu0 %v13552_v24  ;;  %v15980_v18 = vand.u32 4294901760, %v13381_v26  ;;  %v15984_v24 = vand.u32 4294901760, %v13417_v11 }
 0x4a9   : > { %v13567_v60 = vsub.f32 %v13351_v33, %v15972_v44  ;;  %10813 = vmatprep.subr.bf16.mxu1 %v15936_v61  ;;  %v15978_v33 = vand.u32 4294901760, %v13377_v43 }
 0x4aa   : > { %v13572_v5 = vsub.f32 %v13355_v28, %v15974_v2  ;;  %15976 = vst [vmem:[#allocation21_spill] sm:$0xff] %v13578_v58  ;;  %v15979_v28 = vand.u32 4294901760, %v13379_v59  ;;  %v13599_v4 = vsub.f32 %v13381_v26, %v15980_v18  ;;  %v13619_v26 = vsub.f32 %v13417_v11, %v15984_v24 }
 0x4ab   : > { %15973 = vst [vmem:[#allocation51_spill] sm:$0xff] %v13567_v60  ;;  %v13588_v44 = vsub.f32 %v13377_v43, %v15978_v33  ;;  %v15982_v43 = vand.u32 4294901760, %v13404_v9  ;;  %v15985_v18 = vand.u32 4294901760, %v13419_v57  ;;  %v15989_v11 = vand.u32 4294901760, %v13446_v37 }
 0x4ac   : > { %v13593_v2 = vsub.f32 %v13379_v59, %v15979_v28  ;;  %v15983_v59 = vand.u32 4294901760, %v13406_v22 }
 0x4ad   : > { %v13609_v33 = vsub.f32 %v13404_v9, %v15982_v43  ;;  %v13624_v14 = vsub.f32 %v13419_v57, %v15985_v18  ;;  %v13629_v9 = vsub.f32 %v13421_v1, %v15986_v41  ;;  %v15987_v43 = vand.u32 4294901760, %v13426_v20 }
 0x4ae   : > { %v13614_v28 = vsub.f32 %v13406_v22, %v15983_v59  ;;  %v15988_v59 = vand.u32 4294901760, %v13444_v31  ;;  %v13644_v57 = vsub.f32 %v13446_v37, %v15989_v11  ;;  %v15990_v18 = vand.u32 4294901760, %v13457_v19 }
 0x4af   : > { %v13634_v22 = vsub.f32 %v13426_v20, %v15987_v43  ;;  %v15991_v41 = vand.u32 4294901760, %v13459_v45  ;;  %v15992_v43 = vand.u32 4294901760, %v13461_v54  ;;  %v15994_v11 = vand.u32 4294901760, %v13484_v3 }
 0x4b0   : > { %v13639_v24 = vsub.f32 %v13444_v31, %v15988_v59  ;;  %v13649_v1 = vsub.f32 %v13457_v19, %v15990_v18  ;;  %v15993_v59 = vand.u32 4294901760, %v13466_v34  ;;  %v15995_v18 = vand.u32 4294901760, %v13486_v10 }
 0x4b1   : > { %v13654_v20 = vsub.f32 %v13459_v45, %v15991_v41  ;;  %v13659_v31 = vsub.f32 %v13461_v54, %v15992_v43  ;;  %v13669_v19 = vsub.f32 %v13484_v3, %v15994_v11  ;;  %v15996_v41 = vand.u32 4294901760, %v13497_v21 }
 0x4b2   : > { %v13664_v37 = vsub.f32 %v13466_v34, %v15993_v59  ;;  %v13674_v45 = vsub.f32 %v13486_v10, %v15995_v18  ;;  %v15998_v43 = vand.u32 4294901760, %v13499_v50  ;;  %v16000_v59 = vand.u32 4294901760, %v13501_v6 }
 0x4b3   : > { %v13679_v54 = vsub.f32 %v13497_v21, %v15996_v41  ;;  %v16001_v11 = vand.u32 4294901760, %v13506_v38  ;;  %v13697_v18 = vsub.f32 %v13524_v53, %v4570_v35  ;;  %v13700_v21 = vsub.f32 %v13526_v51, %v4574_v16  ;;  %v4509_v53 = vld [vmem:[#allocation9 + $0x480] sm:$0xff]  ;;  %v4508_v35 = vld [vmem:[#allocation9 + $0x478] sm:$0xff]  ;;  %v4511_v16 = vld [vmem:[#allocation9 + $0x490] sm:$0xff] }
 0x4b4   : > { %v13684_v34 = vsub.f32 %v13499_v50, %v15998_v43  ;;  %v13689_v3 = vsub.f32 %v13501_v6, %v16000_v59  ;;  %v13702_v41 = vsub.f32 %v4494_v48, %v4572_v52  ;;  %v13704_v50 = vsub.f32 %v4497_v17, %v4576_v27  ;;  %v4507_v43 = vld [vmem:[#allocation9 + $0x470] sm:$0xff] }
 0x4b5   : > { %15997 = vst [vmem:[#allocation52_spill] sm:$0xff] %v13679_v54  ;;  %v13694_v10 = vsub.f32 %v13506_v38, %v16001_v11  ;;  %v4506_v54 = vld [vmem:[#allocation9 + $0x468] sm:$0xff]  ;;  %v13707_v6 = vsub.f32 %v13537_v62, %v5416_v40  ;;  %v13709_v59 = vsub.f32 %v4499_v55, %v5419_v63  ;;  %v13711_v38 = vsub.f32 %v4501_v56, %v4578_v29 }
 0x4b6   : > { %15999 = vst [vmem:[#allocation49_spill] sm:$0xff] %v13684_v34  ;;  %v4510_v34 = vld [vmem:[#allocation9 + $0x488] sm:$0xff]  ;;  %v13713_v11 = vsub.f32 %v4504_v0, %v4582_v13  ;;  %v13715_v51 = vpack.c.bf16 %v4584_v49, %v4580_v47  ;;  %v13717_v48 = vsub.f32 %v4500_v39, %v4580_v47  ;;  %v13719_v27 = vsub.f32 %v4503_v15, %v4584_v49 }
 0x4b7   : > { %v13721_v17 = vpack.c.bf16 %v5425_v36, %v5422_v12  ;;  %v13723_v52 = vsub.f32 %v4502_v42, %v5422_v12  ;;  %v13725_v62 = vsub.f32 %v4505_v23, %v5425_v36  ;;  %v4586_v55 = vand.u32 4294901760, %v4507_v43 }
 0x4b8   : > { %16002 = vst [vmem:[#allocation48_spill] sm:$0xff] %v13715_v51  ;;  %v4590_v29 = vand.u32 4294901760, %v4510_v34  ;;  %10630 = vmatpush1.bf16.msra.mxu0 %v13715_v51  ;;  %v4588_v63 = vand.u32 4294901760, %v4506_v54  ;;  %v4592_v56 = vand.u32 4294901760, %v4509_v53  ;;  %v5428_v13 = vand.u32 4294901760, %v4508_v35 }
 0x4b9   : > { %16003 = vst [vmem:[#allocation53_spill] sm:$0xff] %v13721_v17  ;;  %16004 = vst [vmem:[#allocation54_spill] sm:$0xff] %v13723_v52  ;;  %10815 = vmatpush3.bf16.msra.mxu1 %v13721_v17  ;;  %v5431_v40 = vand.u32 4294901760, %v4511_v16  ;;  %v13731_v49 = vsub.f32 %v4507_v43, %v4586_v55  ;;  %v15550_v36 = vand.u32 4294901760, %v13255_v30 }
 0x4ba   : > { %16005 = vst [vmem:[#allocation55_spill] sm:$0xff] %v13725_v62  ;;  %v13729_v47 = vpack.c.bf16 %v4590_v29, %v4586_v55  ;;  %v13733_v15 = vsub.f32 %v4510_v34, %v4590_v29  ;;  %10816 = vmatprep.subr.bf16.mxu1 %v15936_v61  ;;  %v13737_v12 = vpack.c.bf16 %v4592_v56, %v4588_v63  ;;  %v15551_v55 = vand.u32 4294901760, %v13257_v46 }
 0x4bb   : > { %16007 = vst [vmem:[#allocation57_spill] sm:$0xff] %v13731_v49  ;;  %v13739_v23 = vsub.f32 %v4506_v54, %v4588_v63  ;;  %v13741_v42 = vsub.f32 %v4509_v53, %v4592_v56  ;;  %v13743_v39 = vpack.c.bf16 %v5431_v40, %v5428_v13  ;;  %v13746_v0 = vsub.f32 %v4508_v35, %v5428_v13 }
 0x4bc   : > { %16006 = vst [vmem:[#allocation56_spill] sm:$0xff] %v13729_v47  ;;  %16008 = vst [vmem:[#allocation58_spill] sm:$0xff] %v13733_v15  ;;  %10632 = vmatprep.subr.bf16.mxu0 %v13729_v47  ;;  %v13748_v43 = vsub.f32 %v4511_v16, %v5431_v40  ;;  %v4641_v34 = vsub.f32 %v13255_v30, %v15550_v36  ;;  %v15556_v54 = vand.u32 4294901760, %v13557_v25  ;;  %v15559_v53 = vand.u32 4294901760, %v13562_v32 }
 0x4bd   : > { %16009 = vst [vmem:[#allocation59_spill] sm:$0xff] %v13737_v12  ;;  %16010 = vst [vmem:[#allocation60_spill] sm:$0xff] %v13739_v23  ;;  %10634 = vmatpush1.bf16.msra.mxu0 %v13737_v12  ;;  %10818 = vmatpush3.bf16.msra.mxu1 %v13743_v39  ;;  %v15565_v29 = vand.u32 4294901760, %v13567_v60  ;;  %v15570_v35 = vand.u32 4294901760, %v13572_v5  ;;  %v4653_v63 = vsub.f32 %v13257_v46, %v15551_v55  ;;  %v15571_v56 = vand.u32 4294901760, %v13578_v58 }
 0x4be   : > { %16011 = vst [vmem:[#allocation61_spill] sm:$0xff] %v13741_v42  ;;  %16012 = vst [vmem:[#allocation62_spill] sm:$0xff] %v13743_v39  ;;  %v4642_v16 = vand.u32 4294901760, %v4641_v34  ;;  %10819 = vmatprep.subr.bf16.mxu1 %v15936_v61  ;;  %v4647_v40 = vsub.f32 %v13557_v25, %v15556_v54  ;;  %v4659_v36 = vsub.f32 %v13562_v32, %v15559_v53  ;;  %v16015_v12 = vand.u32 4294901760, %v13583_v7 }
 0x4bf   : > { %16013 = vst [vmem:[#allocation63_spill] sm:$0xff] %v13746_v0  ;;  %16014 = vst [vmem:[#allocation64_spill] sm:$0xff] %v13748_v43  ;;  %v5480_v34 = vsub.f32 %v13567_v60, %v15565_v29  ;;  %v5487_v55 = vsub.f32 %v13572_v5, %v15570_v35  ;;  %v4654_v39 = vand.u32 4294901760, %v4653_v63  ;;  %v4665_v13 = vsub.f32 %v13578_v58, %v15571_v56 }
 0x4c0   : > { %v4677_v54 = vsub.f32 %v13583_v7, %v16015_v12  ;;  %v15578_v47 = vand.u32 4294901760, %v13588_v44  ;;  %v4648_v53 = vand.u32 4294901760, %v4647_v40  ;;  %v4660_v17 = vand.u32 4294901760, %v4659_v36 }
 0x4c1   : > { %v5481_v51 = vand.u32 4294901760, %v5480_v34  ;;  %v5488_v61 = vand.u32 4294901760, %v5487_v55  ;;  %v10635_v29 = vpack.c.bf16 %v4654_v39, %v4642_v16  ;;  %v4666_v60 = vand.u32 4294901760, %v4665_v13 }
 0x4c2   : > { %v4678_v32 = vand.u32 4294901760, %v4677_v54  ;;  %v4671_v63 = vsub.f32 %v13588_v44, %v15578_v47  ;;  %v13788_v35 = vpack.c.bf16 %v4660_v17, %v4648_v53  ;;  %v15577_v58 = vand.u32 4294901760, %v13593_v2 }
 0x4c3   : > { %v13790_v56 = vpack.c.bf16 %v5488_v61, %v5481_v51  ;;  %v15574_v12 = vand.u32 4294901760, %v13599_v4  ;;  %10636 = vmatprep.subr.bf16.mxu0 %v10635_v29  ;;  %v15575_v39 = vand.u32 4294901760, %v13604_v8  ;;  %v15576_v55 = vand.u32 4294901760, %v13609_v33 }
 0x4c4   : > { %v13794_v40 = vpack.c.bf16 %v4678_v32, %v4666_v60  ;;  %v4672_v36 = vand.u32 4294901760, %v4671_v63  ;;  %v4683_v54 = vsub.f32 %v13593_v2, %v15577_v58  ;;  %v15579_v51 = vand.u32 4294901760, %v13614_v28 }
 0x4c5   : > { %16016 = vst [vmem:[#allocation65_spill] sm:$0xff] %v13790_v56  ;;  %v5494_v61 = vsub.f32 %v13599_v4, %v15574_v12  ;;  %v15580_v17 = vand.u32 4294901760, %v13619_v26  ;;  %v5501_v32 = vsub.f32 %v13604_v8, %v15575_v39  ;;  %v4689_v60 = vsub.f32 %v13609_v33, %v15576_v55 }
 0x4c6   : > { %16017 = vst [vmem:[#allocation66_spill] sm:$0xff] %v13794_v40  ;;  %v15581_v53 = vand.u32 4294901760, %v13624_v14  ;;  %v15582_v29 = vand.u32 4294901760, %v13629_v9  ;;  %v4684_v16 = vand.u32 4294901760, %v4683_v54  ;;  %v4701_v34 = vsub.f32 %v13614_v28, %v15579_v51 }
 0x4c7   : > { %v5495_v13 = vand.u32 4294901760, %v5494_v61  ;;  %v4695_v63 = vsub.f32 %v13619_v26, %v15580_v17  ;;  %v5502_v12 = vand.u32 4294901760, %v5501_v32  ;;  %v4690_v39 = vand.u32 4294901760, %v4689_v60 }
 0x4c8   : > { %v4707_v55 = vsub.f32 %v13624_v14, %v15581_v53  ;;  %v5508_v58 = vsub.f32 %v13629_v9, %v15582_v29  ;;  %v13826_v54 = vpack.c.bf16 %v4684_v16, %v4672_v36  ;;  %v4702_v61 = vand.u32 4294901760, %v4701_v34 }
 0x4c9   : > { %v4696_v47 = vand.u32 4294901760, %v4695_v63  ;;  %v15585_v51 = vand.u32 4294901760, %v13634_v22  ;;  %v13829_v40 = vpack.c.bf16 %v5502_v12, %v5495_v13  ;;  %v15583_v32 = vand.u32 4294901760, %v13639_v24 }
 0x4ca   : > { %16018 = vst [vmem:[#allocation67_spill] sm:$0xff] %v13826_v54  ;;  %v4708_v56 = vand.u32 4294901760, %v4707_v55  ;;  %v5509_v17 = vand.u32 4294901760, %v5508_v58  ;;  %v13832_v60 = vpack.c.bf16 %v4702_v61, %v4690_v39  ;;  %v15584_v29 = vand.u32 4294901760, %v13644_v57  ;;  %v16024_v54 = vld [vmem:[#allocation52_spill] sm:$0xff] }
 0x4cb   : > { %16019 = vst [vmem:[#allocation68_spill] sm:$0xff] %v13829_v40  ;;  %v5515_v53 = vsub.f32 %v13634_v22, %v15585_v51  ;;  %v15586_v36 = vand.u32 4294901760, %v13649_v1  ;;  %v4713_v12 = vsub.f32 %v13639_v24, %v15583_v32  ;;  %v15587_v58 = vand.u32 4294901760, %v13654_v20 }
 0x4cc   : > { %16020 = vst [vmem:[#allocation69_spill] sm:$0xff] %v13832_v60  ;;  %v13839_v16 = vpack.c.bf16 %v4708_v56, %v4696_v47  ;;  %v15588_v55 = vand.u32 4294901760, %v13659_v31  ;;  %v4725_v13 = vsub.f32 %v13644_v57, %v15584_v29  ;;  %v15589_v47 = vand.u32 4294901760, %v13664_v37 }
 0x4cd   : > { %v5516_v39 = vand.u32 4294901760, %v5515_v53  ;;  %v4719_v34 = vsub.f32 %v13649_v1, %v15586_v36  ;;  %v4714_v56 = vand.u32 4294901760, %v4713_v12  ;;  %v4731_v63 = vsub.f32 %v13654_v20, %v15587_v58 }
 0x4ce   : > { %16021 = vst [vmem:[#allocation70_spill] sm:$0xff] %v13839_v16  ;;  %v5522_v61 = vsub.f32 %v13659_v31, %v15588_v55  ;;  %v15592_v53 = vand.u32 4294901760, %v13669_v19  ;;  %v4726_v29 = vand.u32 4294901760, %v4725_v13  ;;  %v5529_v36 = vsub.f32 %v13664_v37, %v15589_v47 }
 0x4cf   : > { %v13860_v32 = vpack.c.bf16 %v5516_v39, %v5509_v17  ;;  %v4720_v51 = vand.u32 4294901760, %v4719_v34  ;;  %v4732_v16 = vand.u32 4294901760, %v4731_v63  ;;  %v15590_v60 = vand.u32 4294901760, %v13674_v45  ;;  %v16025_v39 = vld [vmem:[#allocation49_spill] sm:$0xff] }
 0x4d0   : > { %v5523_v12 = vand.u32 4294901760, %v5522_v61  ;;  %v4737_v58 = vsub.f32 %v13669_v19, %v15592_v53  ;;  %v13869_v40 = vpack.c.bf16 %v4726_v29, %v4714_v56  ;;  %v5530_v55 = vand.u32 4294901760, %v5529_v36 }
 0x4d1   : > { %16022 = vst [vmem:[#allocation71_spill] sm:$0xff] %v13860_v32  ;;  %v15591_v17 = vand.u32 4294901760, %v16024_v54  ;;  %v15593_v13 = vand.u32 4294901760, %v16025_v39  ;;  %v13873_v34 = vpack.c.bf16 %v4732_v16, %v4720_v51  ;;  %v4749_v63 = vsub.f32 %v13674_v45, %v15590_v60 }
 0x4d2   : > { %16023 = vst [vmem:[#allocation72_spill] sm:$0xff] %v13869_v40  ;;  %v4738_v32 = vand.u32 4294901760, %v4737_v58  ;;  %v15594_v61 = vand.u32 4294901760, %v13689_v3  ;;  %v13879_v47 = vpack.c.bf16 %v5530_v55, %v5523_v12  ;;  %v15595_v51 = vand.u32 4294901760, %v13694_v10 }
 0x4d3   : > { %16026 = vst [vmem:[#allocation52_spill] sm:$0xff] %v13873_v34  ;;  %v4743_v29 = vsub.f32 %v16024_v54, %v15591_v17  ;;  %v4755_v36 = vsub.f32 %v16025_v39, %v15593_v13  ;;  %v4750_v16 = vand.u32 4294901760, %v4749_v63  ;;  %v15596_v56 = vand.u32 4294901760, %v13697_v18 }
 0x4d4   : > { %16027 = vst [vmem:[#allocation49_spill] sm:$0xff] %v13879_v47  ;;  %v5536_v58 = vsub.f32 %v13689_v3, %v15594_v61  ;;  %v15600_v55 = vand.u32 4294901760, %v13700_v21  ;;  %v5543_v17 = vsub.f32 %v13694_v10, %v15595_v51  ;;  %v15598_v53 = vand.u32 4294901760, %v13702_v41 }
 0x4d5   : > { %v4744_v12 = vand.u32 4294901760, %v4743_v29  ;;  %v4756_v60 = vand.u32 4294901760, %v4755_v36  ;;  %v13897_v13 = vpack.c.bf16 %v4750_v16, %v4738_v32  ;;  %v4761_v63 = vsub.f32 %v13697_v18, %v15596_v56 }
 0x4d6   : > { %v5537_v47 = vand.u32 4294901760, %v5536_v58  ;;  %v4773_v61 = vsub.f32 %v13700_v21, %v15600_v55  ;;  %v5544_v29 = vand.u32 4294901760, %v5543_v17  ;;  %v4767_v36 = vsub.f32 %v13702_v41, %v15598_v53 }
 0x4d7   : > { %16028 = vst [vmem:[#allocation73_spill] sm:$0xff] %v13897_v13  ;;  %v13905_v34 = vpack.c.bf16 %v4756_v60, %v4744_v12  ;;  %v15597_v51 = vand.u32 4294901760, %v13704_v50  ;;  %v4762_v32 = vand.u32 4294901760, %v4761_v63  ;;  %v15599_v58 = vand.u32 4294901760, %v13707_v6 }
 0x4d8   : > { %v4774_v16 = vand.u32 4294901760, %v4773_v61  ;;  %v15601_v13 = vand.u32 4294901760, %v13709_v59  ;;  %v13913_v56 = vpack.c.bf16 %v5544_v29, %v5537_v47  ;;  %v4768_v40 = vand.u32 4294901760, %v4767_v36 }
 0x4d9   : > { %16029 = vst [vmem:[#allocation74_spill] sm:$0xff] %v13905_v34  ;;  %v4779_v60 = vsub.f32 %v13704_v50, %v15597_v51  ;;  %v15602_v17 = vand.u32 4294901760, %v13711_v38  ;;  %v5550_v63 = vsub.f32 %v13707_v6, %v15599_v58  ;;  %v15603_v47 = vand.u32 4294901760, %v13713_v11 }
 0x4da   : > { %16030 = vst [vmem:[#allocation75_spill] sm:$0xff] %v13913_v56  ;;  %v13919_v12 = vpack.c.bf16 %v4774_v16, %v4762_v32  ;;  %v5557_v61 = vsub.f32 %v13709_v59, %v15601_v13  ;;  %v15604_v51 = vand.u32 4294901760, %v13717_v48  ;;  %v15609_v32 = vand.u32 4294901760, %v13719_v27 }
 0x4db   : > { %v4780_v29 = vand.u32 4294901760, %v4779_v60  ;;  %v4785_v36 = vsub.f32 %v13711_v38, %v15602_v17  ;;  %v5551_v16 = vand.u32 4294901760, %v5550_v63  ;;  %v4797_v58 = vsub.f32 %v13713_v11, %v15603_v47 }
 0x4dc   : > { %16031 = vst [vmem:[#allocation76_spill] sm:$0xff] %v13919_v12  ;;  %v5558_v53 = vand.u32 4294901760, %v5557_v61  ;;  %v15606_v55 = vand.u32 4294901760, %v13723_v52  ;;  %v4791_v60 = vsub.f32 %v13717_v48, %v15604_v51  ;;  %v4803_v17 = vsub.f32 %v13719_v27, %v15609_v32 }
 0x4dd   : > { %v13937_v13 = vpack.c.bf16 %v4780_v29, %v4768_v40  ;;  %v4786_v12 = vand.u32 4294901760, %v4785_v36  ;;  %v4798_v63 = vand.u32 4294901760, %v4797_v58  ;;  %v15605_v47 = vand.u32 4294901760, %v13725_v62 }
 0x4de   : > { %v13945_v56 = vpack.c.bf16 %v5558_v53, %v5551_v16  ;;  %v5564_v61 = vsub.f32 %v13723_v52, %v15606_v55  ;;  %v4792_v40 = vand.u32 4294901760, %v4791_v60  ;;  %v4804_v29 = vand.u32 4294901760, %v4803_v17 }
 0x4df   : > { %16032 = vst [vmem:[#allocation77_spill] sm:$0xff] %v13937_v13  ;;  %v15607_v36 = vand.u32 4294901760, %v13731_v49  ;;  %v15608_v13 = vand.u32 4294901760, %v13733_v15  ;;  %v13953_v51 = vpack.c.bf16 %v4798_v63, %v4786_v12  ;;  %v5571_v53 = vsub.f32 %v13725_v62, %v15605_v47 }
 0x4e0   : > { %16033 = vst [vmem:[#allocation78_spill] sm:$0xff] %v13945_v56  ;;  %v5565_v34 = vand.u32 4294901760, %v5564_v61  ;;  %v15610_v58 = vand.u32 4294901760, %v13739_v23  ;;  %v13959_v16 = vpack.c.bf16 %v4804_v29, %v4792_v40  ;;  %v15611_v12 = vand.u32 4294901760, %v13741_v42  ;;  %v16037_v56 = vld [vmem:[#allocation51_spill] sm:$0xff] }
 0x4e1   : > { %16034 = vst [vmem:[#allocation79_spill] sm:$0xff] %v13953_v51  ;;  %v4809_v60 = vsub.f32 %v13731_v49, %v15607_v36  ;;  %v4821_v17 = vsub.f32 %v13733_v15, %v15608_v13  ;;  %v5572_v63 = vand.u32 4294901760, %v5571_v53  ;;  %v15614_v47 = vand.u32 4294901760, %v13746_v0  ;;  %v16036_v51 = vld [vmem:[#allocation50_spill] sm:$0xff]  ;;  %v11641_v15 = vld [vmem:[#allocation2] sm:$0xff] }
 0x4e2   : > { %16035 = vst [vmem:[#allocation80_spill] sm:$0xff] %v13959_v16  ;;  %v4815_v61 = vsub.f32 %v13739_v23, %v15610_v58  ;;  %v15617_v40 = vand.u32 4294901760, %v13748_v43  ;;  %v4827_v36 = vsub.f32 %v13741_v42, %v15611_v12  ;;  %v16042_v13 = vld [vmem:[#allocation26_spill] sm:$0xff] }
 0x4e3   : > { %v4810_v29 = vand.u32 4294901760, %v4809_v60  ;;  %v4822_v55 = vand.u32 4294901760, %v4821_v17  ;;  %v13978_v32 = vpack.c.bf16 %v5572_v63, %v5565_v34  ;;  %v5578_v58 = vsub.f32 %v13746_v0, %v15614_v47 }
 0x4e4   : > { %v4816_v53 = vand.u32 4294901760, %v4815_v61  ;;  %v5585_v16 = vsub.f32 %v13748_v43, %v15617_v40  ;;  %v4828_v17 = vand.u32 4294901760, %v4827_v36  ;;  %v16038_v61 = vld [vmem:[#allocation21_spill] sm:$0xff] }
 0x4e5   : > { %v13986_v60 = vpack.c.bf16 %v4822_v55, %v4810_v29  ;;  %v5579_v34 = vand.u32 4294901760, %v5578_v58  ;;  %v16039_v58 = vld [vmem:[#allocation35_spill] sm:$0xff]  ;;  %v16041_v29 = vld [vmem:[#allocation20_spill] sm:$0xff] }
 0x4e6   : > { %v5586_v63 = vand.u32 4294901760, %v5585_v16  ;;  %v13996_v46 = vpack.c.bf16 %v4828_v17, %v4816_v53  ;;  %v8415_v53 = vmul.f32 -1.442695, %v16039_v58  ;;  %v16040_v55 = vld [vmem:[#allocation23_spill] sm:$0xff]  ;;  %v2939_v12 = vrot.slane %v16042_v13, %v16041_v29  ;;  %v16044_v58 = vld [vmem:[#allocation33_spill] sm:$0xff] }
 0x4e7   : > { %v8416_v17 = vmul.f32 -1.442695, %v16040_v55 }
 0x4e8   : > { %v14004_v40 = vpack.c.bf16 %v5586_v63, %v5579_v34  ;;  %11612 = vpow2.f32 %v8415_v53  ;;  %v16043_v34 = vld [vmem:[#allocation36_spill] sm:$0xff] }
 0x4e9   : > { %11614 = vpow2.f32 %v8416_v17  ;;  %v2870_v49 = vrot.slane %v16043_v34, %v16041_v29  ;;  %v16110_v29 = vld [vmem:[#allocation34_spill] sm:$0xff] }
 0x4eb   : > { %v2876_v53 = vadd.f32 %v2870_v49, %v16044_v58  ;;  %v16054_v58 = vld [vmem:[#allocation72_spill] sm:$0xff] }
 0x4f2   : > { %v11613_v47 = vpop.eup %11612 }
 0x4f3   : > { %v4443_v36 = vadd.f32 1.0, %v11613_v47  ;;  %v11615_v30 = vpop.eup %11614 }
 0x4f4   : > { %v4450_v63 = vadd.f32 1.0, %v11615_v30 }
 0x4f5   : > { %11616 = vrcp.f32 %v4443_v36 }
 0x4f6   : > { %11618 = vrcp.f32 %v4450_v63  ;;  %v16053_v63 = vld [vmem:[#allocation71_spill] sm:$0xff] }
 0x4ff   : > { %v11617_v0 = vpop.eup %11616 }
 0x500   : > { %v11619_v47 = vpop.eup %11618 }
 0x501   : > { %v4456_v36 = vsub.f32 1.0, %v11619_v47  ;;  %v4458_v52 = vmul.f32 %v11641_v15, %v11619_v47  ;;  %v16045_v15 = vld [vmem:[#allocation65_spill] sm:$0xff] }
 0x502   : > { %v16057_v47 = vld [vmem:[#allocation73_spill] sm:$0xff] }
 0x558   : > { %v4435_v23 = vpop.f32.mrb[26].mxu1 }
 0x559   : > { %v11427_v42 = vadd.f32 %v4435_v23, %v2939_v12  ;;  %v9342_v16 = vpop.f32.mrb[27].mxu1  ;;  %v16050_v12 = vld [vmem:[#allocation68_spill] sm:$0xff] }
 0x55a   : > { %v16051_v16 = vld [vmem:[#allocation69_spill] sm:$0xff] }
 0x55b   : > { %v4453_v55 = vmul.f32 %v11617_v0, %v11427_v42  ;;  %v16047_v0 = vmov 0.0|0.0  }
 0x55d   : > { %v4454_v43 = vadd.f32 %v4453_v55, %v2876_v53  ;;  %v16055_v53 = vld [vmem:[#allocation52_spill] sm:$0xff]  ;;  %v16056_v55 = vld [vmem:[#allocation49_spill] sm:$0xff] }
 0x55f   : > { %11620 = vtanh.f32 %v4454_v43  ;;  %v16048_v43 = vmov 0.0  }
 0x569   : > { %v11621_v17 = vpop.eup %11620 }
 0x56a   : > { %v4457_v13 = vmul.f32 %v11621_v17, %v4456_v36  ;;  %v16058_v36 = vld [vmem:[#allocation74_spill] sm:$0xff]  ;;  %v16059_v17 = vld [vmem:[#allocation75_spill] sm:$0xff] }
 0x56c   : > { %v4459_v62 = vadd.f32 %v4458_v52, %v4457_v13  ;;  %v16046_v52 = vld [vmem:[#allocation66_spill] sm:$0xff]  ;;  %v16060_v13 = vld [vmem:[#allocation76_spill] sm:$0xff] }
 0x56e   : > { %4460 = vst [vmem:[#allocation2] sm:$0xff] %v4459_v62  ;;  %v14045_v34 = vand.u32 4294901760, %v4459_v62 }
 0x570   : > { %v14048_v30 = vsub.f32 %v4459_v62, %v14045_v34  ;;  %v16049_v62 = vld [vmem:[#allocation67_spill] sm:$0xff] }
 0x572   : > { %v14051_v23 = vand.u32 4294901760, %v14048_v30 }
 0x574   : > { %v4630_v49 = vsub.f32 %v14048_v30, %v14051_v23 }
 0x576   : > { %v4631_v42 = vand.u32 4294901760, %v4630_v49  ;;  %v16061_v49 = vld [vmem:[#allocation77_spill] sm:$0xff] }
 0x578   : > { %4632 = vmatmul.mubr.f32.vlgmr.msra.gmra.mrb[4].mxu0 %v4631_v42  ;;  %9376 = vmatmul.mubr.f32.vlgmr.msra.gmra.mrb[28].mxu1 %v4631_v42  ;;  %v16062_v42 = vld [vmem:[#allocation78_spill] sm:$0xff] }
 0x579   : > { %10638 = vmatpush1.bf16.msra.mxu0 %v13788_v35  ;;  %10821 = vmatpush3.bf16.msra.mxu1 %v16045_v15  ;;  %v16052_v35 = vld [vmem:[#allocation70_spill] sm:$0xff]  ;;  %v16063_v15 = vld [vmem:[#allocation79_spill] sm:$0xff] }
 0x57a   : > { %10640 = vmatprep.subr.bf16.mxu0 %v16046_v52  ;;  %10822 = vmatprep.subr.bf16.mxu1 %v16047_v0  ;;  %v16064_v52 = vld [vmem:[#allocation80_spill] sm:$0xff] }
 0x57b   : > { %4862 = vmatprep.mubr.f32.mxu0 %v16048_v43  ;;  %9410 = vmatprep.mubr.msk.f32.mxu1 %vm11841_vm11, %v16048_v43 }
 0x57d   : > { %10642 = vmatpush1.bf16.msra.mxu0 %v16049_v62  ;;  %10824 = vmatpush3.bf16.msra.mxu1 %v16050_v12  ;;  %v16065_v62 = vld [vmem:[#allocation32_spill] sm:$0xff] }
 0x57e   : > { %10644 = vmatprep.subr.bf16.mxu0 %v16051_v16  ;;  %10825 = vmatprep.subr.bf16.mxu1 %v16047_v0  ;;  %v16066_v12 = vld [vmem:[#allocation24_spill] sm:$0xff] }
 0x57f   : > { %v16067_v16 = vpack.c.bf16 %v16065_v62, %v16066_v12 }
 0x581   : > { %10646 = vmatpush1.bf16.msra.mxu0 %v16052_v35  ;;  %10827 = vmatpush3.bf16.msra.mxu1 %v16053_v63  ;;  %v16072_v35 = vpack.c.bf16 %v13604_v8, %v13599_v4  ;;  %v16073_v63 = vpack.c.bf16 %v13614_v28, %v13609_v33 }
 0x582   : > { %10648 = vmatprep.subr.bf16.mxu0 %v16054_v58  ;;  %10828 = vmatprep.subr.bf16.mxu1 %v16047_v0  ;;  %v16074_v58 = vpack.c.bf16 %v13624_v14, %v13619_v26 }
 0x585   : > { %10650 = vmatpush1.bf16.msra.mxu0 %v16055_v53  ;;  %10830 = vmatpush3.bf16.msra.mxu1 %v16056_v55  ;;  %v16075_v53 = vpack.c.bf16 %v13634_v22, %v13629_v9  ;;  %v16076_v55 = vpack.c.bf16 %v13644_v57, %v13639_v24 }
 0x586   : > { %10652 = vmatprep.subr.bf16.mxu0 %v16057_v47  ;;  %10831 = vmatprep.subr.bf16.mxu1 %v16047_v0  ;;  %v16077_v47 = vpack.c.bf16 %v13654_v20, %v13649_v1 }
 0x589   : > { %10654 = vmatpush1.bf16.msra.mxu0 %v16058_v36  ;;  %10833 = vmatpush3.bf16.msra.mxu1 %v16059_v17  ;;  %v16078_v36 = vpack.c.bf16 %v13664_v37, %v13659_v31  ;;  %v16079_v17 = vpack.c.bf16 %v13674_v45, %v13669_v19 }
 0x58a   : > { %10656 = vmatprep.subr.bf16.mxu0 %v16060_v13  ;;  %10834 = vmatprep.subr.bf16.mxu1 %v16047_v0  ;;  %v16080_v13 = vpack.c.bf16 %v16025_v39, %v16024_v54 }
 0x58d   : > { %10658 = vmatpush1.bf16.msra.mxu0 %v16061_v49  ;;  %10836 = vmatpush3.bf16.msra.mxu1 %v16062_v42  ;;  %v16081_v49 = vpack.c.bf16 %v13694_v10, %v13689_v3  ;;  %v16082_v42 = vpack.c.bf16 %v13700_v21, %v13697_v18 }
 0x58e   : > { %10660 = vmatprep.subr.bf16.mxu0 %v16063_v15  ;;  %10837 = vmatprep.subr.bf16.mxu1 %v16047_v0  ;;  %v16083_v15 = vpack.c.bf16 %v13704_v50, %v13702_v41 }
 0x591   : > { %10662 = vmatpush1.bf16.msra.mxu0 %v16064_v52  ;;  %10839 = vmatpush3.bf16.msra.mxu1 %v13978_v32  ;;  %v16068_v32 = vpack.c.bf16 %v16036_v51, %v13557_v25  ;;  %v16084_v52 = vpack.c.bf16 %v13709_v59, %v13707_v6 }
 0x592   : > { %10664 = vmatprep.subr.bf16.mxu0 %v13986_v60  ;;  %10840 = vmatprep.subr.bf16.mxu1 %v16047_v0  ;;  %v16069_v60 = vpack.c.bf16 %v13572_v5, %v16037_v56 }
 0x595   : > { %10666 = vmatpush1.bf16.msra.mxu0 %v13996_v46  ;;  %10842 = vmatpush3.bf16.msra.mxu1 %v14004_v40  ;;  %v16070_v46 = vpack.c.bf16 %v13583_v7, %v16038_v61  ;;  %v16071_v40 = vpack.c.bf16 %v13593_v2, %v13588_v44 }
 0x596   : > { %10668 = vmatprep.subr.bf16.mxu0 %v16067_v16  ;;  %10843 = vmatprep.subr.bf16.mxu1 %v16047_v0  ;;  %v16085_v16 = vpack.c.bf16 %v13713_v11, %v13711_v38 }
 0x598   : > { %4864 = vmatmul.mubr.f32.vlgmr.msra.gmra.mrb[4].mxu0 %v14045_v34  ;;  %9411 = vmatmul.mubr.f32.vlgmr.msra.gmra.mrb[30].mxu1 %v14045_v34 }
 0x599   : > { %10670 = vmatpush1.bf16.msra.mxu0 %v16068_v32  ;;  %10845 = vmatpush3.bf16.msra.mxu1 %v16069_v60  ;;  %v16086_v32 = vpack.c.bf16 %v13719_v27, %v13717_v48  ;;  %v16087_v60 = vld [vmem:[#allocation55_spill] sm:$0xff] }
 0x59a   : > { %10672 = vmatprep.subr.bf16.mxu0 %v16070_v46  ;;  %10846 = vmatprep.subr.bf16.mxu1 %v16047_v0  ;;  %v16088_v46 = vld [vmem:[#allocation54_spill] sm:$0xff] }
 0x59b   : > { %4998 = vmatprep.mubr.f32.mxu0 %v16048_v43  ;;  %9445 = vmatprep.mubr.msk.f32.mxu1 %vm11841_vm11, %v16048_v43 }
 0x59d   : > { %10674 = vmatpush1.bf16.msra.mxu0 %v16071_v40  ;;  %10848 = vmatpush3.bf16.msra.mxu1 %v16072_v35  ;;  %v16089_v40 = vpack.c.bf16 %v16087_v60, %v16088_v46  ;;  %v16090_v35 = vld [vmem:[#allocation58_spill] sm:$0xff] }
 0x59e   : > { %10676 = vmatprep.subr.bf16.mxu0 %v16073_v63  ;;  %10849 = vmatprep.subr.bf16.mxu1 %v16047_v0  ;;  %v16091_v63 = vld [vmem:[#allocation57_spill] sm:$0xff] }
 0x5a1   : > { %10678 = vmatpush1.bf16.msra.mxu0 %v16074_v58  ;;  %10851 = vmatpush3.bf16.msra.mxu1 %v16075_v53  ;;  %v16092_v58 = vpack.c.bf16 %v16090_v35, %v16091_v63  ;;  %v16093_v53 = vld [vmem:[#allocation61_spill] sm:$0xff] }
 0x5a2   : > { %10680 = vmatprep.subr.bf16.mxu0 %v16076_v55  ;;  %10852 = vmatprep.subr.bf16.mxu1 %v16047_v0  ;;  %v16094_v55 = vld [vmem:[#allocation60_spill] sm:$0xff] }
 0x5a5   : > { %10682 = vmatpush1.bf16.msra.mxu0 %v16077_v47  ;;  %10854 = vmatpush3.bf16.msra.mxu1 %v16078_v36  ;;  %v16095_v47 = vpack.c.bf16 %v16093_v53, %v16094_v55  ;;  %v16096_v36 = vld [vmem:[#allocation64_spill] sm:$0xff] }
 0x5a6   : > { %10684 = vmatprep.subr.bf16.mxu0 %v16079_v17  ;;  %10855 = vmatprep.subr.bf16.mxu1 %v16047_v0  ;;  %v16097_v17 = vld [vmem:[#allocation63_spill] sm:$0xff] }
 0x5a9   : > { %10686 = vmatpush1.bf16.msra.mxu0 %v16080_v13  ;;  %10857 = vmatpush3.bf16.msra.mxu1 %v16081_v49  ;;  %v16098_v13 = vpack.c.bf16 %v16096_v36, %v16097_v17  ;;  %v16099_v49 = vld [vmem:[#allocation22_spill] sm:$0xff] }
 0x5aa   : > { %10688 = vmatprep.subr.bf16.mxu0 %v16082_v42  ;;  %10858 = vmatprep.subr.bf16.mxu1 %v16047_v0  ;;  %v16100_v42 = vld [vmem:[#allocation25_spill] sm:$0xff] }
 0x5ad   : > { %10690 = vmatpush1.bf16.msra.mxu0 %v16083_v15  ;;  %10860 = vmatpush3.bf16.msra.mxu1 %v16084_v52  ;;  %v16101_v15 = vld [vmem:[#allocation29_spill] sm:$0xff]  ;;  %v16102_v52 = vld [vmem:[#allocation27_spill] sm:$0xff] }
 0x5ae   : > { %10692 = vmatprep.subr.bf16.mxu0 %v16085_v16  ;;  %10861 = vmatprep.subr.bf16.mxu1 %v16047_v0  ;;  %v16103_v16 = vld [vmem:[#allocation31_spill] sm:$0xff] }
 0x5b1   : > { %10694 = vmatpush1.bf16.msra.mxu0 %v16086_v32  ;;  %10863 = vmatpush3.bf16.msra.mxu1 %v16089_v40  ;;  %v16104_v32 = vld [vmem:[#allocation28_spill] sm:$0xff]  ;;  %v16105_v40 = vld [vmem:[#allocation37_spill] sm:$0xff] }
 0x5b2   : > { %10696 = vmatprep.subr.bf16.mxu0 %v16092_v58  ;;  %10864 = vmatprep.subr.bf16.mxu1 %v16047_v0  ;;  %v16107_v58 = vld [vmem:[#allocation30_spill] sm:$0xff] }
 0x5b5   : > { %10698 = vmatpush1.bf16.msra.mxu0 %v16095_v47  ;;  %10866 = vmatpush3.bf16.msra.mxu1 %v16098_v13  ;;  %v16108_v47 = vld [vmem:[#allocation39_spill] sm:$0xff]  ;;  %v16109_v13 = vld [vmem:[#allocation41_spill] sm:$0xff] }
 0x5b6   : > { %10700 = vmatprep.subr.bf16.mxu0 %v16099_v49  ;;  %10867 = vmatprep.subr.bf16.mxu1 %v16047_v0 }
 0x5b8   : > { %5001 = vmatmul.mubr.f32.vlgmr.msra.gmra.mrb[4].mxu0 %v14048_v30  ;;  %9446 = vmatmul.mubr.f32.vlgmr.msra.gmra.mrb[32].mxu1 %v14048_v30  ;;  %v16106_v30 = vld [vmem:[#allocation38_spill] sm:$0xff] }
 0x5b9   : > { %10702 = vmatpush1.bf16.msra.mxu0 %v16100_v42  ;;  %10869 = vmatpush3.bf16.msra.mxu1 %v16101_v15  ;;  %v16126_v15 = vand.u32 4294901760, %v16036_v51  ;;  %v16132_v51 = vand.u32 4294901760, %v13593_v2  ;;  %v16138_v2 = vand.u32 4294901760, %v13624_v14  ;;  %v16144_v14 = vand.u32 4294901760, %v13654_v20 }
 0x5ba   : > { %10704 = vmatprep.subr.bf16.mxu0 %v16102_v52  ;;  %10870 = vmatprep.subr.bf16.mxu1 %v16047_v0  ;;  %v16111_v52 = vld [vmem:[#allocation43_spill] sm:$0xff]  ;;  %v16150_v20 = vand.u32 4294901760, %v16025_v39  ;;  %v16156_v39 = vand.u32 4294901760, %v13704_v50  ;;  %v16162_v50 = vand.u32 4294901760, %v13719_v27  ;;  %v16168_v27 = vand.u32 4294901760, %v16093_v53 }
 0x5bb   : > { %5103 = vmatprep.mubr.f32.mxu0 %v16048_v43  ;;  %9480 = vmatprep.mubr.msk.f32.mxu1 %vm11841_vm11, %v16048_v43  ;;  %v16173_v53 = vld [vmem:[#allocation27_spill] sm:$0xff] }
 0x5bd   : > { %10706 = vmatpush1.bf16.msra.mxu0 %v16103_v16  ;;  %10872 = vmatpush3.bf16.msra.mxu1 %v16104_v32  ;;  %v16112_v32 = vld [vmem:[#allocation44_spill] sm:$0xff]  ;;  %v16114_v16 = vld [vmem:[#allocation42_spill] sm:$0xff] }
 0x5be   : > { %10708 = vmatprep.subr.bf16.mxu0 %v16105_v40  ;;  %10873 = vmatprep.subr.bf16.mxu1 %v16047_v0  ;;  %v16113_v40 = vld [vmem:[#allocation40_spill] sm:$0xff] }
 0x5c1   : > { %10710 = vmatpush1.bf16.msra.mxu0 %v16106_v30  ;;  %10875 = vmatpush3.bf16.msra.mxu1 %v16107_v58  ;;  %v16115_v58 = vld [vmem:[#allocation45_spill] sm:$0xff]  ;;  %v16117_v30 = vld [vmem:[#allocation47_spill] sm:$0xff] }
 0x5c2   : > { %10712 = vmatprep.subr.bf16.mxu0 %v16108_v47  ;;  %10876 = vmatprep.subr.bf16.mxu1 %v16047_v0  ;;  %v16116_v47 = vld [vmem:[#allocation46_spill] sm:$0xff] }
 0x5c5   : > { %10714 = vmatpush1.bf16.msra.mxu0 %v16109_v13  ;;  %10878 = vmatpush3.bf16.msra.mxu1 %v16110_v29  ;;  %v16118_v29 = vld [vmem:[#allocation48_spill] sm:$0xff] }
 0x5c6   : > { %10716 = vmatprep.subr.bf16.mxu0 %v16111_v52  ;;  %10879 = vmatprep.subr.bf16.mxu1 %v16047_v0  ;;  %v16119_v52 = vld [vmem:[#allocation53_spill] sm:$0xff]  ;;  %v16120_v13 = vld [vmem:[#allocation56_spill] sm:$0xff] }
 0x5c9   : > { %10718 = vmatpush1.bf16.msra.mxu0 %v16112_v32  ;;  %10881 = vmatpush3.bf16.msra.mxu1 %v16113_v40  ;;  %v16122_v40 = vand.u32 4294901760, %v16065_v62  ;;  %v16129_v62 = vand.u32 4294901760, %v16038_v61  ;;  %v16136_v61 = vand.u32 4294901760, %v13614_v28  ;;  %v16141_v28 = vand.u32 4294901760, %v13639_v24 }
 0x5ca   : > { %10720 = vmatprep.subr.bf16.mxu0 %v16114_v16  ;;  %10882 = vmatprep.subr.bf16.mxu1 %v16047_v0  ;;  %v16121_v16 = vand.u32 4294901760, %v16066_v12  ;;  %v16130_v12 = vand.u32 4294901760, %v13583_v7  ;;  %v16135_v7 = vand.u32 4294901760, %v13609_v33  ;;  %v16147_v24 = vand.u32 4294901760, %v13669_v19 }
 0x5cb   : > { %v16153_v19 = vand.u32 4294901760, %v13697_v18  ;;  %v16159_v18 = vand.u32 4294901760, %v13711_v38  ;;  %v16165_v38 = vand.u32 4294901760, %v16091_v63  ;;  %v16172_v63 = vld [vmem:[#allocation29_spill] sm:$0xff] }
 0x5cc   : > { %v10731_v32 = vpack.c.bf16 %v16122_v40, %v16121_v16  ;;  %v10735_v16 = vpack.c.bf16 %v16130_v12, %v16129_v62 }
 0x5cd   : > { %10722 = vmatpush1.bf16.msra.mxu0 %v16115_v58  ;;  %10884 = vmatpush3.bf16.msra.mxu1 %v16116_v47  ;;  %v16123_v58 = vld [vmem:[#allocation59_spill] sm:$0xff]  ;;  %v16124_v47 = vld [vmem:[#allocation62_spill] sm:$0xff] }
 0x5ce   : > { %10724 = vmatprep.subr.bf16.mxu0 %v16117_v30  ;;  %10885 = vmatprep.subr.bf16.mxu1 %v16047_v0  ;;  %v16125_v30 = vand.u32 4294901760, %v13557_v25  ;;  %v16131_v25 = vand.u32 4294901760, %v13588_v44  ;;  %v16137_v44 = vand.u32 4294901760, %v13619_v26  ;;  %v16143_v26 = vand.u32 4294901760, %v13649_v1 }
 0x5cf   : > { %v16149_v1 = vand.u32 4294901760, %v16024_v54  ;;  %v16155_v54 = vand.u32 4294901760, %v13702_v41  ;;  %v16161_v41 = vand.u32 4294901760, %v13717_v48  ;;  %v16167_v48 = vand.u32 4294901760, %v16094_v55  ;;  %v6027_v55 = vld [vmem:[#allocation9 + $0x4a0] sm:$0xff] }
 0x5d0   : > { %v10745_v40 = vpack.c.bf16 %v16144_v14, %v16143_v26  ;;  %v6036_v26 = vld [vmem:[#allocation9 + $0x4e8] sm:$0xff]  ;;  %v16177_v14 = vld [vmem:[#allocation38_spill] sm:$0xff] }
 0x5d1   : > { %10726 = vmatpush1.bf16.msra.mxu0 %v16118_v29  ;;  %10887 = vmatpush3.bf16.msra.mxu1 %v16119_v52  ;;  %v10733_v29 = vpack.c.bf16 %v16126_v15, %v16125_v30  ;;  %v16127_v52 = vand.u32 4294901760, %v16037_v56  ;;  %v16133_v56 = vand.u32 4294901760, %v13599_v4  ;;  %v16134_v15 = vand.u32 4294901760, %v13604_v8 }
 0x5d2   : > { %10728 = vmatprep.subr.bf16.mxu0 %v16120_v13  ;;  %10888 = vmatprep.subr.bf16.mxu1 %v16047_v0  ;;  %v16128_v13 = vand.u32 4294901760, %v13572_v5  ;;  %v10737_v5 = vpack.c.bf16 %v16132_v51, %v16131_v25  ;;  %v10741_v4 = vpack.c.bf16 %v16138_v2, %v16137_v44  ;;  %v16139_v8 = vand.u32 4294901760, %v13629_v9  ;;  %v16175_v44 = vld [vmem:[#allocation28_spill] sm:$0xff]  ;;  %v16176_v2 = vld [vmem:[#allocation37_spill] sm:$0xff] }
 0x5d3   : > { %v16145_v9 = vand.u32 4294901760, %v13659_v31  ;;  %v10749_v62 = vpack.c.bf16 %v16150_v20, %v16149_v1  ;;  %v16151_v31 = vand.u32 4294901760, %v13689_v3  ;;  %v10753_v25 = vpack.c.bf16 %v16156_v39, %v16155_v54  ;;  %v6039_v54 = vld [vmem:[#allocation9 + $0x500] sm:$0xff]  ;;  %v6042_v39 = vld [vmem:[#allocation9 + $0x518] sm:$0xff] }
 0x5d4   : > { %v10892_v42 = vpack.c.bf16 %v16128_v13, %v16127_v52  ;;  %v10895_v52 = vpack.c.bf16 %v16134_v15, %v16133_v56  ;;  %v16157_v3 = vand.u32 4294901760, %v13707_v6  ;;  %v10757_v56 = vpack.c.bf16 %v16162_v50, %v16161_v41  ;;  %v16185_v41 = vld [vmem:[#allocation43_spill] sm:$0xff] }
 0x5d5   : > { %10730 = vmatpush1.bf16.msra.mxu0 %v16123_v58  ;;  %10890 = vmatpush3.bf16.msra.mxu1 %v16124_v47  ;;  %v16163_v6 = vand.u32 4294901760, %v16088_v46  ;;  %v16169_v46 = vand.u32 4294901760, %v16097_v17  ;;  %v6026_v17 = vld [vmem:[#allocation9 + $0x498] sm:$0xff] }
 0x5d6   : > { %10732 = vmatprep.subr.bf16.mxu0 %v10731_v32  ;;  %10891 = vmatprep.subr.bf16.mxu1 %v16047_v0 }
 0x5d8   : > { %5107 = vmatmul.mubr.f32.vlgmr.msra.gmra.mrb[4].mxu0 %v14051_v23  ;;  %9481 = vmatmul.mubr.f32.vlgmr.msra.gmra.mrb[34].mxu1 %v14051_v23  ;;  %v10739_v23 = vpack.c.bf16 %v16136_v61, %v16135_v7  ;;  %v10761_v7 = vpack.c.bf16 %v16168_v27, %v16167_v48  ;;  %v6108_v48 = vand.u32 4294901760, %v6039_v54  ;;  %v6112_v27 = vand.u32 4294901760, %v6042_v39 }
 0x5d9   : > { %10734 = vmatpush1.bf16.msra.mxu0 %v10733_v29  ;;  %10893 = vmatpush3.bf16.msra.mxu1 %v10892_v42  ;;  %v16140_v29 = vand.u32 4294901760, %v13634_v22  ;;  %v16142_v42 = vand.u32 4294901760, %v13644_v57  ;;  %v16146_v22 = vand.u32 4294901760, %v13664_v37  ;;  %v16148_v57 = vand.u32 4294901760, %v13674_v45 }
 0x5da   : > { %10736 = vmatprep.subr.bf16.mxu0 %v10735_v16  ;;  %10894 = vmatprep.subr.bf16.mxu1 %v16047_v0  ;;  %v16152_v37 = vand.u32 4294901760, %v13694_v10  ;;  %v16154_v45 = vand.u32 4294901760, %v13700_v21  ;;  %v16158_v10 = vand.u32 4294901760, %v13709_v59  ;;  %v16160_v21 = vand.u32 4294901760, %v13713_v11 }
 0x5db   : > { %5273 = vmatprep.mubr.f32.mxu0 %v16048_v43  ;;  %9515 = vmatprep.mubr.msk.f32.mxu1 %vm11841_vm11, %v16048_v43  ;;  %v10898_v33 = vpack.c.bf16 %v16140_v29, %v16139_v8  ;;  %v10743_v32 = vpack.c.bf16 %v16142_v42, %v16141_v28  ;;  %v10901_v30 = vpack.c.bf16 %v16146_v22, %v16145_v9  ;;  %v16164_v59 = vand.u32 4294901760, %v16087_v60  ;;  %v6031_v8 = vld [vmem:[#allocation9 + $0x4c0] sm:$0xff] }
 0x5dc   : > { %v10747_v13 = vpack.c.bf16 %v16148_v57, %v16147_v24  ;;  %v10904_v12 = vpack.c.bf16 %v16152_v37, %v16151_v31  ;;  %v10751_v16 = vpack.c.bf16 %v16154_v45, %v16153_v19  ;;  %v10907_v51 = vpack.c.bf16 %v16158_v10, %v16157_v3  ;;  %v6035_v24 = vld [vmem:[#allocation9 + $0x4e0] sm:$0xff]  ;;  %v16179_v57 = vld [vmem:[#allocation39_spill] sm:$0xff]  ;;  %v6037_v37 = vld [vmem:[#allocation9 + $0x4f0] sm:$0xff] }
 0x5dd   : > { %10738 = vmatpush1.bf16.msra.mxu0 %v10737_v5  ;;  %10896 = vmatpush3.bf16.msra.mxu1 %v10895_v52  ;;  %v10755_v5 = vpack.c.bf16 %v16160_v21, %v16159_v18  ;;  %v10910_v15 = vpack.c.bf16 %v16164_v59, %v16163_v6  ;;  %v16166_v11 = vand.u32 4294901760, %v16090_v35  ;;  %v16170_v60 = vand.u32 4294901760, %v16096_v36  ;;  %v16171_v35 = vld [vmem:[#allocation25_spill] sm:$0xff]  ;;  %v6030_v36 = vld [vmem:[#allocation9 + $0x4b8] sm:$0xff]  ;;  %v16183_v3 = vld [vmem:[#allocation34_spill] sm:$0xff] }
 0x5de   : > { %10740 = vmatprep.subr.bf16.mxu0 %v10739_v23  ;;  %10897 = vmatprep.subr.bf16.mxu1 %v16047_v0  ;;  %v16174_v23 = vld [vmem:[#allocation31_spill] sm:$0xff]  ;;  %v6092_v29 = vand.u32 4294901760, %v6027_v55  ;;  %v6094_v28 = vand.u32 4294901760, %v6026_v17  ;;  %v6951_v22 = vand.u32 4294901760, %v6031_v8  ;;  %v6957_v59 = vand.u32 4294901760, %v6037_v37 }
 0x5df   : > { %v10759_v52 = vpack.c.bf16 %v16166_v11, %v16165_v38  ;;  %v10913_v61 = vpack.c.bf16 %v16170_v60, %v16169_v46  ;;  %v6034_v31 = vld [vmem:[#allocation9 + $0x4d8] sm:$0xff]  ;;  %v6043_v38 = vld [vmem:[#allocation9 + $0x520] sm:$0xff] }
 0x5e0   : > { %v14348_v10 = vsub.f32 %v6026_v17, %v6094_v28  ;;  %v6038_v21 = vld [vmem:[#allocation9 + $0x4f8] sm:$0xff]  ;;  %v6954_v6 = vand.u32 4294901760, %v6034_v31 }
 0x5e1   : > { %10742 = vmatpush1.bf16.msra.mxu0 %v10741_v4  ;;  %10899 = vmatpush3.bf16.msra.mxu1 %v10898_v33  ;;  %v6028_v4 = vld [vmem:[#allocation9 + $0x4a8] sm:$0xff]  ;;  %v6096_v33 = vand.u32 4294901760, %v6030_v36  ;;  %v6110_v60 = vand.u32 4294901760, %v6038_v21 }
 0x5e2   : > { %10744 = vmatprep.subr.bf16.mxu0 %v10743_v32  ;;  %10900 = vmatprep.subr.bf16.mxu1 %v16047_v0  ;;  %v6033_v32 = vld [vmem:[#allocation9 + $0x4d0] sm:$0xff]  ;;  %v6948_v9 = vand.u32 4294901760, %v6028_v4 }
 0x5e3   : > { %v6100_v20 = vand.u32 4294901760, %v6033_v32  ;;  %v14344_v19 = vsub.f32 %v6030_v36, %v6096_v33 }
 0x5e4   : > { %v14352_v18 = vpack.c.bf16 %v6951_v22, %v6948_v9  ;;  %v14356_v50 = vsub.f32 %v6028_v4, %v6948_v9  ;;  %v16195_v4 = vld [vmem:[#allocation42_spill] sm:$0xff]  ;;  %v14386_v9 = vsub.f32 %v6042_v39, %v6112_v27  ;;  %v16207_v39 = vld [vmem:[#allocation47_spill] sm:$0xff] }
 0x5e5   : > { %10746 = vmatpush1.bf16.msra.mxu0 %v10745_v40  ;;  %10902 = vmatpush3.bf16.msra.mxu1 %v10901_v30  ;;  %v16178_v40 = vld [vmem:[#allocation30_spill] sm:$0xff]  ;;  %v6032_v30 = vld [vmem:[#allocation9 + $0x4c8] sm:$0xff] }
 0x5e6   : > { %10748 = vmatprep.subr.bf16.mxu0 %v10747_v13  ;;  %10903 = vmatprep.subr.bf16.mxu1 %v16047_v0  ;;  %v14338_v13 = vpack.c.bf16 %v6096_v33, %v6092_v29  ;;  %v6102_v45 = vand.u32 4294901760, %v6032_v30  ;;  %16184 = vst [vmem:[#allocation21_spill] sm:$0xff] %v14352_v18  ;;  %v14380_v33 = vsub.f32 %v6037_v37, %v6957_v59  ;;  %16200 = vst [vmem:[#allocation71_spill] sm:$0xff] %v14386_v9  ;;  %v6066_v9 = vld [vmem:[#allocation9 + $0x5d8] sm:$0xff] }
 0x5e7   : > { %v14392_v37 = vsub.f32 %v6038_v21, %v6110_v60 }
 0x5e8   : > { %16180 = vst [vmem:[#allocation50_spill] sm:$0xff] %v14338_v13  ;;  %v14370_v36 = vsub.f32 %v6032_v30, %v6102_v45  ;;  %16198 = vst [vmem:[#allocation69_spill] sm:$0xff] %v14380_v33 }
 0x5e9   : > { %10750 = vmatpush1.bf16.msra.mxu0 %v10749_v62  ;;  %10905 = vmatpush3.bf16.msra.mxu1 %v10904_v12  ;;  %v6104_v62 = vand.u32 4294901760, %v6036_v26  ;;  %v14342_v12 = vsub.f32 %v6027_v55, %v6092_v29  ;;  %v16192_v55 = vld [vmem:[#allocation40_spill] sm:$0xff]  ;;  %v14378_v29 = vsub.f32 %v6034_v31, %v6954_v6  ;;  %v16203_v31 = vld [vmem:[#allocation46_spill] sm:$0xff]  ;;  %16204 = vst [vmem:[#allocation52_spill] sm:$0xff] %v14392_v37 }
 0x5ea   : > { %10752 = vmatprep.subr.bf16.mxu0 %v10751_v16  ;;  %10906 = vmatprep.subr.bf16.mxu1 %v16047_v0  ;;  %v6106_v16 = vand.u32 4294901760, %v6035_v24  ;;  %16193 = vst [vmem:[#allocation65_spill] sm:$0xff] %v14370_v36  ;;  %v6063_v37 = vld [vmem:[#allocation9 + $0x5c0] sm:$0xff] }
 0x5eb   : > { %v14360_v11 = vpack.c.bf16 %v6104_v62, %v6100_v20  ;;  %16197 = vst [vmem:[#allocation68_spill] sm:$0xff] %v14378_v29 }
 0x5ec   : > { %v14366_v46 = vpack.c.bf16 %v6106_v16, %v6102_v45  ;;  %v14372_v17 = vsub.f32 %v6035_v24, %v6106_v16 }
 0x5ed   : > { %10754 = vmatpush1.bf16.msra.mxu0 %v10753_v25  ;;  %10908 = vmatpush3.bf16.msra.mxu1 %v10907_v51  ;;  %v16182_v25 = vld [vmem:[#allocation41_spill] sm:$0xff]  ;;  %16187 = vst [vmem:[#allocation23_spill] sm:$0xff] %v14360_v11 }
 0x5ee   : > { %10756 = vmatprep.subr.bf16.mxu0 %v10755_v5  ;;  %10909 = vmatprep.subr.bf16.mxu1 %v16047_v0  ;;  %v6041_v5 = vld [vmem:[#allocation9 + $0x510] sm:$0xff]  ;;  %16190 = vst [vmem:[#allocation33_spill] sm:$0xff] %v14366_v46  ;;  %16194 = vst [vmem:[#allocation66_spill] sm:$0xff] %v14372_v17 }
 0x5f1   : > { %10758 = vmatpush1.bf16.msra.mxu0 %v10757_v56  ;;  %10911 = vmatpush3.bf16.msra.mxu1 %v10910_v15  ;;  %v14358_v56 = vsub.f32 %v6031_v8, %v6951_v22  ;;  %v6040_v15 = vld [vmem:[#allocation9 + $0x508] sm:$0xff]  ;;  %v14376_v8 = vpack.c.bf16 %v6957_v59, %v6954_v6 }
 0x5f2   : > { %10760 = vmatprep.subr.bf16.mxu0 %v10759_v52  ;;  %10912 = vmatprep.subr.bf16.mxu1 %v16047_v0  ;;  %v14362_v52 = vsub.f32 %v6033_v32, %v6100_v20  ;;  %v6054_v20 = vld [vmem:[#allocation9 + $0x578] sm:$0xff] }
 0x5f3   : > { %16186 = vst [vmem:[#allocation35_spill] sm:$0xff] %v14358_v56  ;;  %16196 = vst [vmem:[#allocation67_spill] sm:$0xff] %v14376_v8 }
 0x5f4   : > { %16188 = vst [vmem:[#allocation26_spill] sm:$0xff] %v14362_v52 }
 0x5f5   : > { %10762 = vmatpush1.bf16.msra.mxu0 %v10761_v7  ;;  %10914 = vmatpush3.bf16.msra.mxu1 %v10913_v61  ;;  %v14364_v7 = vsub.f32 %v6036_v26, %v6104_v62  ;;  %v6114_v61 = vand.u32 4294901760, %v6041_v5  ;;  %v16202_v62 = vld [vmem:[#allocation45_spill] sm:$0xff] }
 0x5f6   : > { %10764 = vmatprep.subr.bf16.mxu0 %v16099_v49  ;;  %10915 = vmatprep.subr.bf16.mxu1 %v16047_v0  ;;  %v6029_v49 = vld [vmem:[#allocation9 + $0x4b0] sm:$0xff] }
 0x5f7   : > { %v6098_v42 = vand.u32 4294901760, %v6029_v49  ;;  %16189 = vst [vmem:[#allocation36_spill] sm:$0xff] %v14364_v7  ;;  %v14388_v22 = vpack.c.bf16 %v6114_v61, %v6110_v60  ;;  %v14394_v45 = vsub.f32 %v6041_v5, %v6114_v61  ;;  %v6128_v61 = vand.u32 4294901760, %v6054_v20 }
 0x5f8   : > { %5275 = vmatmul.mubr.f32.vlgmr.msra.gmra.mrb[4].mxu0 %v14045_v34  ;;  %9516 = vmatmul.mubr.f32.vlgmr.msra.gmra.mrb[36].mxu1 %v14045_v34 }
 0x5f9   : > { %10766 = vmatpush1.bf16.msra.mxu0 %v16171_v35  ;;  %10917 = vmatpush3.bf16.msra.mxu1 %v16172_v63  ;;  %v14340_v1 = vpack.c.bf16 %v6098_v42, %v6094_v28  ;;  %v14350_v51 = vsub.f32 %v6029_v49, %v6098_v42  ;;  %v6045_v35 = vld [vmem:[#allocation9 + $0x530] sm:$0xff]  ;;  %v6048_v63 = vld [vmem:[#allocation9 + $0x548] sm:$0xff]  ;;  %v6960_v49 = vand.u32 4294901760, %v6040_v15  ;;  %v14382_v28 = vpack.c.bf16 %v6112_v27, %v6108_v48  ;;  %v6055_v27 = vld [vmem:[#allocation9 + $0x580] sm:$0xff] }
 0x5fa   : > { %10768 = vmatprep.subr.bf16.mxu0 %v16173_v53  ;;  %10918 = vmatprep.subr.bf16.mxu1 %v16047_v0  ;;  %v16191_v53 = vld [vmem:[#allocation44_spill] sm:$0xff]  ;;  %v14384_v42 = vsub.f32 %v6039_v54, %v6108_v48  ;;  %v6116_v32 = vand.u32 4294901760, %v6045_v35  ;;  %v6120_v26 = vand.u32 4294901760, %v6048_v63  ;;  %16201 = vst [vmem:[#allocation72_spill] sm:$0xff] %v14388_v22  ;;  %16205 = vst [vmem:[#allocation49_spill] sm:$0xff] %v14394_v45  ;;  %v6050_v54 = vld [vmem:[#allocation9 + $0x558] sm:$0xff] }
 0x5fb   : > { %5377 = vmatprep.mubr.f32.mxu0 %v16048_v43  ;;  %9550 = vmatprep.mubr.msk.f32.mxu1 %vm11841_vm11, %v16048_v43  ;;  %16181 = vst [vmem:[#allocation51_spill] sm:$0xff] %v14340_v1  ;;  %16199 = vst [vmem:[#allocation70_spill] sm:$0xff] %v14382_v28  ;;  %v6052_v48 = vld [vmem:[#allocation9 + $0x568] sm:$0xff] }
 0x5fc   : > { %v14404_v21 = vpack.c.bf16 %v6120_v26, %v6116_v32  ;;  %v14406_v5 = vsub.f32 %v6045_v35, %v6116_v32  ;;  %v6972_v35 = vand.u32 4294901760, %v6052_v48  ;;  %v6975_v32 = vand.u32 4294901760, %v6055_v27 }
 0x5fd   : > { %10770 = vmatpush1.bf16.msra.mxu0 %v16174_v23  ;;  %10920 = vmatpush3.bf16.msra.mxu1 %v16175_v44  ;;  %v6963_v23 = vand.u32 4294901760, %v6043_v38  ;;  %v6044_v44 = vld [vmem:[#allocation9 + $0x528] sm:$0xff] }
 0x5fe   : > { %10772 = vmatprep.subr.bf16.mxu0 %v16176_v2  ;;  %10921 = vmatprep.subr.bf16.mxu1 %v16047_v0  ;;  %v6047_v2 = vld [vmem:[#allocation9 + $0x540] sm:$0xff]  ;;  %v6118_v30 = vand.u32 4294901760, %v6044_v44  ;;  %16210 = vst [vmem:[#allocation76_spill] sm:$0xff] %v14404_v21  ;;  %16211 = vst [vmem:[#allocation77_spill] sm:$0xff] %v14406_v5  ;;  %v6056_v5 = vld [vmem:[#allocation9 + $0x588] sm:$0xff] }
 0x5ff   : > { %v6122_v24 = vand.u32 4294901760, %v6047_v2  ;;  %v14396_v16 = vpack.c.bf16 %v6963_v23, %v6960_v49 }
 0x601   : > { %10774 = vmatpush1.bf16.msra.mxu0 %v16177_v14  ;;  %10923 = vmatpush3.bf16.msra.mxu1 %v16178_v40  ;;  %v6046_v14 = vld [vmem:[#allocation9 + $0x538] sm:$0xff]  ;;  %v6049_v40 = vld [vmem:[#allocation9 + $0x550] sm:$0xff]  ;;  %16206 = vst [vmem:[#allocation73_spill] sm:$0xff] %v14396_v16 }
 0x602   : > { %10776 = vmatprep.subr.bf16.mxu0 %v16179_v57  ;;  %10924 = vmatprep.subr.bf16.mxu1 %v16047_v0  ;;  %v6051_v57 = vld [vmem:[#allocation9 + $0x560] sm:$0xff]  ;;  %v6966_v6 = vand.u32 4294901760, %v6046_v14  ;;  %v6969_v59 = vand.u32 4294901760, %v6049_v40 }
 0x603   : > { %v6124_v60 = vand.u32 4294901760, %v6051_v57 }
 0x605   : > { %10778 = vmatpush1.bf16.msra.mxu0 %v16182_v25  ;;  %10926 = vmatpush3.bf16.msra.mxu1 %v16183_v3  ;;  %v6053_v25 = vld [vmem:[#allocation9 + $0x570] sm:$0xff]  ;;  %v14400_v3 = vsub.f32 %v6040_v15, %v6960_v49  ;;  %v6060_v49 = vld [vmem:[#allocation9 + $0x5a8] sm:$0xff] }
 0x606   : > { %10780 = vmatprep.subr.bf16.mxu0 %v16185_v41  ;;  %10927 = vmatprep.subr.bf16.mxu1 %v16047_v0  ;;  %v14402_v41 = vsub.f32 %v6043_v38, %v6963_v23  ;;  %v6057_v15 = vld [vmem:[#allocation9 + $0x590] sm:$0xff]  ;;  %v16214_v38 = vld [vmem:[#allocation48_spill] sm:$0xff]  ;;  %v16215_v23 = vld [vmem:[#allocation53_spill] sm:$0xff] }
 0x607   : > { %16208 = vst [vmem:[#allocation74_spill] sm:$0xff] %v14400_v3  ;;  %v14424_v3 = vsub.f32 %v6049_v40, %v6969_v59 }
 0x608   : > { %16209 = vst [vmem:[#allocation75_spill] sm:$0xff] %v14402_v41  ;;  %v6059_v41 = vld [vmem:[#allocation9 + $0x5a0] sm:$0xff] }
 0x609   : > { %10782 = vmatpush1.bf16.msra.mxu0 %v16191_v53  ;;  %10929 = vmatpush3.bf16.msra.mxu1 %v16192_v55  ;;  %v14408_v53 = vsub.f32 %v6048_v63, %v6120_v26  ;;  %v14410_v55 = vpack.c.bf16 %v6122_v24, %v6118_v30  ;;  %v16218_v63 = vld [vmem:[#allocation56_spill] sm:$0xff]  ;;  %v14420_v26 = vpack.c.bf16 %v6969_v59, %v6966_v6  ;;  %v6138_v45 = vand.u32 4294901760, %v6059_v41  ;;  %v6065_v59 = vld [vmem:[#allocation9 + $0x5d0] sm:$0xff] }
 0x60a   : > { %10784 = vmatprep.subr.bf16.mxu0 %v16195_v4  ;;  %10930 = vmatprep.subr.bf16.mxu1 %v16047_v0  ;;  %v6126_v4 = vand.u32 4294901760, %v6050_v54  ;;  %16221 = vst [vmem:[#allocation54_spill] sm:$0xff] %v14424_v3 }
 0x60b   : > { %16212 = vst [vmem:[#allocation78_spill] sm:$0xff] %v14408_v53  ;;  %16213 = vst [vmem:[#allocation79_spill] sm:$0xff] %v14410_v55  ;;  %v14422_v53 = vsub.f32 %v6046_v14, %v6966_v6  ;;  %v6062_v6 = vld [vmem:[#allocation9 + $0x5b8] sm:$0xff] }
 0x60c   : > { %16219 = vst [vmem:[#allocation24_spill] sm:$0xff] %v14420_v26  ;;  %v14436_v14 = vsub.f32 %v6050_v54, %v6126_v4 }
 0x60d   : > { %10786 = vmatpush1.bf16.msra.mxu0 %v16202_v62  ;;  %10932 = vmatpush3.bf16.msra.mxu1 %v16203_v31  ;;  %v6130_v62 = vand.u32 4294901760, %v6053_v25  ;;  %v14414_v31 = vsub.f32 %v6044_v44, %v6118_v30  ;;  %16220 = vst [vmem:[#allocation55_spill] sm:$0xff] %v14422_v53  ;;  %v14428_v44 = vsub.f32 %v6051_v57, %v6124_v60  ;;  %v6136_v30 = vand.u32 4294901760, %v6060_v49 }
 0x60e   : > { %10788 = vmatprep.subr.bf16.mxu0 %v16207_v39  ;;  %10933 = vmatprep.subr.bf16.mxu1 %v16047_v0  ;;  %v14416_v39 = vsub.f32 %v6047_v2, %v6122_v24  ;;  %v6132_v2 = vand.u32 4294901760, %v6057_v15  ;;  %v6058_v24 = vld [vmem:[#allocation9 + $0x598] sm:$0xff]  ;;  %16226 = vst [vmem:[#allocation64_spill] sm:$0xff] %v14436_v14  ;;  %v14440_v57 = vpack.c.bf16 %v6975_v32, %v6972_v35  ;;  %v6072_v14 = vld [vmem:[#allocation9 + $0x608] sm:$0xff] }
 0x60f   : > { %16216 = vst [vmem:[#allocation80_spill] sm:$0xff] %v14414_v31  ;;  %16223 = vst [vmem:[#allocation57_spill] sm:$0xff] %v14428_v44  ;;  %v14432_v31 = vpack.c.bf16 %v6130_v62, %v6126_v4  ;;  %v14438_v40 = vsub.f32 %v6053_v25, %v6130_v62  ;;  %v6140_v4 = vand.u32 4294901760, %v6063_v37  ;;  %v6144_v62 = vand.u32 4294901760, %v6066_v9 }
 0x610   : > { %16217 = vst [vmem:[#allocation32_spill] sm:$0xff] %v14416_v39  ;;  %v14430_v39 = vsub.f32 %v6054_v20, %v6128_v61  ;;  %16228 = vst [vmem:[#allocation22_spill] sm:$0xff] %v14440_v57  ;;  %v14444_v20 = vsub.f32 %v6052_v48, %v6972_v35  ;;  %v14448_v54 = vpack.c.bf16 %v6136_v30, %v6132_v2  ;;  %v6142_v35 = vand.u32 4294901760, %v6062_v6 }
 0x611   : > { %10790 = vmatpush1.bf16.msra.mxu0 %v16214_v38  ;;  %10935 = vmatpush3.bf16.msra.mxu1 %v16215_v23  ;;  %v14426_v38 = vpack.c.bf16 %v6128_v61, %v6124_v60  ;;  %v6061_v23 = vld [vmem:[#allocation9 + $0x5b0] sm:$0xff]  ;;  %16225 = vst [vmem:[#allocation60_spill] sm:$0xff] %v14432_v31  ;;  %16227 = vst [vmem:[#allocation63_spill] sm:$0xff] %v14438_v40  ;;  %v14446_v60 = vsub.f32 %v6055_v27, %v6975_v32  ;;  %v6978_v61 = vand.u32 4294901760, %v6058_v24 }
 0x612   : > { %10792 = vmatprep.subr.bf16.mxu0 %v16218_v63  ;;  %10936 = vmatprep.subr.bf16.mxu1 %v16047_v0  ;;  %16224 = vst [vmem:[#allocation61_spill] sm:$0xff] %v14430_v39  ;;  %v6134_v63 = vand.u32 4294901760, %v6056_v5  ;;  %16229 = vst [vmem:[#allocation59_spill] sm:$0xff] %v14444_v20  ;;  %v6064_v39 = vld [vmem:[#allocation9 + $0x5c8] sm:$0xff]  ;;  %v14450_v25 = vsub.f32 %v6057_v15, %v6132_v2  ;;  %v6069_v40 = vld [vmem:[#allocation9 + $0x5f0] sm:$0xff]  ;;  %v14454_v48 = vsub.f32 %v6060_v49, %v6136_v30 }
 0x613   : > { %16222 = vst [vmem:[#allocation58_spill] sm:$0xff] %v14426_v38  ;;  %16230 = vst [vmem:[#allocation62_spill] sm:$0xff] %v14446_v60  ;;  %v6146_v32 = vand.u32 4294901760, %v6065_v59  ;;  %v14462_v2 = vsub.f32 %v6059_v41, %v6138_v45  ;;  %v14468_v49 = vsub.f32 %v6058_v24, %v6978_v61  ;;  %v6148_v30 = vand.u32 4294901760, %v6069_v40  ;;  %v6068_v20 = vld [vmem:[#allocation9 + $0x5e8] sm:$0xff] }
 0x614   : > { %16231 = vst [vmem:[#allocation25_spill] sm:$0xff] %v14448_v54  ;;  %16232 = vst [vmem:[#allocation29_spill] sm:$0xff] %v14450_v25  ;;  %v14456_v27 = vpack.c.bf16 %v6138_v45, %v6134_v63  ;;  %v14460_v15 = vsub.f32 %v6056_v5, %v6134_v63  ;;  %v6984_v25 = vand.u32 4294901760, %v6064_v39  ;;  %v14472_v5 = vpack.c.bf16 %v6144_v62, %v6140_v4 }
 0x615   : > { %10794 = vmatpush1.bf16.msra.mxu0 %v16123_v58  ;;  %10938 = vmatpush3.bf16.msra.mxu1 %v16124_v47  ;;  %v6981_v58 = vand.u32 4294901760, %v6061_v23  ;;  %v6067_v47 = vld [vmem:[#allocation9 + $0x5e0] sm:$0xff]  ;;  %16233 = vst [vmem:[#allocation27_spill] sm:$0xff] %v14454_v48  ;;  %v6152_v48 = vand.u32 4294901760, %v6072_v14  ;;  %v14474_v45 = vsub.f32 %v6063_v37, %v6140_v4  ;;  %v14481_v63 = vsub.f32 %v6066_v9, %v6144_v62 }
 0x616   : > { %10940 = vmatprep.subr.bf16.mxu0 %v14338_v13  ;;  %11131 = vmatprep.subr.bf16.mxu1 %v16047_v0  ;;  %16234 = vst [vmem:[#allocation31_spill] sm:$0xff] %v14456_v27  ;;  %v4462_v13 = vld [vmem:[#allocation2 + $0x8] sm:$0xff]  ;;  %v6987_v60 = vand.u32 4294901760, %v6067_v47  ;;  %16236 = vst [vmem:[#allocation37_spill] sm:$0xff] %v14472_v5  ;;  %v14483_v24 = vpack.c.bf16 %v6146_v32, %v6142_v35  ;;  %v14490_v37 = vsub.f32 %v6065_v59, %v6146_v32 }
 0x617   : > { %v14470_v44 = vsub.f32 %v6061_v23, %v6981_v58  ;;  %16237 = vst [vmem:[#allocation38_spill] sm:$0xff] %v14474_v45  ;;  %v14479_v41 = vand.u32 4294901760, %v4462_v13  ;;  %v6150_v4 = vand.u32 4294901760, %v6068_v20  ;;  %v14494_v45 = vld [vmem:[#allocation9 + $0x610] sm:$0xff]  ;;  %v14498_v9 = vsub.f32 %v6064_v39, %v6984_v25 }
 0x618   : > { %5379 = vmatmul.mubr.f32.vlgmr.msra.gmra.mrb[4].mxu0 %v14045_v34  ;;  %9551 = vmatmul.mubr.f32.vlgmr.msra.gmra.mrb[38].mxu1 %v14045_v34  ;;  %v14466_v34 = vpack.c.bf16 %v6981_v58, %v6978_v61  ;;  %16239 = vst [vmem:[#allocation39_spill] sm:$0xff] %v14483_v24  ;;  %v14485_v61 = vsub.f32 %v6062_v6, %v6142_v35  ;;  %v15669_v59 = vand.u32 4294901760, %v14344_v19  ;;  %v15672_v32 = vand.u32 4294901760, %v14348_v10 }
 0x619   : > { %10942 = vmatpush1.bf16.msra.mxu0 %v14340_v1  ;;  %11133 = vmatpush3.bf16.msra.mxu1 %v14352_v18  ;;  %v6071_v1 = vld [vmem:[#allocation9 + $0x600] sm:$0xff]  ;;  %16238 = vst [vmem:[#allocation30_spill] sm:$0xff] %v14479_v41  ;;  %v14492_v58 = vpack.c.bf16 %v6987_v60, %v6984_v25  ;;  %v6070_v18 = vld [vmem:[#allocation9 + $0x5f8] sm:$0xff]  ;;  %v14500_v6 = vsub.f32 %v6067_v47, %v6987_v60  ;;  %v6993_v60 = vand.u32 4294901760, %v14494_v45  ;;  %v16244_v25 = vand.u32 4294901760, %v14342_v12 }
 0x61a   : > { %10944 = vmatprep.subr.bf16.mxu0 %v14360_v11  ;;  %11134 = vmatprep.subr.bf16.mxu1 %v16047_v0  ;;  %16235 = vst [vmem:[#allocation28_spill] sm:$0xff] %v14466_v34  ;;  %v6154_v11 = vand.u32 4294901760, %v6071_v1  ;;  %v14502_v62 = vpack.c.bf16 %v6152_v48, %v6148_v30  ;;  %v14506_v35 = vsub.f32 %v4462_v13, %v14479_v41  ;;  %v6990_v39 = vand.u32 4294901760, %v6070_v18 }
 0x61b   : > { %6188 = vmatprep.mubr.f32.mxu0 %v16048_v43  ;;  %9585 = vmatprep.mubr.msk.f32.mxu1 %vm11841_vm11, %v16048_v43  ;;  %16240 = vst [vmem:[#allocation41_spill] sm:$0xff] %v14492_v58  ;;  %v14520_v13 = vsub.f32 %v6068_v20, %v6150_v4  ;;  %v6203_v23 = vsub.f32 %v14342_v12, %v16244_v25  ;;  %v16246_v25 = vand.u32 4294901760, %v14350_v51 }
 0x61c   : > { %16241 = vst [vmem:[#allocation34_spill] sm:$0xff] %v14502_v62  ;;  %16242 = vst [vmem:[#allocation43_spill] sm:$0xff] %v14506_v35  ;;  %v14518_v47 = vpack.c.bf16 %v6154_v11, %v6150_v4  ;;  %v14534_v20 = vand.u32 4294901760, %v14506_v35  ;;  %v6209_v4 = vsub.f32 %v14348_v10, %v15672_v32  ;;  %v14553_v32 = vsub.f32 %v6070_v18, %v6990_v39 }
 0x61d   : > { %10946 = vmatpush1.bf16.msra.mxu0 %v14366_v46  ;;  %11136 = vmatpush3.bf16.msra.mxu1 %v14376_v8  ;;  %v14513_v46 = vsub.f32 %v6072_v14, %v6152_v48  ;;  %v6215_v14 = vsub.f32 %v14344_v19, %v15669_v59  ;;  %v6221_v8 = vsub.f32 %v14350_v51, %v16246_v25  ;;  %v16251_v18 = vand.u32 4294901760, %v14364_v7 }
 0x61e   : > { %10948 = vmatprep.subr.bf16.mxu0 %v14382_v28  ;;  %11137 = vmatprep.subr.bf16.mxu1 %v16047_v0  ;;  %v14511_v28 = vsub.f32 %v6069_v40, %v6148_v30  ;;  %16243 = vst [vmem:[#allocation44_spill] sm:$0xff] %v14518_v47  ;;  %16245 = vst [vmem:[#allocation40_spill] sm:$0xff] %v14534_v20  ;;  %v14545_v40 = vsub.f32 %v6071_v1, %v6154_v11  ;;  %v16249_v11 = vand.u32 4294901760, %v14358_v56 }
 0x61f   : > { %v14547_v48 = vpack.c.bf16 %v6993_v60, %v6990_v39  ;;  %v6216_v1 = vand.u32 4294901760, %v6215_v14  ;;  %v6192_v39 = vsub.f32 %v14506_v35, %v14534_v20  ;;  %v6210_v41 = vand.u32 4294901760, %v6209_v4  ;;  %v16258_v35 = vld [vmem:[#allocation49_spill] sm:$0xff] }
 0x620   : > { %v6222_v25 = vand.u32 4294901760, %v6221_v8  ;;  %v16252_v14 = vand.u32 4294901760, %v14370_v36  ;;  %v16255_v4 = vand.u32 4294901760, %v14378_v29 }
 0x621   : > { %10950 = vmatpush1.bf16.msra.mxu0 %v14388_v22  ;;  %11139 = vmatpush3.bf16.msra.mxu1 %v14396_v16  ;;  %16248 = vst [vmem:[#allocation42_spill] sm:$0xff] %v14547_v48  ;;  %v6204_v22 = vand.u32 4294901760, %v6203_v23  ;;  %v16250_v16 = vand.u32 4294901760, %v14362_v52  ;;  %v6239_v23 = vsub.f32 %v14364_v7, %v16251_v18 }
 0x622   : > { %10952 = vmatprep.subr.bf16.mxu0 %v14404_v21  ;;  %11140 = vmatprep.subr.bf16.mxu1 %v16047_v0  ;;  %v16247_v21 = vand.u32 4294901760, %v14356_v50  ;;  %v7056_v8 = vsub.f32 %v14378_v29, %v16255_v4  ;;  %v14594_v29 = vpack.c.bf16 %v6222_v25, %v6210_v41  ;;  %v6193_v25 = vand.u32 4294901760, %v6192_v39 }
 0x623   : > { %v6227_v30 = vsub.f32 %v14362_v52, %v16250_v16  ;;  %v16254_v52 = vld [vmem:[#allocation71_spill] sm:$0xff]  ;;  %v10971_v4 = vpack.c.bf16 %v6216_v1, %v6204_v22 }
 0x624   : > { %v7042_v59 = vsub.f32 %v14356_v50, %v16247_v21  ;;  %v7049_v21 = vsub.f32 %v14358_v56, %v16249_v11  ;;  %v16253_v11 = vand.u32 4294901760, %v14372_v17 }
 0x625   : > { %10954 = vmatpush1.bf16.msra.mxu0 %v14410_v55  ;;  %11142 = vmatpush3.bf16.msra.mxu1 %v14420_v26  ;;  %v6233_v26 = vsub.f32 %v14370_v36, %v16252_v14  ;;  %v16257_v14 = vld [vmem:[#allocation52_spill] sm:$0xff]  ;;  %v6228_v16 = vand.u32 4294901760, %v6227_v30  ;;  %v14592_v36 = vsub.f32 %v14494_v45, %v6993_v60  ;;  %v7057_v45 = vand.u32 4294901760, %v7056_v8 }
 0x626   : > { %10956 = vmatprep.subr.bf16.mxu0 %v14426_v38  ;;  %11143 = vmatprep.subr.bf16.mxu1 %v16047_v0  ;;  %v7043_v38 = vand.u32 4294901760, %v7042_v59  ;;  %v6245_v55 = vsub.f32 %v14372_v17, %v16253_v11  ;;  %v16256_v59 = vand.u32 4294901760, %v14380_v33  ;;  %v7050_v56 = vand.u32 4294901760, %v7049_v21 }
 0x627   : > { %v6234_v20 = vand.u32 4294901760, %v6233_v26  ;;  %v16261_v11 = vand.u32 4294901760, %v14384_v42  ;;  %v16262_v21 = vand.u32 4294901760, %v16254_v52  ;;  %v16263_v41 = vand.u32 4294901760, %v16257_v14 }
 0x628   : > { %v7063_v18 = vsub.f32 %v14380_v33, %v16256_v59  ;;  %v16260_v59 = vld [vmem:[#allocation75_spill] sm:$0xff]  ;;  %v6246_v7 = vand.u32 4294901760, %v6245_v55  ;;  %v16264_v55 = vand.u32 4294901760, %v16258_v35  ;;  %v11156_v1 = vpack.c.bf16 %v7050_v56, %v7043_v38  ;;  %v16268_v56 = vld [vmem:[#allocation32_spill] sm:$0xff] }
 0x629   : > { %10958 = vmatpush1.bf16.msra.mxu0 %v14432_v31  ;;  %11145 = vmatpush3.bf16.msra.mxu1 %v14440_v57  ;;  %v6240_v31 = vand.u32 4294901760, %v6239_v23  ;;  %v16259_v57 = vld [vmem:[#allocation74_spill] sm:$0xff]  ;;  %v15715_v33 = vand.u32 4294901760, %v16260_v59  ;;  %v6263_v30 = vsub.f32 %v16254_v52, %v16262_v21  ;;  %v6257_v60 = vsub.f32 %v16257_v14, %v16263_v41 }
 0x62a   : > { %10960 = vmatprep.subr.bf16.mxu0 %v14448_v54  ;;  %11146 = vmatprep.subr.bf16.mxu1 %v16047_v0  ;;  %v15714_v17 = vand.u32 4294901760, %v16259_v57  ;;  %v6251_v54 = vsub.f32 %v14384_v42, %v16261_v11  ;;  %v7064_v22 = vand.u32 4294901760, %v7063_v18  ;;  %v6269_v26 = vsub.f32 %v16258_v35, %v16264_v55  ;;  %v16265_v11 = vld [vmem:[#allocation77_spill] sm:$0xff]  ;;  %v16266_v41 = vld [vmem:[#allocation78_spill] sm:$0xff]  ;;  %v16267_v55 = vld [vmem:[#allocation80_spill] sm:$0xff] }
 0x62b   : > { %v10975_v23 = vpack.c.bf16 %v6240_v31, %v6228_v16  ;;  %v7077_v18 = vsub.f32 %v16260_v59, %v15715_v33  ;;  %v15720_v21 = vand.u32 4294901760, %v16265_v11  ;;  %v6264_v39 = vand.u32 4294901760, %v6263_v30  ;;  %v16270_v30 = vld [vmem:[#allocation61_spill] sm:$0xff] }
 0x62c   : > { %v7070_v8 = vsub.f32 %v16259_v57, %v15714_v17  ;;  %v6252_v35 = vand.u32 4294901760, %v6251_v54  ;;  %v11159_v38 = vpack.c.bf16 %v7064_v22, %v7057_v45  ;;  %v6258_v16 = vand.u32 4294901760, %v6257_v60  ;;  %v16269_v54 = vld [vmem:[#allocation57_spill] sm:$0xff] }
 0x62d   : > { %10962 = vmatpush1.bf16.msra.mxu0 %v14456_v27  ;;  %11148 = vmatpush3.bf16.msra.mxu1 %v14466_v34  ;;  %v6270_v17 = vand.u32 4294901760, %v6269_v26  ;;  %v7078_v34 = vand.u32 4294901760, %v7077_v18  ;;  %v6275_v45 = vsub.f32 %v16265_v11, %v15720_v21  ;;  %v16271_v22 = vand.u32 4294901760, %v16266_v41  ;;  %v16275_v18 = vld [vmem:[#allocation63_spill] sm:$0xff] }
 0x62e   : > { %10964 = vmatprep.subr.bf16.mxu0 %v14472_v5  ;;  %11149 = vmatprep.subr.bf16.mxu1 %v16047_v0  ;;  %v14622_v5 = vpack.c.bf16 %v6246_v7, %v6234_v20  ;;  %v7071_v27 = vand.u32 4294901760, %v7070_v8  ;;  %v16272_v26 = vand.u32 4294901760, %v16267_v55  ;;  %v10979_v8 = vpack.c.bf16 %v6264_v39, %v6252_v35  ;;  %v16278_v35 = vld [vmem:[#allocation62_spill] sm:$0xff] }
 0x62f   : > { %v6287_v60 = vsub.f32 %v16266_v41, %v16271_v22  ;;  %v16273_v7 = vand.u32 4294901760, %v16268_v56  ;;  %v10981_v21 = vpack.c.bf16 %v6270_v17, %v6258_v16  ;;  %v16276_v22 = vand.u32 4294901760, %v14422_v53  ;;  %v16277_v41 = vld [vmem:[#allocation59_spill] sm:$0xff] }
 0x630   : > { %v6281_v33 = vsub.f32 %v16267_v55, %v16272_v26  ;;  %v16280_v31 = vand.u32 4294901760, %v16269_v54  ;;  %v16281_v17 = vand.u32 4294901760, %v16270_v30 }
 0x631   : > { %10966 = vmatpush1.bf16.msra.mxu0 %v14483_v24  ;;  %11151 = vmatpush3.bf16.msra.mxu1 %v14492_v58  ;;  %v6293_v20 = vsub.f32 %v16268_v56, %v16273_v7  ;;  %v7084_v24 = vsub.f32 %v14422_v53, %v16276_v22  ;;  %v16279_v7 = vand.u32 4294901760, %v14424_v3  ;;  %v11162_v22 = vpack.c.bf16 %v7078_v34, %v7071_v27 }
 0x632   : > { %10968 = vmatprep.subr.bf16.mxu0 %v14502_v62  ;;  %11152 = vmatprep.subr.bf16.mxu1 %v16047_v0  ;;  %v16274_v62 = vld [vmem:[#allocation64_spill] sm:$0xff]  ;;  %v6311_v16 = vsub.f32 %v16270_v30, %v16281_v17  ;;  %v6288_v26 = vand.u32 4294901760, %v6287_v60  ;;  %v6282_v53 = vand.u32 4294901760, %v6281_v33  ;;  %v16285_v27 = vand.u32 4294901760, %v16277_v41 }
 0x633   : > { %v7091_v58 = vsub.f32 %v14424_v3, %v16279_v7  ;;  %v16282_v39 = vand.u32 4294901760, %v16274_v62  ;;  %v16283_v7 = vand.u32 4294901760, %v16275_v18  ;;  %v16286_v34 = vand.u32 4294901760, %v16278_v35 }
 0x634   : > { %v7098_v33 = vsub.f32 %v16277_v41, %v16285_v27  ;;  %v15737_v27 = vand.u32 4294901760, %v14468_v49 }
 0x635   : > { %10970 = vmatpush1.bf16.msra.mxu0 %v14518_v47  ;;  %11154 = vmatpush3.bf16.msra.mxu1 %v14547_v48  ;;  %v6299_v48 = vsub.f32 %v16269_v54, %v16280_v31  ;;  %v6276_v47 = vand.u32 4294901760, %v6275_v45  ;;  %v6305_v56 = vsub.f32 %v16274_v62, %v16282_v39  ;;  %v6317_v3 = vsub.f32 %v16275_v18, %v16283_v7  ;;  %v16284_v31 = vld [vmem:[#allocation29_spill] sm:$0xff] }
 0x636   : > { %10972 = vmatprep.subr.bf16.mxu0 %v10971_v4  ;;  %11155 = vmatprep.subr.bf16.mxu1 %v16047_v0  ;;  %v6294_v4 = vand.u32 4294901760, %v6293_v20  ;;  %v16287_v20 = vld [vmem:[#allocation27_spill] sm:$0xff]  ;;  %v7085_v39 = vand.u32 4294901760, %v7084_v24  ;;  %v7092_v17 = vand.u32 4294901760, %v7091_v58  ;;  %v15735_v54 = vand.u32 4294901760, %v14462_v2 }
 0x637   : > { %v15736_v45 = vand.u32 4294901760, %v16287_v20  ;;  %v6300_v7 = vand.u32 4294901760, %v6299_v48  ;;  %v6318_v60 = vand.u32 4294901760, %v6317_v3  ;;  %v16288_v24 = vand.u32 4294901760, %v16284_v31 }
 0x638   : > { %6194 = vmatmul.mubr.f32.vlgmr.msra.gmra.mrb[4].mxu0 %v6193_v25  ;;  %9586 = vmatmul.mubr.f32.vlgmr.msra.gmra.mrb[40].mxu1 %v6193_v25  ;;  %v7105_v25 = vsub.f32 %v16278_v35, %v16286_v34  ;;  %v10985_v34 = vpack.c.bf16 %v6294_v4, %v6282_v53  ;;  %v11165_v3 = vpack.c.bf16 %v7092_v17, %v7085_v39  ;;  %v15739_v17 = vand.u32 4294901760, %v14490_v37 }
 0x639   : > { %10974 = vmatpush1.bf16.msra.mxu0 %v14594_v29  ;;  %11157 = vmatpush3.bf16.msra.mxu1 %v11156_v1  ;;  %v6312_v29 = vand.u32 4294901760, %v6311_v16  ;;  %v10983_v1 = vpack.c.bf16 %v6288_v26, %v6276_v47  ;;  %v6323_v58 = vsub.f32 %v16284_v31, %v16288_v24  ;;  %v7099_v47 = vand.u32 4294901760, %v7098_v33 }
 0x63a   : > { %10976 = vmatprep.subr.bf16.mxu0 %v10975_v23  ;;  %11158 = vmatprep.subr.bf16.mxu1 %v16047_v0  ;;  %v6306_v23 = vand.u32 4294901760, %v6305_v56  ;;  %v7106_v48 = vand.u32 4294901760, %v7105_v25  ;;  %v6335_v26 = vsub.f32 %v16287_v20, %v15736_v45  ;;  %v16289_v16 = vand.u32 4294901760, %v14460_v15  ;;  %v16290_v56 = vld [vmem:[#allocation38_spill] sm:$0xff] }
 0x63b   : > { %6424 = vmatprep.mubr.f32.mxu0 %v16048_v43  ;;  %9620 = vmatprep.mubr.msk.f32.mxu1 %vm11841_vm11, %v16048_v43  ;;  %v10987_v53 = vpack.c.bf16 %v6312_v29, %v6300_v7  ;;  %v15742_v4 = vand.u32 4294901760, %v16290_v56  ;;  %v7112_v33 = vsub.f32 %v14468_v49, %v15737_v27  ;;  %v16291_v25 = vand.u32 4294901760, %v14470_v44 }
 0x63c   : > { %v6329_v41 = vsub.f32 %v14460_v15, %v16289_v16  ;;  %v15738_v24 = vand.u32 4294901760, %v14485_v61  ;;  %v10989_v39 = vpack.c.bf16 %v6318_v60, %v6306_v23  ;;  %v15740_v7 = vand.u32 4294901760, %v14498_v9 }
 0x63d   : > { %10978 = vmatpush1.bf16.msra.mxu0 %v14622_v5  ;;  %11160 = vmatpush3.bf16.msra.mxu1 %v11159_v38  ;;  %v6341_v38 = vsub.f32 %v14462_v2, %v15735_v54  ;;  %v15741_v29 = vand.u32 4294901760, %v14500_v6  ;;  %v11168_v16 = vpack.c.bf16 %v7106_v48, %v7099_v47  ;;  %v6324_v54 = vand.u32 4294901760, %v6323_v58 }
 0x63e   : > { %10980 = vmatprep.subr.bf16.mxu0 %v10979_v8  ;;  %11161 = vmatprep.subr.bf16.mxu1 %v16047_v0  ;;  %v7119_v8 = vsub.f32 %v14470_v44, %v16291_v25  ;;  %v6336_v45 = vand.u32 4294901760, %v6335_v26  ;;  %v6330_v5 = vand.u32 4294901760, %v6329_v41  ;;  %v6347_v25 = vsub.f32 %v16290_v56, %v15742_v4 }
 0x63f   : > { %v16292_v60 = vand.u32 4294901760, %v14481_v63  ;;  %v15743_v27 = vand.u32 4294901760, %v14511_v28  ;;  %v7113_v47 = vand.u32 4294901760, %v7112_v33  ;;  %v6353_v41 = vsub.f32 %v14485_v61, %v15738_v24 }
 0x640   : > { %v7120_v58 = vand.u32 4294901760, %v7119_v8  ;;  %v7126_v48 = vsub.f32 %v14498_v9, %v15740_v7  ;;  %v7133_v26 = vsub.f32 %v14500_v6, %v15741_v29  ;;  %v10991_v33 = vpack.c.bf16 %v6336_v45, %v6324_v54 }
 0x641   : > { %10982 = vmatpush1.bf16.msra.mxu0 %v10981_v21  ;;  %11163 = vmatpush3.bf16.msra.mxu1 %v11162_v22  ;;  %v6359_v23 = vsub.f32 %v14481_v63, %v16292_v60  ;;  %v15744_v21 = vand.u32 4294901760, %v14513_v46  ;;  %v6342_v22 = vand.u32 4294901760, %v6341_v38  ;;  %v15746_v38 = vand.u32 4294901760, %v14520_v13 }
 0x642   : > { %10984 = vmatprep.subr.bf16.mxu0 %v10983_v1  ;;  %11164 = vmatprep.subr.bf16.mxu1 %v16047_v0  ;;  %v6365_v1 = vsub.f32 %v14490_v37, %v15739_v17  ;;  %v15745_v24 = vand.u32 4294901760, %v14592_v36  ;;  %v6348_v17 = vand.u32 4294901760, %v6347_v25  ;;  %v6371_v29 = vsub.f32 %v14511_v28, %v15743_v27 }
 0x643   : > { %v6360_v7 = vand.u32 4294901760, %v6359_v23  ;;  %v10993_v54 = vpack.c.bf16 %v6342_v22, %v6330_v5  ;;  %v11171_v45 = vpack.c.bf16 %v7120_v58, %v7113_v47  ;;  %v7127_v60 = vand.u32 4294901760, %v7126_v48 }
 0x644   : > { %v6366_v4 = vand.u32 4294901760, %v6365_v1  ;;  %v7134_v8 = vand.u32 4294901760, %v7133_v26  ;;  %v16293_v25 = vand.u32 4294901760, %v14545_v40  ;;  %v16294_v27 = vand.u32 4294901760, %v14553_v32 }
 0x645   : > { %10986 = vmatpush1.bf16.msra.mxu0 %v10985_v34  ;;  %11166 = vmatpush3.bf16.msra.mxu1 %v11165_v3  ;;  %v6383_v34 = vsub.f32 %v14513_v46, %v15744_v21  ;;  %v6354_v3 = vand.u32 4294901760, %v6353_v41  ;;  %v7147_v5 = vsub.f32 %v14592_v36, %v15745_v24  ;;  %v10995_v22 = vpack.c.bf16 %v6360_v7, %v6348_v17 }
 0x646   : > { %10988 = vmatprep.subr.bf16.mxu0 %v10987_v53  ;;  %11167 = vmatprep.subr.bf16.mxu1 %v16047_v0  ;;  %v6377_v53 = vsub.f32 %v14520_v13, %v15746_v38  ;;  %v6389_v23 = vsub.f32 %v14545_v40, %v16293_v25  ;;  %v7140_v21 = vsub.f32 %v14553_v32, %v16294_v27  ;;  %v6372_v47 = vand.u32 4294901760, %v6371_v29 }
 0x647   : > { %v6384_v58 = vand.u32 4294901760, %v6383_v34  ;;  %v10997_v41 = vpack.c.bf16 %v6366_v4, %v6354_v3  ;;  %v11174_v1 = vpack.c.bf16 %v7134_v8, %v7127_v60  ;;  %v7148_v25 = vand.u32 4294901760, %v7147_v5  ;;  %v16296_v60 = vld [vmem:[#allocation26_spill] sm:$0xff]  ;;  %v16297_v34 = vld [vmem:[#allocation36_spill] sm:$0xff]  ;;  %v16299_v3 = vld [vmem:[#allocation65_spill] sm:$0xff] }
 0x648   : > { %v6378_v48 = vand.u32 4294901760, %v6377_v53  ;;  %v6390_v26 = vand.u32 4294901760, %v6389_v23  ;;  %v7141_v27 = vand.u32 4294901760, %v7140_v21  ;;  %v11003_v4 = vpack.c.bf16 %v14344_v19, %v14342_v12  ;;  %v16295_v21 = vld [vmem:[#allocation35_spill] sm:$0xff]  ;;  %v16300_v53 = vld [vmem:[#allocation66_spill] sm:$0xff]  ;;  %v16301_v5 = vld [vmem:[#allocation68_spill] sm:$0xff] }
 0x649   : > { %10990 = vmatpush1.bf16.msra.mxu0 %v10989_v39  ;;  %11169 = vmatpush3.bf16.msra.mxu1 %v11168_v16  ;;  %v11005_v29 = vpack.c.bf16 %v14350_v51, %v14348_v10  ;;  %v11180_v8 = vpack.c.bf16 %v16295_v21, %v14356_v50  ;;  %v11009_v23 = vpack.c.bf16 %v16300_v53, %v16299_v3 }
 0x64a   : > { %10992 = vmatprep.subr.bf16.mxu0 %v10991_v33  ;;  %11170 = vmatprep.subr.bf16.mxu1 %v16047_v0  ;;  %v10999_v33 = vpack.c.bf16 %v6384_v58, %v6372_v47  ;;  %v11001_v17 = vpack.c.bf16 %v6390_v26, %v6378_v48  ;;  %v11177_v7 = vpack.c.bf16 %v7148_v25, %v7141_v27  ;;  %v16304_v48 = vld [vmem:[#allocation78_spill] sm:$0xff]  ;;  %v16305_v27 = vld [vmem:[#allocation32_spill] sm:$0xff] }
 0x64b   : > { %v14758_v39 = vpop.f32.mrb[28].mxu1  ;;  %v11011_v58 = vpack.c.bf16 %v16254_v52, %v14384_v42  ;;  %v11015_v26 = vpack.c.bf16 %v16304_v48, %v16265_v11  ;;  %v11017_v25 = vpack.c.bf16 %v16305_v27, %v16267_v55 }
 0x64c   : > { %v9377_v16 = vpop.f32.mrb[29].mxu1 }
 0x64d   : > { %10994 = vmatpush1.bf16.msra.mxu0 %v10993_v54  ;;  %11172 = vmatpush3.bf16.msra.mxu1 %v11171_v45  ;;  %v11007_v54 = vpack.c.bf16 %v16297_v34, %v16296_v60  ;;  %v16298_v45 = vld [vmem:[#allocation30_spill] sm:$0xff]  ;;  %v16303_v16 = vld [vmem:[#allocation49_spill] sm:$0xff] }
 0x64e   : > { %10996 = vmatprep.subr.bf16.mxu0 %v10995_v22  ;;  %11173 = vmatprep.subr.bf16.mxu1 %v16047_v0  ;;  %v16302_v22 = vld [vmem:[#allocation69_spill] sm:$0xff] }
 0x64f   : > { %v11183_v47 = vpack.c.bf16 %v16302_v22, %v16301_v5 }
 0x651   : > { %10998 = vmatpush1.bf16.msra.mxu0 %v10997_v41  ;;  %11175 = vmatpush3.bf16.msra.mxu1 %v11174_v1  ;;  %v11013_v41 = vpack.c.bf16 %v16303_v16, %v16257_v14  ;;  %v11186_v1 = vpack.c.bf16 %v16260_v59, %v16259_v57 }
 0x652   : > { %11000 = vmatprep.subr.bf16.mxu0 %v10999_v33  ;;  %11176 = vmatprep.subr.bf16.mxu1 %v16047_v0  ;;  %v16306_v33 = vld [vmem:[#allocation55_spill] sm:$0xff] }
 0x655   : > { %11002 = vmatpush1.bf16.msra.mxu0 %v11001_v17  ;;  %11178 = vmatpush3.bf16.msra.mxu1 %v11177_v7  ;;  %v16307_v17 = vld [vmem:[#allocation54_spill] sm:$0xff] }
 0x656   : > { %11004 = vmatprep.subr.bf16.mxu0 %v11003_v4  ;;  %11179 = vmatprep.subr.bf16.mxu1 %v16047_v0  ;;  %v11189_v7 = vpack.c.bf16 %v16307_v17, %v16306_v33  ;;  %v16308_v4 = vld [vmem:[#allocation57_spill] sm:$0xff] }
 0x658   : > { %6426 = vmatmul.mubr.f32.vlgmr.msra.gmra.mrb[4].mxu0 %v16298_v45  ;;  %9621 = vmatmul.mubr.f32.vlgmr.msra.gmra.mrb[40].mxu1 %v16298_v45 }
 0x659   : > { %11006 = vmatpush1.bf16.msra.mxu0 %v11005_v29  ;;  %11181 = vmatpush3.bf16.msra.mxu1 %v11180_v8  ;;  %v11019_v29 = vpack.c.bf16 %v16270_v30, %v16308_v4  ;;  %v14797_v8 = vld [vmem:[#allocation9 + $0x618] ss:$8 sm:$0x7] }
 0x65a   : > { %11008 = vmatprep.subr.bf16.mxu0 %v11007_v54  ;;  %11182 = vmatprep.subr.bf16.mxu1 %v16047_v0  ;;  %16309 = vst [vmem:[#allocation45_spill] sm:$0xff] %v14797_v8  ;;  %v11021_v54 = vpack.c.bf16 %v16275_v18, %v16274_v62 }
 0x65b   : > { %6560 = vmatprep.mubr.f32.mxu0 %v16048_v43  ;;  %9655 = vmatprep.mubr.msk.f32.mxu1 %vm11841_vm11, %v16048_v43 }
 0x65d   : > { %11010 = vmatpush1.bf16.msra.mxu0 %v11009_v23  ;;  %11184 = vmatpush3.bf16.msra.mxu1 %v11183_v47  ;;  %v16310_v23 = vld [vmem:[#allocation59_spill] sm:$0xff] }
 0x65e   : > { %11012 = vmatprep.subr.bf16.mxu0 %v11011_v58  ;;  %11185 = vmatprep.subr.bf16.mxu1 %v16047_v0  ;;  %v11192_v47 = vpack.c.bf16 %v16278_v35, %v16310_v23  ;;  %v16311_v58 = vld [vmem:[#allocation20_spill] sm:$0xff] }
 0x661   : > { %11014 = vmatpush1.bf16.msra.mxu0 %v11013_v41  ;;  %11187 = vmatpush3.bf16.msra.mxu1 %v11186_v1  ;;  %v4526_v41 = vrot.slane %v14797_v8, %v16311_v58  ;;  %v11023_v1 = vpack.c.bf16 %v16287_v20, %v16284_v31  ;;  %v16324_v8 = vld [vmem:[#allocation24_spill] sm:$0xff] }
 0x662   : > { %11016 = vmatprep.subr.bf16.mxu0 %v11015_v26  ;;  %11188 = vmatprep.subr.bf16.mxu1 %v16047_v0  ;;  %v11025_v26 = vpack.c.bf16 %v14462_v2, %v14460_v15 }
 0x665   : > { %11018 = vmatpush1.bf16.msra.mxu0 %v11017_v25  ;;  %11190 = vmatpush3.bf16.msra.mxu1 %v11189_v7  ;;  %v11195_v25 = vpack.c.bf16 %v14470_v44, %v14468_v49  ;;  %v5473_v7 = vadd.f32 %v14758_v39, %v4526_v41  ;;  %v11031_v39 = vpack.c.bf16 %v14513_v46, %v14511_v28  ;;  %v16312_v41 = vld [vmem:[#allocation50_spill] sm:$0xff] }
 0x666   : > { %11020 = vmatprep.subr.bf16.mxu0 %v11019_v29  ;;  %11191 = vmatprep.subr.bf16.mxu1 %v16047_v0  ;;  %v11027_v29 = vpack.c.bf16 %v14481_v63, %v16290_v56 }
 0x669   : > { %11022 = vmatpush1.bf16.msra.mxu0 %v11021_v54  ;;  %11193 = vmatpush3.bf16.msra.mxu1 %v11192_v47  ;;  %v11029_v54 = vpack.c.bf16 %v14490_v37, %v14485_v61  ;;  %v11198_v47 = vpack.c.bf16 %v14500_v6, %v14498_v9 }
 0x66a   : > { %11024 = vmatprep.subr.bf16.mxu0 %v11023_v1  ;;  %11194 = vmatprep.subr.bf16.mxu1 %v16047_v0  ;;  %v16313_v1 = vld [vmem:[#allocation43_spill] sm:$0xff] }
 0x66b   : > { %v5623_v24 = vpop.f32.mrb[30].mxu1 }
 0x66c   : > { %v5624_v38 = vadd.f32 %v5623_v24, %v5473_v7  ;;  %v9412_v58 = vpop.f32.mrb[31].mxu1  ;;  %v11033_v24 = vpack.c.bf16 %v14545_v40, %v14520_v13  ;;  %v16316_v7 = vld [vmem:[#allocation23_spill] sm:$0xff] }
 0x66d   : > { %11026 = vmatpush1.bf16.msra.mxu0 %v11025_v26  ;;  %11196 = vmatpush3.bf16.msra.mxu1 %v11195_v25  ;;  %v11201_v58 = vpack.c.bf16 %v14592_v36, %v14553_v32  ;;  %v16314_v26 = vld [vmem:[#allocation51_spill] sm:$0xff]  ;;  %v16315_v25 = vld [vmem:[#allocation21_spill] sm:$0xff] }
 0x66e   : > { %11028 = vmatprep.subr.bf16.mxu0 %v11027_v29  ;;  %11197 = vmatprep.subr.bf16.mxu1 %v16047_v0  ;;  %v16317_v29 = vld [vmem:[#allocation33_spill] sm:$0xff] }
 0x671   : > { %11030 = vmatpush1.bf16.msra.mxu0 %v11029_v54  ;;  %11199 = vmatpush3.bf16.msra.mxu1 %v11198_v47  ;;  %v16318_v54 = vld [vmem:[#allocation67_spill] sm:$0xff]  ;;  %v16319_v47 = vld [vmem:[#allocation70_spill] sm:$0xff] }
 0x672   : > { %11032 = vmatprep.subr.bf16.mxu0 %v11031_v39  ;;  %11200 = vmatprep.subr.bf16.mxu1 %v16047_v0  ;;  %v16320_v39 = vld [vmem:[#allocation72_spill] sm:$0xff] }
 0x675   : > { %11034 = vmatpush1.bf16.msra.mxu0 %v11033_v24  ;;  %11202 = vmatpush3.bf16.msra.mxu1 %v11201_v58  ;;  %v16321_v24 = vld [vmem:[#allocation73_spill] sm:$0xff]  ;;  %v16322_v58 = vld [vmem:[#allocation76_spill] sm:$0xff] }
 0x676   : > { %11036 = vmatprep.subr.bf16.mxu0 %v16312_v41  ;;  %11203 = vmatprep.subr.bf16.mxu1 %v16047_v0 }
 0x678   : > { %6563 = vmatmul.mubr.f32.vlgmr.msra.gmra.mrb[4].mxu0 %v16313_v1  ;;  %9656 = vmatmul.mubr.f32.vlgmr.msra.gmra.mrb[40].mxu1 %v16313_v1  ;;  %v16323_v1 = vld [vmem:[#allocation79_spill] sm:$0xff] }
 0x679   : > { %11038 = vmatpush1.bf16.msra.mxu0 %v16314_v26  ;;  %11205 = vmatpush3.bf16.msra.mxu1 %v16315_v25  ;;  %v16329_v25 = vld [vmem:[#allocation31_spill] sm:$0xff] }
 0x67a   : > { %11040 = vmatprep.subr.bf16.mxu0 %v16316_v7  ;;  %11206 = vmatprep.subr.bf16.mxu1 %v16047_v0  ;;  %v16325_v7 = vld [vmem:[#allocation58_spill] sm:$0xff] }
 0x67b   : > { %6665 = vmatprep.mubr.f32.mxu0 %v16048_v43  ;;  %9690 = vmatprep.mubr.msk.f32.mxu1 %vm11841_vm11, %v16048_v43 }
 0x67d   : > { %11042 = vmatpush1.bf16.msra.mxu0 %v16317_v29  ;;  %11208 = vmatpush3.bf16.msra.mxu1 %v16318_v54  ;;  %v16326_v54 = vld [vmem:[#allocation60_spill] sm:$0xff]  ;;  %v16328_v29 = vld [vmem:[#allocation25_spill] sm:$0xff] }
 0x67e   : > { %11044 = vmatprep.subr.bf16.mxu0 %v16319_v47  ;;  %11209 = vmatprep.subr.bf16.mxu1 %v16047_v0  ;;  %v16327_v47 = vld [vmem:[#allocation22_spill] sm:$0xff] }
 0x681   : > { %11046 = vmatpush1.bf16.msra.mxu0 %v16320_v39  ;;  %11211 = vmatpush3.bf16.msra.mxu1 %v16321_v24 }
 0x682   : > { %11048 = vmatprep.subr.bf16.mxu0 %v16322_v58  ;;  %11212 = vmatprep.subr.bf16.mxu1 %v16047_v0 }
 0x685   : > { %11050 = vmatpush1.bf16.msra.mxu0 %v16323_v1  ;;  %11214 = vmatpush3.bf16.msra.mxu1 %v16324_v8  ;;  %v16330_v1 = vld [vmem:[#allocation28_spill] sm:$0xff]  ;;  %v16331_v8 = vld [vmem:[#allocation37_spill] sm:$0xff] }
 0x686   : > { %11052 = vmatprep.subr.bf16.mxu0 %v16325_v7  ;;  %11215 = vmatprep.subr.bf16.mxu1 %v16047_v0  ;;  %v16332_v7 = vld [vmem:[#allocation39_spill] sm:$0xff] }
 0x689   : > { %11054 = vmatpush1.bf16.msra.mxu0 %v16326_v54  ;;  %11217 = vmatpush3.bf16.msra.mxu1 %v16327_v47  ;;  %v16333_v54 = vld [vmem:[#allocation41_spill] sm:$0xff]  ;;  %v16334_v47 = vld [vmem:[#allocation34_spill] sm:$0xff] }
 0x68a   : > { %11056 = vmatprep.subr.bf16.mxu0 %v16328_v29  ;;  %11218 = vmatprep.subr.bf16.mxu1 %v16047_v0  ;;  %v16335_v29 = vand.u32 4294901760, %v14342_v12  ;;  %v16343_v12 = vand.u32 4294901760, %v16296_v60  ;;  %v16350_v60 = vand.u32 4294901760, %v14384_v42 }
 0x68b   : > { %v5727_v24 = vpop.f32.mrb[32].mxu1 }
 0x68c   : > { %v5728_v58 = vadd.f32 %v5727_v24, %v5624_v38  ;;  %v9447_v39 = vpop.f32.mrb[33].mxu1  ;;  %v16336_v38 = vand.u32 4294901760, %v14344_v19  ;;  %v16337_v24 = vld [vmem:[#allocation44_spill] sm:$0xff]  ;;  %v16344_v19 = vand.u32 4294901760, %v16297_v34  ;;  %v16351_v34 = vand.u32 4294901760, %v16254_v52 }
 0x68d   : > { %11058 = vmatpush1.bf16.msra.mxu0 %v16329_v25  ;;  %11220 = vmatpush3.bf16.msra.mxu1 %v16330_v1  ;;  %v16338_v1 = vld [vmem:[#allocation42_spill] sm:$0xff]  ;;  %v16340_v25 = vand.u32 4294901760, %v14350_v51  ;;  %v16347_v51 = vand.u32 4294901760, %v16300_v53  ;;  %v16353_v53 = vand.u32 4294901760, %v16303_v16  ;;  %v16356_v52 = vand.u32 4294901760, %v16265_v11 }
 0x68e   : > { %11060 = vmatprep.subr.bf16.mxu0 %v16331_v8  ;;  %11221 = vmatprep.subr.bf16.mxu1 %v16047_v0  ;;  %v11067_v39 = vpack.c.bf16 %v16336_v38, %v16335_v29  ;;  %v16339_v8 = vand.u32 4294901760, %v14348_v10  ;;  %v11071_v29 = vpack.c.bf16 %v16344_v19, %v16343_v12  ;;  %v16345_v38 = vld [vmem:[#allocation40_spill] sm:$0xff]  ;;  %v16346_v10 = vand.u32 4294901760, %v16299_v3 }
 0x68f   : > { %v16352_v3 = vand.u32 4294901760, %v16257_v14  ;;  %v16358_v14 = vand.u32 4294901760, %v16267_v55  ;;  %v16359_v16 = vand.u32 4294901760, %v16305_v27  ;;  %v16362_v11 = vand.u32 4294901760, %v16308_v4 }
 0x690   : > { %v16364_v55 = vand.u32 4294901760, %v16274_v62  ;;  %v16365_v27 = vand.u32 4294901760, %v16275_v18  ;;  %v16368_v4 = vand.u32 4294901760, %v16284_v31  ;;  %v16370_v62 = vand.u32 4294901760, %v14460_v15 }
 0x691   : > { %11062 = vmatpush1.bf16.msra.mxu0 %v16332_v7  ;;  %11223 = vmatpush3.bf16.msra.mxu1 %v16333_v54  ;;  %v11069_v7 = vpack.c.bf16 %v16340_v25, %v16339_v8  ;;  %v16341_v54 = vand.u32 4294901760, %v14356_v50  ;;  %v11073_v50 = vpack.c.bf16 %v16347_v51, %v16346_v10  ;;  %v16349_v8 = vand.u32 4294901760, %v16302_v22 }
 0x692   : > { %11064 = vmatprep.subr.bf16.mxu0 %v16334_v47  ;;  %11224 = vmatprep.subr.bf16.mxu1 %v16047_v0  ;;  %v16342_v47 = vand.u32 4294901760, %v16295_v21  ;;  %v16348_v21 = vand.u32 4294901760, %v16301_v5  ;;  %v11077_v5 = vpack.c.bf16 %v16353_v53, %v16352_v3  ;;  %v16354_v22 = vand.u32 4294901760, %v16259_v57 }
 0x693   : > { %v16360_v57 = vand.u32 4294901760, %v16306_v33  ;;  %v16366_v33 = vand.u32 4294901760, %v16310_v23  ;;  %v16371_v18 = vand.u32 4294901760, %v14462_v2  ;;  %v16372_v23 = vand.u32 4294901760, %v14468_v49 }
 0x694   : > { %v11228_v26 = vpack.c.bf16 %v16342_v47, %v16341_v54  ;;  %v11231_v25 = vpack.c.bf16 %v16349_v8, %v16348_v21  ;;  %v11075_v54 = vpack.c.bf16 %v16351_v34, %v16350_v60  ;;  %v16374_v31 = vand.u32 4294901760, %v16290_v56 }
 0x695   : > { %11066 = vmatpush1.bf16.msra.mxu0 %v16337_v24  ;;  %11226 = vmatpush3.bf16.msra.mxu1 %v16338_v1  ;;  %v11089_v51 = vpack.c.bf16 %v16371_v18, %v16370_v62  ;;  %v16376_v15 = vand.u32 4294901760, %v14485_v61  ;;  %v16377_v2 = vand.u32 4294901760, %v14490_v37  ;;  %v16379_v34 = vand.u32 4294901760, %v14500_v6 }
 0x696   : > { %11068 = vmatprep.subr.bf16.mxu0 %v11067_v39  ;;  %11227 = vmatprep.subr.bf16.mxu1 %v16047_v0  ;;  %v11081_v39 = vpack.c.bf16 %v16359_v16, %v16358_v14  ;;  %v16381_v56 = vand.u32 4294901760, %v14513_v46  ;;  %v16382_v61 = vand.u32 4294901760, %v14520_v13  ;;  %v16383_v37 = vand.u32 4294901760, %v14545_v40  ;;  %v16386_v46 = vld [vmem:[#allocation51_spill] sm:$0xff]  ;;  %v16391_v40 = vld [vmem:[#allocation70_spill] sm:$0xff]  ;;  %v16400_v14 = vld [vmem:[#allocation25_spill] sm:$0xff] }
 0x697   : > { %v11093_v49 = vpack.c.bf16 %v16377_v2, %v16376_v15  ;;  %v16385_v6 = vand.u32 4294901760, %v14592_v36  ;;  %v16389_v36 = vld [vmem:[#allocation33_spill] sm:$0xff]  ;;  %v16390_v13 = vld [vmem:[#allocation67_spill] sm:$0xff]  ;;  %v7618_v15 = vld [vmem:[#allocation10 + $0x40] sm:$0xff] }
 0x698   : > { %6669 = vmatmul.mubr.f32.vlgmr.msra.gmra.mrb[4].mxu0 %v16345_v38  ;;  %9691 = vmatmul.mubr.f32.vlgmr.msra.gmra.mrb[40].mxu1 %v16345_v38  ;;  %v11097_v3 = vpack.c.bf16 %v16383_v37, %v16382_v61  ;;  %v7619_v2 = vld [vmem:[#allocation10 + $0x48] sm:$0xff] }
 0x699   : > { %11070 = vmatpush1.bf16.msra.mxu0 %v11069_v7  ;;  %11229 = vmatpush3.bf16.msra.mxu1 %v11228_v26  ;;  %v16355_v26 = vand.u32 4294901760, %v16260_v59  ;;  %v16357_v7 = vand.u32 4294901760, %v16304_v48  ;;  %v16361_v59 = vand.u32 4294901760, %v16307_v17  ;;  %v16363_v48 = vand.u32 4294901760, %v16270_v30 }
 0x69a   : > { %11072 = vmatprep.subr.bf16.mxu0 %v11071_v29  ;;  %11230 = vmatprep.subr.bf16.mxu1 %v16047_v0  ;;  %v11085_v29 = vpack.c.bf16 %v16365_v27, %v16364_v55  ;;  %v16367_v17 = vand.u32 4294901760, %v16278_v35  ;;  %v16369_v30 = vand.u32 4294901760, %v16287_v20  ;;  %v16373_v35 = vand.u32 4294901760, %v14470_v44  ;;  %v16406_v55 = vld [vmem:[#allocation34_spill] sm:$0xff] }
 0x69b   : > { %6835 = vmatprep.mubr.f32.mxu0 %v16048_v43  ;;  %9725 = vmatprep.mubr.msk.f32.mxu1 %vm11841_vm11, %v16048_v43  ;;  %v11234_v42 = vpack.c.bf16 %v16355_v26, %v16354_v22  ;;  %v11079_v47 = vpack.c.bf16 %v16357_v7, %v16356_v52  ;;  %v11237_v12 = vpack.c.bf16 %v16361_v59, %v16360_v57  ;;  %v16375_v20 = vand.u32 4294901760, %v14481_v63  ;;  %v16394_v22 = vld [vmem:[#allocation76_spill] sm:$0xff]  ;;  %v16395_v26 = vld [vmem:[#allocation79_spill] sm:$0xff]  ;;  %v16397_v52 = vld [vmem:[#allocation58_spill] sm:$0xff] }
 0x69c   : > { %v11083_v19 = vpack.c.bf16 %v16363_v48, %v16362_v11  ;;  %v11240_v38 = vpack.c.bf16 %v16367_v17, %v16366_v33  ;;  %v11087_v10 = vpack.c.bf16 %v16369_v30, %v16368_v4  ;;  %v16378_v44 = vand.u32 4294901760, %v14498_v9  ;;  %v16398_v7 = vld [vmem:[#allocation60_spill] sm:$0xff]  ;;  %v16401_v59 = vld [vmem:[#allocation31_spill] sm:$0xff]  ;;  %v16403_v11 = vld [vmem:[#allocation37_spill] sm:$0xff] }
 0x69d   : > { %11074 = vmatpush1.bf16.msra.mxu0 %v11073_v50  ;;  %11232 = vmatpush3.bf16.msra.mxu1 %v11231_v25  ;;  %v11243_v50 = vpack.c.bf16 %v16373_v35, %v16372_v23  ;;  %v11091_v21 = vpack.c.bf16 %v16375_v20, %v16374_v31  ;;  %v16380_v63 = vand.u32 4294901760, %v14511_v28  ;;  %v16384_v9 = vand.u32 4294901760, %v14553_v32  ;;  %v16387_v28 = vld [vmem:[#allocation21_spill] sm:$0xff]  ;;  %v16388_v32 = vld [vmem:[#allocation23_spill] sm:$0xff]  ;;  %v7610_v17 = vld [vmem:[#allocation10] sm:$0xff] }
 0x69e   : > { %11076 = vmatprep.subr.bf16.mxu0 %v11075_v54  ;;  %11233 = vmatprep.subr.bf16.mxu1 %v16047_v0  ;;  %v11246_v54 = vpack.c.bf16 %v16379_v34, %v16378_v44  ;;  %v16404_v48 = vld [vmem:[#allocation39_spill] sm:$0xff]  ;;  %v7632_v4 = vand.u32 4294901760, %v7610_v17  ;;  %v7616_v20 = vld [vmem:[#allocation10 + $0x30] sm:$0xff]  ;;  %v7659_v44 = vand.u32 4294901760, %v7619_v2 }
 0x69f   : > { %v11249_v53 = vpack.c.bf16 %v16385_v6, %v16384_v9  ;;  %v7615_v23 = vld [vmem:[#allocation10 + $0x28] sm:$0xff]  ;;  %v7622_v6 = vld [vmem:[#allocation10 + $0x60] sm:$0xff] }
 0x6a0   : > { %v15038_v61 = vsub.f32 %v7610_v17, %v7632_v4 }
 0x6a1   : > { %11078 = vmatpush1.bf16.msra.mxu0 %v11077_v5  ;;  %11235 = vmatpush3.bf16.msra.mxu1 %v11234_v42  ;;  %v16393_v5 = vld [vmem:[#allocation73_spill] sm:$0xff]  ;;  %v16396_v42 = vld [vmem:[#allocation24_spill] sm:$0xff] }
 0x6a2   : > { %11080 = vmatprep.subr.bf16.mxu0 %v11079_v47  ;;  %11236 = vmatprep.subr.bf16.mxu1 %v16047_v0  ;;  %v16399_v47 = vld [vmem:[#allocation22_spill] sm:$0xff] }
 0x6a5   : > { %11082 = vmatpush1.bf16.msra.mxu0 %v11081_v39  ;;  %11238 = vmatpush3.bf16.msra.mxu1 %v11237_v12  ;;  %v16402_v12 = vld [vmem:[#allocation28_spill] sm:$0xff] }
 0x6a6   : > { %11084 = vmatprep.subr.bf16.mxu0 %v11083_v19  ;;  %11239 = vmatprep.subr.bf16.mxu1 %v16047_v0  ;;  %v16405_v19 = vld [vmem:[#allocation41_spill] sm:$0xff] }
 0x6a9   : > { %11086 = vmatpush1.bf16.msra.mxu0 %v11085_v29  ;;  %11241 = vmatpush3.bf16.msra.mxu1 %v11240_v38  ;;  %v7611_v38 = vld [vmem:[#allocation10 + $0x8] sm:$0xff] }
 0x6aa   : > { %11088 = vmatprep.subr.bf16.mxu0 %v11087_v10  ;;  %11242 = vmatprep.subr.bf16.mxu1 %v16047_v0  ;;  %v7635_v30 = vand.u32 4294901760, %v7611_v38  ;;  %v7613_v10 = vld [vmem:[#allocation10 + $0x18] sm:$0xff] }
 0x6ab   : > { %v5816_v8 = vpop.f32.mrb[34].mxu1  ;;  %v7641_v18 = vand.u32 4294901760, %v7613_v10 }
 0x6ac   : > { %v5817_v25 = vadd.f32 %v5816_v8, %v5728_v58  ;;  %v9482_v60 = vpop.f32.mrb[35].mxu1  ;;  %v11095_v58 = vpack.c.bf16 %v16381_v56, %v16380_v63  ;;  %v7650_v8 = vand.u32 4294901760, %v7616_v20  ;;  %v7621_v63 = vld [vmem:[#allocation10 + $0x58] sm:$0xff]  ;;  %v15040_v37 = vsub.f32 %v7611_v38, %v7635_v30 }
 0x6ad   : > { %11090 = vmatpush1.bf16.msra.mxu0 %v11089_v51  ;;  %11244 = vmatpush3.bf16.msra.mxu1 %v11243_v50  ;;  %v7614_v51 = vld [vmem:[#allocation10 + $0x20] sm:$0xff]  ;;  %v7647_v50 = vand.u32 4294901760, %v7615_v23  ;;  %v15044_v9 = vsub.f32 %v7613_v10, %v7641_v18 }
 0x6ae   : > { %11092 = vmatprep.subr.bf16.mxu0 %v11091_v21  ;;  %11245 = vmatprep.subr.bf16.mxu1 %v16047_v0  ;;  %v7644_v35 = vand.u32 4294901760, %v7614_v51  ;;  %v7617_v21 = vld [vmem:[#allocation10 + $0x38] sm:$0xff] }
 0x6b0   : > { %v15026_v31 = vpack.c.bf16 %v7647_v50, %v7644_v35 }
 0x6b1   : > { %11094 = vmatpush1.bf16.msra.mxu0 %v11093_v49  ;;  %11247 = vmatpush3.bf16.msra.mxu1 %v11246_v54  ;;  %v7656_v49 = vand.u32 4294901760, %v7618_v15  ;;  %v7620_v54 = vld [vmem:[#allocation10 + $0x50] sm:$0xff] }
 0x6b2   : > { %11096 = vmatprep.subr.bf16.mxu0 %v11095_v58  ;;  %11248 = vmatprep.subr.bf16.mxu1 %v16047_v0  ;;  %v7662_v56 = vand.u32 4294901760, %v7620_v54  ;;  %v7665_v58 = vand.u32 4294901760, %v7621_v63 }
 0x6b3   : > { %v15034_v34 = vpack.c.bf16 %v7659_v44, %v7656_v49 }
 0x6b5   : > { %11098 = vmatpush1.bf16.msra.mxu0 %v11097_v3  ;;  %11250 = vmatpush3.bf16.msra.mxu1 %v11249_v53  ;;  %v7623_v53 = vld [vmem:[#allocation10 + $0x68] sm:$0xff] }
 0x6b6   : > { %11100 = vmatprep.subr.bf16.mxu0 %v16312_v41  ;;  %11251 = vmatprep.subr.bf16.mxu1 %v16047_v0  ;;  %v16392_v41 = vld [vmem:[#allocation72_spill] sm:$0xff] }
 0x6b8   : > { %6837 = vmatmul.mubr.f32.vlgmr.msra.gmra.mrb[4].mxu0 %v16298_v45  ;;  %9726 = vmatmul.mubr.f32.vlgmr.msra.gmra.mrb[40].mxu1 %v16298_v45 }
 0x6b9   : > { %11102 = vmatpush1.bf16.msra.mxu0 %v16386_v46  ;;  %11253 = vmatpush3.bf16.msra.mxu1 %v16387_v28  ;;  %v7624_v46 = vld [vmem:[#allocation10 + $0x70] sm:$0xff]  ;;  %v15046_v28 = vsub.f32 %v7614_v51, %v7644_v35 }
 0x6ba   : > { %11104 = vmatprep.subr.bf16.mxu0 %v16388_v32  ;;  %11254 = vmatprep.subr.bf16.mxu1 %v16047_v0  ;;  %v15048_v32 = vsub.f32 %v7615_v23, %v7647_v50 }
 0x6bb   : > { %6939 = vmatprep.mubr.f32.mxu0 %v16048_v43  ;;  %9760 = vmatprep.mubr.msk.f32.mxu1 %vm11841_vm11, %v16048_v43  ;;  %v15760_v51 = vand.u32 4294901760, %v15046_v28 }
 0x6bc   : > { %v15759_v23 = vand.u32 4294901760, %v15048_v32 }
 0x6bd   : > { %11106 = vmatpush1.bf16.msra.mxu0 %v16389_v36  ;;  %11256 = vmatpush3.bf16.msra.mxu1 %v16390_v13  ;;  %v15050_v36 = vsub.f32 %v7616_v20, %v7650_v8  ;;  %v7754_v50 = vsub.f32 %v15046_v28, %v15760_v51 }
 0x6be   : > { %11108 = vmatprep.subr.bf16.mxu0 %v16391_v40  ;;  %11257 = vmatprep.subr.bf16.mxu1 %v16047_v0  ;;  %v7625_v40 = vld [vmem:[#allocation10 + $0x78] sm:$0xff]  ;;  %v7761_v20 = vsub.f32 %v15048_v32, %v15759_v23 }
 0x6c1   : > { %11110 = vmatpush1.bf16.msra.mxu0 %v16392_v41  ;;  %11259 = vmatpush3.bf16.msra.mxu1 %v16393_v5  ;;  %v15054_v41 = vsub.f32 %v7618_v15, %v7656_v49  ;;  %v15056_v5 = vsub.f32 %v7619_v2, %v7659_v44 }
 0x6c2   : > { %11112 = vmatprep.subr.bf16.mxu0 %v16394_v22  ;;  %11260 = vmatprep.subr.bf16.mxu1 %v16047_v0  ;;  %v15058_v22 = vpack.c.bf16 %v7665_v58, %v7662_v56 }
 0x6c5   : > { %11114 = vmatpush1.bf16.msra.mxu0 %v16395_v26  ;;  %11262 = vmatpush3.bf16.msra.mxu1 %v16396_v42  ;;  %v15060_v26 = vsub.f32 %v7620_v54, %v7662_v56  ;;  %v15062_v42 = vsub.f32 %v7621_v63, %v7665_v58  ;;  %v15756_v56 = vand.u32 4294901760, %v15054_v41  ;;  %v15755_v58 = vand.u32 4294901760, %v15056_v5 }
 0x6c6   : > { %11116 = vmatprep.subr.bf16.mxu0 %v16397_v52  ;;  %11263 = vmatprep.subr.bf16.mxu1 %v16047_v0  ;;  %v7668_v52 = vand.u32 4294901760, %v7622_v6 }
 0x6c9   : > { %11118 = vmatpush1.bf16.msra.mxu0 %v16398_v7  ;;  %11265 = vmatpush3.bf16.msra.mxu1 %v16399_v47  ;;  %v7671_v7 = vand.u32 4294901760, %v7623_v53  ;;  %v7674_v47 = vand.u32 4294901760, %v7624_v46 }
 0x6ca   : > { %11120 = vmatprep.subr.bf16.mxu0 %v16400_v14  ;;  %11266 = vmatprep.subr.bf16.mxu1 %v16047_v0  ;;  %v7677_v14 = vand.u32 4294901760, %v7625_v40 }
 0x6cb   : > { %v5935_v16 = vpop.f32.mrb[36].mxu1 }
 0x6cc   : > { %v5936_v39 = vadd.f32 %v5935_v16, %v5817_v25  ;;  %v9517_v57 = vpop.f32.mrb[37].mxu1  ;;  %v7653_v25 = vand.u32 4294901760, %v7617_v21  ;;  %v15066_v16 = vpack.c.bf16 %v7671_v7, %v7668_v52 }
 0x6cd   : > { %11122 = vmatpush1.bf16.msra.mxu0 %v16401_v59  ;;  %11268 = vmatpush3.bf16.msra.mxu1 %v16402_v12  ;;  %v15070_v57 = vsub.f32 %v7623_v53, %v7671_v7  ;;  %v15072_v59 = vsub.f32 %v7624_v46, %v7674_v47  ;;  %v15074_v12 = vsub.f32 %v7625_v40, %v7677_v14  ;;  %v15754_v7 = vand.u32 4294901760, %v15060_v26 }
 0x6ce   : > { %11124 = vmatprep.subr.bf16.mxu0 %v16403_v11  ;;  %11269 = vmatprep.subr.bf16.mxu1 %v16047_v0  ;;  %v15030_v60 = vpack.c.bf16 %v7653_v25, %v7650_v8  ;;  %v15052_v13 = vsub.f32 %v7617_v21, %v7653_v25  ;;  %v15764_v11 = vand.u32 4294901760, %v15038_v61  ;;  %v7755_v21 = vand.u32 4294901760, %v7754_v50 }
 0x6cf   : > { %v7762_v8 = vand.u32 4294901760, %v7761_v20  ;;  %v15758_v25 = vand.u32 4294901760, %v15050_v36  ;;  %v7782_v53 = vsub.f32 %v15054_v41, %v15756_v56  ;;  %v7789_v46 = vsub.f32 %v15056_v5, %v15755_v58 }
 0x6d0   : > { %v15757_v15 = vand.u32 4294901760, %v15052_v13 }
 0x6d1   : > { %11126 = vmatpush1.bf16.msra.mxu0 %v16404_v48  ;;  %11271 = vmatpush3.bf16.msra.mxu1 %v16405_v19  ;;  %v15763_v48 = vand.u32 4294901760, %v15040_v37  ;;  %v15079_v19 = vpack.c.bf16 %v7677_v14, %v7674_v47  ;;  %v15112_v2 = vpack.c.bf16 %v7762_v8, %v7755_v21  ;;  %v7768_v49 = vsub.f32 %v15050_v36, %v15758_v25 }
 0x6d2   : > { %11128 = vmatprep.subr.bf16.mxu0 %v16406_v55  ;;  %11272 = vmatprep.subr.bf16.mxu1 %v16047_v0  ;;  %v7726_v55 = vsub.f32 %v15038_v61, %v15764_v11  ;;  %v7775_v44 = vsub.f32 %v15052_v13, %v15757_v15  ;;  %v7783_v40 = vand.u32 4294901760, %v7782_v53  ;;  %v15753_v47 = vand.u32 4294901760, %v15062_v42  ;;  %v16410_v11 = vld [vmem:[#allocation20_spill] sm:$0xff] }
 0x6d3   : > { %v7769_v54 = vand.u32 4294901760, %v7768_v49  ;;  %v15750_v8 = vand.u32 4294901760, %v15072_v59  ;;  %v15749_v49 = vand.u32 4294901760, %v15074_v12 }
 0x6d4   : > { %v7776_v63 = vand.u32 4294901760, %v7775_v44 }
 0x6d5   : > { %11130 = vmatpush1.bf16.msra.mxu0 %v16337_v24  ;;  %11274 = vmatpush3.bf16.msra.mxu1 %v16338_v1  ;;  %v15018_v24 = vpack.c.bf16 %v7635_v30, %v7632_v4  ;;  %v7612_v1 = vld [vmem:[#allocation10 + $0x10] sm:$0xff]  ;;  %v15761_v4 = vand.u32 4294901760, %v15044_v9 }
 0x6d6   : > { %11275 = vmatprep.subr.bf16.mxu0 %v16047_v0  ;;  %v7638_v62 = vand.u32 4294901760, %v7612_v1 }
 0x6d7   : > { %v7747_v10 = vsub.f32 %v15044_v9, %v15761_v4 }
 0x6d8   : > { %6941 = vmatmul.mubr.f32.vlgmr.msra.gmra.mrb[4].mxu0 %v16298_v45  ;;  %9761 = vmatmul.mubr.f32.vlgmr.msra.gmra.mrb[40].mxu1 %v16298_v45  ;;  %v15022_v45 = vpack.c.bf16 %v7641_v18, %v7638_v62  ;;  %v15042_v3 = vsub.f32 %v7612_v1, %v7638_v62 }
 0x6d9   : > { %9795 = vmatprep.mubr.msk.f32.mxu0 %vm11841_vm11, %v16048_v43  ;;  %11277 = vmatpush3.bf16.msra.mxu0 %v15018_v24  ;;  %v7748_v18 = vand.u32 4294901760, %v7747_v10  ;;  %v15751_v10 = vand.u32 4294901760, %v15070_v57 }
 0x6da   : > { %11278 = vmatprep.subr.bf16.mxu0 %v16047_v0  ;;  %v15762_v38 = vand.u32 4294901760, %v15042_v3 }
 0x6db   : > { %v7817_v50 = vsub.f32 %v15070_v57, %v15751_v10 }
 0x6dc   : > { %v7740_v1 = vsub.f32 %v15042_v3, %v15762_v38 }
 0x6dd   : > { %11280 = vmatpush3.bf16.msra.mxu0 %v15022_v45  ;;  %v7818_v21 = vand.u32 4294901760, %v7817_v50 }
 0x6de   : > { %11281 = vmatprep.subr.bf16.mxu0 %v16047_v0  ;;  %v7741_v62 = vand.u32 4294901760, %v7740_v1 }
 0x6e0   : > { %v15102_v35 = vpack.c.bf16 %v7748_v18, %v7741_v62 }
 0x6e1   : > { %11283 = vmatpush3.bf16.msra.mxu0 %v15026_v31 }
 0x6e2   : > { %11284 = vmatprep.subr.bf16.mxu0 %v16047_v0 }
 0x6e5   : > { %11286 = vmatpush3.bf16.msra.mxu0 %v15030_v60 }
 0x6e6   : > { %11287 = vmatprep.subr.bf16.mxu0 %v16047_v0 }
 0x6e9   : > { %11289 = vmatpush3.bf16.msra.mxu0 %v15034_v34 }
 0x6ea   : > { %11290 = vmatprep.subr.bf16.mxu0 %v16047_v0 }
 0x6eb   : > { %v6022_v27 = vpop.f32.mrb[38].mxu1 }
 0x6ec   : > { %v15016_v29 = vadd.f32 %v6022_v27, %v5936_v39  ;;  %v9552_v33 = vpop.f32.mrb[39].mxu1  ;;  %v15068_v39 = vsub.f32 %v7622_v6, %v7668_v52  ;;  %v7733_v27 = vsub.f32 %v15040_v37, %v15763_v48  ;;  %v15122_v6 = vpack.c.bf16 %v7776_v63, %v7769_v54 }
 0x6ed   : > { %11292 = vmatpush3.bf16.msra.mxu0 %v15058_v22  ;;  %v7727_v33 = vand.u32 4294901760, %v7726_v55  ;;  %v7790_v52 = vand.u32 4294901760, %v7789_v46  ;;  %v7796_v55 = vsub.f32 %v15060_v26, %v15754_v7  ;;  %v7824_v54 = vsub.f32 %v15072_v59, %v15750_v8 }
 0x6ee   : > { %11293 = vmatprep.subr.bf16.mxu0 %v16047_v0  ;;  %v7734_v17 = vand.u32 4294901760, %v7733_v27  ;;  %v7803_v27 = vsub.f32 %v15062_v42, %v15753_v47  ;;  %v15752_v1 = vand.u32 4294901760, %v15068_v39  ;;  %v7831_v63 = vsub.f32 %v15074_v12, %v15749_v49  ;;  %v16409_v49 = vld [vmem:[#allocation18_spill] sm:$0xff] }
 0x6ef   : > { %v15132_v14 = vpack.c.bf16 %v7790_v52, %v7783_v40  ;;  %v7825_v53 = vand.u32 4294901760, %v7824_v54  ;;  %v11324_v52 = vpack.c.bf16 %v15040_v37, %v15038_v61  ;;  %v11342_v50 = vpack.c.bf16 %v15070_v57, %v15068_v39  ;;  %v16407_v54 = vld [vmem:[#allocation19_spill] sm:$0xff] }
 0x6f0   : > { %v15091_v30 = vpack.c.bf16 %v7734_v17, %v7727_v33  ;;  %v7797_v33 = vand.u32 4294901760, %v7796_v55  ;;  %v7804_v17 = vand.u32 4294901760, %v7803_v27  ;;  %v7810_v18 = vsub.f32 %v15068_v39, %v15752_v1 }
 0x6f1   : > { %11295 = vmatpush3.bf16.msra.mxu0 %v15066_v16  ;;  %v7832_v46 = vand.u32 4294901760, %v7831_v63  ;;  %v11327_v55 = vpack.c.bf16 %v15044_v9, %v15042_v3  ;;  %v11330_v27 = vpack.c.bf16 %v15048_v32, %v15046_v28  ;;  %v16408_v63 = vld [vmem:[#allocation45_spill] sm:$0xff] }
 0x6f2   : > { %11296 = vmatprep.subr.bf16.mxu0 %v16047_v0  ;;  %v15142_v62 = vpack.c.bf16 %v7804_v17, %v7797_v33  ;;  %v7811_v20 = vand.u32 4294901760, %v7810_v18  ;;  %v11333_v33 = vpack.c.bf16 %v15052_v13, %v15050_v36  ;;  %v11336_v17 = vpack.c.bf16 %v15056_v5, %v15054_v41 }
 0x6f3   : > { %v15160_v40 = vpack.c.bf16 %v7832_v46, %v7825_v53  ;;  %v11339_v18 = vpack.c.bf16 %v15062_v42, %v15060_v26  ;;  %v4518_v53 = vrot.slane %v16408_v63, %v16407_v54  ;;  %v4522_v8 = vrot.slane %v16408_v63, %v16409_v49 }
 0x6f4   : > { %v15152_v44 = vpack.c.bf16 %v7818_v21, %v7811_v20  ;;  %v6075_v21 = vld [vmem:[#allocation9 + $0x619] ss:$8 sm:$0x7] }
 0x6f5   : > { %11298 = vmatpush3.bf16.msra.mxu0 %v15079_v19  ;;  %v6080_v46 = vrot.slane %v6075_v21, %v16407_v54  ;;  %v6084_v10 = vrot.slane %v6075_v21, %v16409_v49  ;;  %v6088_v63 = vrot.slane %v6075_v21, %v16410_v11 }
 0x6f6   : > { %11299 = vmatprep.subr.bf16.mxu0 %v16047_v0 }
 0x6f7   : > { %v11428_v1 = vadd.f32 %v6080_v46, %v4518_v53  ;;  %v11430_v58 = vadd.f32 %v6084_v10, %v4522_v8  ;;  %v16418_v8 = vand.u32 4294901760, %v15050_v36  ;;  %v16424_v36 = vand.u32 4294901760, %v15068_v39 }
 0x7ab   : > { %v6942_v47 = vpop.f32.mrb[4].mxu0  ;;  %v7584_v7 = vpop.f32.mrb[40].mxu1 }
 0x7ac   : > { %v11429_v56 = vadd.f32 %v11428_v1, %v6942_v47  ;;  %v6944_v15 = vpop.f32.mrb[5].mxu0  ;;  %v9762_v25 = vpop.f32.mrb[41].mxu1  ;;  %v11432_v49 = vadd.f32 %v7584_v7, %v6088_v63 }
 0x7ad   : > { %v11431_v51 = vadd.f32 %v11430_v58, %v6944_v15 }
 0x7ae   : > { %v8417_v23 = vmul.f32 -1.442695, %v11429_v56 }
 0x7af   : > { %v8418_v4 = vmul.f32 -1.442695, %v11431_v51  ;;  %v11642_v51 = vld [vmem:[#allocation2 + $0x8] sm:$0xff] }
 0x7b0   : > { %11622 = vpow2.f32 %v8417_v23 }
 0x7b1   : > { %11624 = vpow2.f32 %v8418_v4 }
 0x7ba   : > { %v11623_v38 = vpop.eup %11622 }
 0x7bb   : > { %v7592_v48 = vadd.f32 1.0, %v11623_v38  ;;  %v11625_v54 = vpop.eup %11624 }
 0x7bc   : > { %v7599_v20 = vadd.f32 1.0, %v11625_v54 }
 0x7bd   : > { %11626 = vrcp.f32 %v7592_v48 }
 0x7be   : > { %11628 = vrcp.f32 %v7599_v20 }
 0x7c7   : > { %v11627_v53 = vpop.eup %11626 }
 0x7c8   : > { %v7602_v46 = vmul.f32 %v11627_v53, %v11432_v49  ;;  %v11629_v25 = vpop.eup %11628 }
 0x7c9   : > { %v7605_v56 = vsub.f32 1.0, %v11629_v25  ;;  %v7607_v4 = vmul.f32 %v11642_v51, %v11629_v25 }
 0x7ca   : > { %v7603_v47 = vadd.f32 %v7602_v46, %v15016_v29  ;;  %v16411_v29 = vpack.c.bf16 %v15074_v12, %v15072_v59 }
 0x7cc   : > { %11630 = vtanh.f32 %v7603_v47 }
 0x7d6   : > { %v11631_v15 = vpop.eup %11630 }
 0x7d7   : > { %v7606_v23 = vmul.f32 %v11631_v15, %v7605_v56 }
 0x7d9   : > { %v7608_v58 = vadd.f32 %v7607_v4, %v7606_v23 }
 0x7db   : > { %7609 = vst [vmem:[#allocation2 + $0x8] sm:$0xff] %v7608_v58  ;;  %v15186_v48 = vand.u32 4294901760, %v7608_v58 }
 0x7dd   : > { %v7713_v11 = vsub.f32 %v7608_v58, %v15186_v48 }
 0x7df   : > { %v7714_v38 = vand.u32 4294901760, %v7713_v11 }
 0x7e1   : > { %v7715_v7 = vsub.f32 %v7713_v11, %v7714_v38 }
 0x7e3   : > { %v7716_v1 = vand.u32 4294901760, %v7715_v7 }
 0x7e5   : > { %9796 = vmatmul.mubr.f32.vlgmr.msra.gmra.mrb[6].mxu0 %v7716_v1 }
 0x7e6   : > { %11301 = vmatpush3.bf16.msra.mxu0 %v15091_v30  ;;  %9830 = vmatprep.mubr.msk.f32.mxu0 %vm11841_vm11, %v16048_v43  ;;  %v16412_v30 = vand.u32 4294901760, %v15038_v61  ;;  %v16416_v61 = vand.u32 4294901760, %v15046_v28  ;;  %v16422_v28 = vand.u32 4294901760, %v15060_v26 }
 0x7e7   : > { %11302 = vmatprep.subr.bf16.mxu0 %v16047_v0 }
 0x7ea   : > { %11304 = vmatpush3.bf16.msra.mxu0 %v15102_v35  ;;  %v16413_v35 = vand.u32 4294901760, %v15040_v37  ;;  %v16417_v37 = vand.u32 4294901760, %v15048_v32  ;;  %v16423_v32 = vand.u32 4294901760, %v15062_v42 }
 0x7eb   : > { %11305 = vmatprep.subr.bf16.mxu0 %v16047_v0 }
 0x7ee   : > { %11307 = vmatpush3.bf16.msra.mxu0 %v15112_v2  ;;  %v11372_v2 = vpack.c.bf16 %v16413_v35, %v16412_v30 }
 0x7ef   : > { %11308 = vmatprep.subr.bf16.mxu0 %v16047_v0 }
 0x7f2   : > { %11310 = vmatpush3.bf16.msra.mxu0 %v15122_v6  ;;  %v16414_v6 = vand.u32 4294901760, %v15042_v3  ;;  %v16419_v3 = vand.u32 4294901760, %v15052_v13  ;;  %v16425_v13 = vand.u32 4294901760, %v15070_v57 }
 0x7f3   : > { %11311 = vmatprep.subr.bf16.mxu0 %v16047_v0 }
 0x7f6   : > { %11313 = vmatpush3.bf16.msra.mxu0 %v15132_v14  ;;  %v16415_v14 = vand.u32 4294901760, %v15044_v9  ;;  %v11381_v9 = vpack.c.bf16 %v16419_v3, %v16418_v8 }
 0x7f7   : > { %11314 = vmatprep.subr.bf16.mxu0 %v16047_v0 }
 0x7f8   : > { %v11375_v10 = vpack.c.bf16 %v16415_v14, %v16414_v6 }
 0x7fa   : > { %11316 = vmatpush3.bf16.msra.mxu0 %v15142_v62  ;;  %v11378_v62 = vpack.c.bf16 %v16417_v37, %v16416_v61 }
 0x7fb   : > { %11317 = vmatprep.subr.bf16.mxu0 %v16047_v0 }
 0x7fe   : > { %11319 = vmatpush3.bf16.msra.mxu0 %v15152_v44  ;;  %v16420_v44 = vand.u32 4294901760, %v15054_v41  ;;  %v16426_v41 = vand.u32 4294901760, %v15072_v59 }
 0x7ff   : > { %11320 = vmatprep.subr.bf16.mxu0 %v16047_v0 }
 0x802   : > { %11322 = vmatpush3.bf16.msra.mxu0 %v15160_v40  ;;  %v16421_v40 = vand.u32 4294901760, %v15056_v5  ;;  %v16427_v5 = vand.u32 4294901760, %v15074_v12 }
 0x803   : > { %11323 = vmatprep.subr.bf16.mxu0 %v16047_v0 }
 0x805   : > { %9831 = vmatmul.mubr.f32.vlgmr.msra.gmra.mrb[6].mxu0 %v15186_v48 }
 0x806   : > { %11325 = vmatpush3.bf16.msra.mxu0 %v11324_v52  ;;  %9865 = vmatprep.mubr.msk.f32.mxu0 %vm11841_vm11, %v16048_v43  ;;  %v11384_v52 = vpack.c.bf16 %v16421_v40, %v16420_v44 }
 0x807   : > { %11326 = vmatprep.subr.bf16.mxu0 %v16047_v0 }
 0x80a   : > { %11328 = vmatpush3.bf16.msra.mxu0 %v11327_v55  ;;  %v11387_v55 = vpack.c.bf16 %v16423_v32, %v16422_v28 }
 0x80b   : > { %11329 = vmatprep.subr.bf16.mxu0 %v16047_v0 }
 0x80e   : > { %11331 = vmatpush3.bf16.msra.mxu0 %v11330_v27  ;;  %v11390_v27 = vpack.c.bf16 %v16425_v13, %v16424_v36 }
 0x80f   : > { %11332 = vmatprep.subr.bf16.mxu0 %v16047_v0 }
 0x812   : > { %11334 = vmatpush3.bf16.msra.mxu0 %v11333_v33  ;;  %v11393_v33 = vpack.c.bf16 %v16427_v5, %v16426_v41 }
 0x813   : > { %11335 = vmatprep.subr.bf16.mxu0 %v16047_v0 }
 0x816   : > { %11337 = vmatpush3.bf16.msra.mxu0 %v11336_v17 }
 0x817   : > { %11338 = vmatprep.subr.bf16.mxu0 %v16047_v0 }
 0x81a   : > { %11340 = vmatpush3.bf16.msra.mxu0 %v11339_v18 }
 0x81b   : > { %11341 = vmatprep.subr.bf16.mxu0 %v16047_v0 }
 0x81e   : > { %11343 = vmatpush3.bf16.msra.mxu0 %v11342_v50 }
 0x81f   : > { %11344 = vmatprep.subr.bf16.mxu0 %v16047_v0 }
 0x822   : > { %11346 = vmatpush3.bf16.msra.mxu0 %v16411_v29 }
 0x823   : > { %11347 = vmatprep.subr.bf16.mxu0 %v16047_v0 }
 0x825   : > { %9866 = vmatmul.mubr.f32.vlgmr.msra.gmra.mrb[6].mxu0 %v7713_v11 }
 0x826   : > { %11349 = vmatpush3.bf16.msra.mxu0 %v15018_v24  ;;  %9900 = vmatprep.mubr.msk.f32.mxu0 %vm11841_vm11, %v16048_v43 }
 0x827   : > { %11350 = vmatprep.subr.bf16.mxu0 %v16047_v0 }
 0x82a   : > { %11352 = vmatpush3.bf16.msra.mxu0 %v15022_v45 }
 0x82b   : > { %11353 = vmatprep.subr.bf16.mxu0 %v16047_v0 }
 0x82e   : > { %11355 = vmatpush3.bf16.msra.mxu0 %v15026_v31 }
 0x82f   : > { %11356 = vmatprep.subr.bf16.mxu0 %v16047_v0 }
 0x832   : > { %11358 = vmatpush3.bf16.msra.mxu0 %v15030_v60 }
 0x833   : > { %11359 = vmatprep.subr.bf16.mxu0 %v16047_v0 }
 0x836   : > { %11361 = vmatpush3.bf16.msra.mxu0 %v15034_v34 }
 0x837   : > { %11362 = vmatprep.subr.bf16.mxu0 %v16047_v0 }
 0x83a   : > { %11364 = vmatpush3.bf16.msra.mxu0 %v15058_v22 }
 0x83b   : > { %11365 = vmatprep.subr.bf16.mxu0 %v16047_v0 }
 0x83e   : > { %11367 = vmatpush3.bf16.msra.mxu0 %v15066_v16 }
 0x83f   : > { %11368 = vmatprep.subr.bf16.mxu0 %v16047_v0 }
 0x842   : > { %11370 = vmatpush3.bf16.msra.mxu0 %v15079_v19 }
 0x843   : > { %11371 = vmatprep.subr.bf16.mxu0 %v16047_v0 }
 0x845   : > { %9901 = vmatmul.mubr.f32.vlgmr.msra.gmra.mrb[6].mxu0 %v7714_v38 }
 0x846   : > { %11373 = vmatpush3.bf16.msra.mxu0 %v11372_v2  ;;  %9935 = vmatprep.mubr.msk.f32.mxu0 %vm11841_vm11, %v16048_v43 }
 0x847   : > { %11374 = vmatprep.subr.bf16.mxu0 %v16047_v0 }
 0x84a   : > { %11376 = vmatpush3.bf16.msra.mxu0 %v11375_v10 }
 0x84b   : > { %11377 = vmatprep.subr.bf16.mxu0 %v16047_v0 }
 0x84e   : > { %11379 = vmatpush3.bf16.msra.mxu0 %v11378_v62 }
 0x84f   : > { %11380 = vmatprep.subr.bf16.mxu0 %v16047_v0 }
 0x852   : > { %11382 = vmatpush3.bf16.msra.mxu0 %v11381_v9 }
 0x853   : > { %11383 = vmatprep.subr.bf16.mxu0 %v16047_v0 }
 0x856   : > { %11385 = vmatpush3.bf16.msra.mxu0 %v11384_v52 }
 0x857   : > { %11386 = vmatprep.subr.bf16.mxu0 %v16047_v0 }
 0x85a   : > { %11388 = vmatpush3.bf16.msra.mxu0 %v11387_v55 }
 0x85b   : > { %11389 = vmatprep.subr.bf16.mxu0 %v16047_v0 }
 0x85e   : > { %11391 = vmatpush3.bf16.msra.mxu0 %v11390_v27 }
 0x85f   : > { %11392 = vmatprep.subr.bf16.mxu0 %v16047_v0 }
 0x862   : > { %11394 = vmatpush3.bf16.msra.mxu0 %v11393_v33 }
 0x863   : > { %11395 = vmatprep.subr.bf16.mxu0 %v16047_v0 }
 0x865   : > { %9936 = vmatmul.mubr.f32.vlgmr.msra.gmra.mrb[6].mxu0 %v15186_v48 }
 0x866   : > { %11397 = vmatpush3.bf16.msra.mxu0 %v15018_v24  ;;  %9970 = vmatprep.mubr.msk.f32.mxu0 %vm11841_vm11, %v16048_v43  ;;  %v8419_v24 = vld [vmem:[#allocation10 + $0x80] ss:$0 sm:$0xff] }
 0x867   : > { %11398 = vmatprep.subr.bf16.mxu0 %v16047_v0 }
 0x86a   : > { %11400 = vmatpush3.bf16.msra.mxu0 %v15022_v45 }
 0x86b   : > { %11401 = vmatprep.subr.bf16.mxu0 %v16047_v0 }
 0x86e   : > { %11403 = vmatpush3.bf16.msra.mxu0 %v15026_v31 }
 0x86f   : > { %11404 = vmatprep.subr.bf16.mxu0 %v16047_v0 }
 0x872   : > { %11406 = vmatpush3.bf16.msra.mxu0 %v15030_v60 }
 0x873   : > { %11407 = vmatprep.subr.bf16.mxu0 %v16047_v0 }
 0x876   : > { %11409 = vmatpush3.bf16.msra.mxu0 %v15034_v34 }
 0x877   : > { %11410 = vmatprep.subr.bf16.mxu0 %v16047_v0 }
 0x87a   : > { %11412 = vmatpush3.bf16.msra.mxu0 %v15058_v22  ;;  %v16428_v22 = vld [vmem:[#allocation17_spill] sm:$0xff] }
 0x87b   : > { %11413 = vmatprep.subr.bf16.mxu0 %v16047_v0 }
 0x87e   : > { %11415 = vmatpush3.bf16.msra.mxu0 %v15066_v16 }
 0x87f   : > { %11416 = vmatprep.subr.bf16.mxu0 %v16047_v0 }
 0x882   : > { %11418 = vmatpush3.bf16.msra.mxu0 %v15079_v19 }
 0x885   : > { %9971 = vmatmul.mubr.f32.vlgmr.msra.gmra.mrb[6].mxu0 %v15186_v48 }
 0x958   : > { %v8268_v45 = vpop.f32.mrb[6].mxu0 }
 0x959   : > { %v11433_v31 = vadd.f32 %v8419_v24, %v8268_v45  ;;  %v9972_v60 = vpop.f32.mrb[7].mxu0 }
 0x95b   : > { %8272 = vst [vmem:[%s234_s14] sm:$0xff] %v11433_v31  ;;  %8273 = vmax.xlane.f32.xlu1 %v11433_v31 }
 0x9e8   : > { %v8274_v34 = vpop.xlane.xlu1 %8273 }
 0x9e9   : > { %vm8275_vm13 = vcmp.eq.f32.partialorder %v11433_v31, %v8274_v34 }
 0x9ea   : > { %v8276_v26 = vsel %vm8275_vm13, %v16428_v22, 1073741824 }
 0x9eb   : > { %v8278_v42 = vshra.s32 %v8276_v26, 16  ;;  %v8277_v16 = vand.u32 65535, %v8276_v26 }
 0x9ed   : > { %v8280_v0 = vcvt.s32.f32 %v8278_v42  ;;  %v8279_v57 = vcvt.s32.f32 %v8277_v16 }
 0x9ef   : > { %8281 = vmin.xlane.f32.xlu0 %v8280_v0 }
 0xa7c   : > { %v8282_v39 = vpop.xlane.xlu0 %8281 }
 0xa7d   : > { %vm8283_vm14 = vcmp.eq.f32.partialorder %v8280_v0, %v8282_v39 }
 0xa7e   : > { %v8284_v59 = vsel %vm8283_vm14, %v8279_v57, inf }
 0xa7f   : > { %8285 = vmin.xlane.f32.xlu0 %v8284_v59 }
 0xa80   : > { %11768 = shalt.err (!%p11765_p1)
}
 0xa81   : > { %s11769_s19 = scalar_lea.hbm %s15330_s20, 128  ;;  %s11773_s5 = scalar_lea.hbm %s15375_s4, 1920 }
 0xa82   : > { %p11770_p11 = scmp.ne.s32.totalorder %s15330_s20, %s11769_s19  ;;  %p11774_p4 = scmp.lt.u32.totalorder %s15330_s20, %s15375_s4 }
 0xa83   : > { %p11775_p13 = scmp.lt.u32.totalorder %s11773_s5, %s11769_s19  ;;  %p11777_p8 = scmp.lt.u32.totalorder %s11769_s19, %s15330_s20 }
 0xa84   : > { %p11771_p10 = pnand %p11770_p11, %p16429_p12 }
 0xa85   : > { %p11776_p7 = por %p11775_p13, %p11774_p4 }
 0xa86   : > { %p11772_p3 = pneg %p11771_p10 }
 0xa87   : > { %p11778_p0 = por %p11777_p8, %p11776_p7 }
 0xa89   : > { %p11779_p2 = pnand %p11778_p0, %p11772_p3 }
 0xa8b   : > { %11782 = shalt.err (!%p11779_p2)
}
 0xa8c   : > { %11534 = dma.vmem_to_hbm [thread:$0]  (%p16429_p12), %s8310_s11, 128, %s15330_s20, %s8296_s22   ;;  %v8288_v12 = vcvt.f32.s32 %v8282_v39 }
 0xa8e   : > { %v8289_v17 = vshll.u32 %v8288_v12, 16 }
 0xb0c   : > { %v8286_v19 = vpop.xlane.xlu0 %8285 }
 0xb0d   : > { %v8287_v18 = vcvt.f32.s32 %v8286_v19 }
 0xb0f   : > { %v8290_v50 = vadd.s32 %v8289_v17, %v8287_v18 }
 0xb11   : > { %vm8291_vm15 = vcmp.eq.s32.totalorder %v16428_v22, %v8290_v50 }
 0xb12   : > { %v8420_v20 = vsel %vm8291_vm15, 1.0, %v16048_v43 }
 0xb13   : > { %8294 = vst.msk [vmem:[#allocation3] sm:$0xff] %vm545_vm12, %v8420_v20 }
 0xb14 PF: > { %p11561_p6 = scmp.ge.s32.totalorder %s11829_s18, 2  ;;  %s8321_s14 = sand.u32 1, %s11817_s15  }
 0xb15   : > { %p16430_p9 = scmp.ne.s32.totalorder %s15766_s26, 0  ;;  %s8322_s25 = scalar_lea.sflag [#allocation6], %s8321_s14 }
 0xb17   : > { %p11550_p5 = pnand %p11561_p6, %p16430_p9 }
 0xb19   : > { %11812 = dma.done.wait (!%p11550_p5), %s8322_s25, 128  }
 0xb1a   : > { %11814 = vsyncadd (!%p11550_p5), %s8322_s25, 4294967168  ;;  %p17_p12 = scmp.ge.s32.totalorder %s11894_s21, 17   ;;  %s16431_s15 = smov %s11821_s16 }
 0xb1b   : > { %s16432_s16 = smov %s11825_s17  ;;  %s16433_s17 = smov %s11905_s24 }
 0xb1c   : > { %s16434_s18 = smov %s11894_s21  ;;  %19 = sbr.rel (!%p17_p12) target bundleno = 6 (0x6), region = 95 }
 0xb23   :  { %8327 = vsyncpa [#allocation5], 1 }
 0xb24   :  { %8329 = vsyncpa [#allocation5 + $0x1], 1 }
 0xb25   :  { %8330 = vsyncpa [#allocation8], 1 }
 0xb26   :  { %8331 = vsyncpa [#allocation11], 1 }
 0xb27   :  { %8332 = vsyncpa [#allocation6], 1 }
 0xb28   :  { %8334 = vsyncpa [#allocation6 + $0x1], 1 }

</bundles_post_ra>
